<compile_context>
chip_gen: v5e
topology: v5e:2x2
jax: 0.10.0
libtpu: 0.0.40
codegen_flags: <defaults>
</compile_context>

<pallas_src>
import math

import jax
import jax.numpy as jnp
from jax.experimental import pallas as pl
from jax.experimental.pallas import tpu as pltpu

# Small synthetic BertConfig (hidden_size == embedding_dim, all_head_size == manager.hidden_dim).
EMB_DIM = 32       # bert_config.hidden_size / embedding_dim
HIDDEN = 32        # manager.hidden_dim == all_head_size
NUM_HEADS = 4
HEAD_DIM = HIDDEN // NUM_HEADS
INTER = 64         # intermediate_size
LN_EPS = 1e-12

# Row indices inside the packed [8, HIDDEN] "vector" slab.
VEC_B_AO, VEC_LN1_G, VEC_LN1_B, VEC_B_OUT, VEC_LN2_G, VEC_LN2_B, VEC_QW = range(7)


def _round_up(n, m):
    return ((n + m - 1) // m) * m


def _layernorm(x, gamma, beta):
    mu = jnp.mean(x, axis=-1, keepdims=True)
    var = jnp.mean((x - mu) ** 2, axis=-1, keepdims=True)
    return (x - mu) * jax.lax.rsqrt(var + LN_EPS) * gamma + beta


def _gelu(x):
    # tanh-approximate GELU ("gelu_new").
    # TODO(synk): swap to exact erf GELU if the reference BertLayer uses the erf-based activation.
    c = math.sqrt(2.0 / math.pi)
    return 0.5 * x * (1.0 + jnp.tanh(c * (x + 0.044715 * x * x * x)))


def encoder_kernel(x_ref, mask_ref,
                   wbig_ref, bbig_ref,
                   wao_ref, wi_ref, bi_ref, wo_ref, vec_ref,
                   bert_out_ref, repr_ref):
    f32 = jnp.float32
    TB, L = mask_ref.shape
    H = wao_ref.shape[0]
    HD = H // NUM_HEADS
    TBL = TB * L

    x = x_ref[...]                     # [TB*L, E]
    mask = mask_ref[...]               # [TB, L]
    vec = vec_ref[...]                 # [8, H] packed per-feature vectors

    # ---- fused project + Q/K/V: one lane-dense [E, 4H]=[32,128] matmul -> h|q|k|v
    hqkv = jnp.dot(x, wbig_ref[...], preferred_element_type=f32) + bbig_ref[...]   # [TB*L, 4H]
    h = hqkv[:, 0 * H:1 * H]
    q = hqkv[:, 1 * H:2 * H]
    k = hqkv[:, 2 * H:3 * H]
    v = hqkv[:, 3 * H:4 * H]

    # ---- item-batched multi-head self-attention with additive mask
    q3 = q.reshape(TB, L, H)           # leading-dim split only (layout preserving)
    k3 = k.reshape(TB, L, H)
    v3 = v.reshape(TB, L, H)
    bias = ((mask - 1.0) * 10000.0)[:, None, :]          # [TB, 1, L]
    inv_sqrt_hd = 1.0 / math.sqrt(HD)

    ctx_heads = []
    for hh in range(NUM_HEADS):        # static unroll; each einsum batches all TB items at once
        sl = slice(hh * HD, (hh + 1) * HD)
        qh, kh, vh = q3[:, :, sl], k3[:, :, sl], v3[:, :, sl]
        sc = jnp.einsum('bqd,bkd->bqk', qh, kh,
                        preferred_element_type=f32) * inv_sqrt_hd + bias
        sc = sc - jnp.max(sc, axis=-1, keepdims=True)
        e = jnp.exp(sc)
        p = e * pl.reciprocal(jnp.sum(e, axis=-1, keepdims=True), approx=True)
        ctx_heads.append(jnp.einsum('bqk,bkd->bqd', p, vh, preferred_element_type=f32))
    ctx = jnp.concatenate(ctx_heads, axis=-1).reshape(TBL, H)                        # [TB*L, H]

    # ---- BertSelfOutput: dense + residual + LayerNorm
    attn_out = jnp.dot(ctx, wao_ref[...], preferred_element_type=f32) \
        + vec[VEC_B_AO:VEC_B_AO + 1, :]
    y = _layernorm(attn_out + h,
                   vec[VEC_LN1_G:VEC_LN1_G + 1, :], vec[VEC_LN1_B:VEC_LN1_B + 1, :])

    # ---- BertIntermediate + BertOutput: GELU FFN + residual + LayerNorm
    inter = _gelu(jnp.dot(y, wi_ref[...], preferred_element_type=f32) + bi_ref[...])
    ffn = jnp.dot(inter, wo_ref[...], preferred_element_type=f32) \
        + vec[VEC_B_OUT:VEC_B_OUT + 1, :]
    out = _layernorm(ffn + y,
                     vec[VEC_LN2_G:VEC_LN2_G + 1, :], vec[VEC_LN2_B:VEC_LN2_B + 1, :])  # [TB*L, H]

    bert_out_ref[...] = out

    # ---- attentive pooling: scaled_dp_attention(query_words, out, out, attn_mask)
    out3 = out.reshape(TB, L, H)
    qw = vec[VEC_QW:VEC_QW + 1, :]                                       # [1, H]
    sc = jnp.sum(out3 * qw, axis=-1) * (1.0 / math.sqrt(H))              # [TB, L]
    sc = jnp.where(mask > 0.5, sc, -1e9)    # robust vs. float == comparison on the mask
    sc = sc - jnp.max(sc, axis=-1, keepdims=True)
    e = jnp.exp(sc)
    pool = e * pl.reciprocal(jnp.sum(e, axis=-1, keepdims=True), approx=True)        # [TB, L]
    repr_ref[...] = jnp.einsum('bqk,bkd->bqd', pool[:, None, :], out3,
                               preferred_element_type=f32)                            # [TB, 1, H]


def pack_params(p):
    """Fold the projection into Q/K/V and pack small vectors into one slab (host side, exact)."""
    wp, bp = p["w_proj"], p["b_proj"]
    w_big = jnp.concatenate(
        [wp, wp @ p["w_q"], wp @ p["w_k"], wp @ p["w_v"]], axis=1)                 # [E, 4H]=[32,128]
    b_big = jnp.concatenate(
        [bp,
         bp @ p["w_q"] + p["b_q"],
         bp @ p["w_k"] + p["b_k"],
         bp @ p["w_v"] + p["b_v"]], axis=1)                                         # [1, 4H]
    vecs = jnp.concatenate(
        [p["b_attn_out"], p["ln1_g"], p["ln1_b"], p["b_out"], p["ln2_g"], p["ln2_b"],
         p["query_words"], jnp.zeros((1, HIDDEN), jnp.float32)], axis=0)            # [8, H]
    return (w_big.astype(jnp.float32), b_big.astype(jnp.float32),
            p["w_attn_out"], p["w_inter"], p["b_inter"], p["w_out"],
            vecs.astype(jnp.float32))


def transformer_encoder(news_embedding, attn_mask, params, block_items=128):
    B, N, L, E = news_embedding.shape
    BN = B * N

    # TB news items per grid step (multiple of 8 so block sublane dims stay (8,128)-aligned).
    # Capped at 128: a few MiB per-step working set, safe on v7x's smaller VMEM as well.
    TB = _round_up(min(block_items, _round_up(BN, 8)), 8)
    BN_pad = _round_up(BN, TB)
    grid = (BN_pad // TB,)

    x = news_embedding.reshape(BN, L, E).astype(jnp.float32)
    mask = attn_mask.reshape(BN, L).astype(jnp.float32)
    if BN_pad != BN:
        # padded items get an all-zero mask -> finite (uniform) softmax weights; outputs discarded.
        x = jnp.pad(x, ((0, BN_pad - BN), (0, 0), (0, 0)))
        mask = jnp.pad(mask, ((0, BN_pad - BN), (0, 0)))
    x2 = x.reshape(BN_pad * L, E)

    weights = pack_params(params)

    def full_spec(arr):
        nd = arr.ndim
        return pl.BlockSpec(arr.shape, lambda i, _nd=nd: (0,) * _nd)  # resident, not re-DMA'd

    in_specs = [
        pl.BlockSpec((TB * L, E), lambda i: (i, 0)),     # TB news items per grid step
        pl.BlockSpec((TB, L), lambda i: (i, 0)),
    ] + [full_spec(w) for w in weights]

    out_specs = [
        pl.BlockSpec((TB * L, HIDDEN), lambda i: (i, 0)),
        pl.BlockSpec((TB, 1, HIDDEN), lambda i: (i, 0, 0)),
    ]
    out_shape = [
        jax.ShapeDtypeStruct((BN_pad * L, HIDDEN), jnp.float32),
        jax.ShapeDtypeStruct((BN_pad, 1, HIDDEN), jnp.float32),
    ]

    bert_flat, repr_flat = pl.pallas_call(
        encoder_kernel,
        grid=grid,
        in_specs=in_specs,
        out_specs=out_specs,
        out_shape=out_shape,
        compiler_params=pltpu.CompilerParams(dimension_semantics=("parallel",)),
    )(x2, mask, *weights)

    bert_out = bert_flat[:BN * L].reshape(B, N, L, HIDDEN)
    news_repr = repr_flat[:BN, 0, :].reshape(B, N, HIDDEN)
    return bert_out, news_repr


def init_params(key):
    ks = jax.random.split(key, 16)
    std = 0.02

    def w(k, shape):
        return (jax.random.normal(k, shape) * std).astype(jnp.float32)

    def b(k, dim):
        return (jax.random.normal(k, (1, dim)) * 0.01).astype(jnp.float32)

    xavier_std = math.sqrt(2.0 / (1 + HIDDEN))
    return {
        "w_proj": w(ks[0], (EMB_DIM, HIDDEN)), "b_proj": b(ks[8], HIDDEN),
        "w_q": w(ks[1], (HIDDEN, HIDDEN)), "b_q": b(ks[9], HIDDEN),
        "w_k": w(ks[2], (HIDDEN, HIDDEN)), "b_k": b(ks[10], HIDDEN),
        "w_v": w(ks[3], (HIDDEN, HIDDEN)), "b_v": b(ks[11], HIDDEN),
        "w_attn_out": w(ks[4], (HIDDEN, HIDDEN)), "b_attn_out": b(ks[12], HIDDEN),
        "ln1_g": jnp.ones((1, HIDDEN), jnp.float32), "ln1_b": b(ks[13], HIDDEN),
        "w_inter": w(ks[5], (HIDDEN, INTER)), "b_inter": b(ks[14], INTER),
        "w_out": w(ks[6], (INTER, HIDDEN)), "b_out": b(ks[15], HIDDEN),
        "ln2_g": jnp.ones((1, HIDDEN), jnp.float32), "ln2_b": jnp.zeros((1, HIDDEN), jnp.float32),
        "query_words": (jax.random.normal(ks[7], (1, HIDDEN)) * xavier_std).astype(jnp.float32),
    }


def reference_forward(news_embedding, attn_mask, p):
    """Pure-JAX reference using the UNFUSED weights (validates the host-side weight folding too)."""
    B, N, L, E = news_embedding.shape
    x = news_embedding.reshape(-1, L, E).astype(jnp.float32)
    mask = attn_mask.reshape(-1, L).astype(jnp.float32)

    h = x @ p["w_proj"] + p["b_proj"]
    q = h @ p["w_q"] + p["b_q"]
    k = h @ p["w_k"] + p["b_k"]
    v = h @ p["w_v"] + p["b_v"]

    def split(t):
        return t.reshape(-1, L, NUM_HEADS, HEAD_DIM).transpose(0, 2, 1, 3)

    qh, kh, vh = split(q), split(k), split(v)
    bias = ((mask - 1.0) * 10000.0)[:, None, None, :]
    scores = jnp.einsum("bhqd,bhkd->bhqk", qh, kh) / math.sqrt(HEAD_DIM) + bias
    probs = jax.nn.softmax(scores, axis=-1)
    ctx = jnp.einsum("bhqk,bhkd->bhqd", probs, vh).transpose(0, 2, 1, 3).reshape(-1, L, HIDDEN)

    attn_out = ctx @ p["w_attn_out"] + p["b_attn_out"]
    y = _layernorm(attn_out + h, p["ln1_g"], p["ln1_b"])
    inter = _gelu(y @ p["w_inter"] + p["b_inter"])
    ffn = inter @ p["w_out"] + p["b_out"]
    out = _layernorm(ffn + y, p["ln2_g"], p["ln2_b"])

    sc = jnp.einsum("h,blh->bl", p["query_words"][0], out) / math.sqrt(HIDDEN)
    sc = jnp.where(mask > 0.5, sc, -1e9)
    pool = jax.nn.softmax(sc, axis=-1)
    repr_ = jnp.einsum("bl,blh->bh", pool, out)
    return out.reshape(B, N, L, HIDDEN), repr_.reshape(B, N, HIDDEN)


if __name__ == "__main__":
    key = jax.random.PRNGKey(0)
    k_param, k_x = jax.random.split(key)

    batch, news_num, signal_length = 2, 3, 8
    params = init_params(k_param)

    news_embedding = jax.random.normal(
        k_x, (batch, news_num, signal_length, EMB_DIM), dtype=jnp.float32)

    # attention mask: per-item variable lengths (1 = valid token, 0 = pad)
    lengths = jnp.array([8, 5, 6, 7, 8, 4], dtype=jnp.int32).reshape(batch, news_num)
    pos = jnp.arange(signal_length)[None, None, :]
    attn_mask = (pos < lengths[:, :, None]).astype(jnp.float32)

    bert_out, news_repr = transformer_encoder(news_embedding, attn_mask, params)
    bert_out = jax.block_until_ready(bert_out)
    news_repr = jax.block_until_ready(news_repr)

    ref_out, ref_repr = reference_forward(news_embedding, attn_mask, params)

    assert bert_out.shape == (batch, news_num, signal_length, HIDDEN)
    assert news_repr.shape == (batch, news_num, HIDDEN)
    # Tolerance 2e-3: approx-reciprocal softmax denominators + host-side weight folding reassociate
    # f32 rounding slightly vs. the unfused reference.
    assert jnp.allclose(bert_out, ref_out, rtol=2e-3, atol=2e-3)
    assert jnp.allclose(news_repr, ref_repr, rtol=2e-3, atol=2e-3)

    print("KERNEL_OK")
</pallas_src>

<mosaic_0001>
module attributes {stable_mosaic.version = 11 : i64} {
  func.func @encoder_kernel(%arg0: i32, %arg1: memref<64x32xf32, #tpu.memory_space<vmem>>, %arg2: memref<8x8xf32, #tpu.memory_space<vmem>>, %arg3: memref<32x128xf32, #tpu.memory_space<vmem>>, %arg4: memref<1x128xf32, #tpu.memory_space<vmem>>, %arg5: memref<32x32xf32, #tpu.memory_space<vmem>>, %arg6: memref<32x64xf32, #tpu.memory_space<vmem>>, %arg7: memref<1x64xf32, #tpu.memory_space<vmem>>, %arg8: memref<64x32xf32, #tpu.memory_space<vmem>>, %arg9: memref<8x32xf32, #tpu.memory_space<vmem>>, %arg10: memref<64x32xf32, #tpu.memory_space<vmem>>, %arg11: memref<8x1x32xf32, #tpu.memory_space<vmem>>) attributes {dimension_semantics = [#tpu.dimension_semantics<parallel>], iteration_bounds = array<i64: 1>, scalar_prefetch = 0 : i64, scratch_operands = 0 : i64, tpu.core_type = #tpu.core_type<tc>, window_params = [{transform_indices = @transform_0, window_bounds = array<i64: 64, 32>}, {transform_indices = @transform_1, window_bounds = array<i64: 8, 8>}, {pipeline_mode = #tpu.pipeline_mode<synchronous>, transform_indices = @transform_2, window_bounds = array<i64: 32, 128>}, {pipeline_mode = #tpu.pipeline_mode<synchronous>, transform_indices = @transform_3, window_bounds = array<i64: 1, 128>}, {pipeline_mode = #tpu.pipeline_mode<synchronous>, transform_indices = @transform_4, window_bounds = array<i64: 32, 32>}, {pipeline_mode = #tpu.pipeline_mode<synchronous>, transform_indices = @transform_5, window_bounds = array<i64: 32, 64>}, {pipeline_mode = #tpu.pipeline_mode<synchronous>, transform_indices = @transform_6, window_bounds = array<i64: 1, 64>}, {pipeline_mode = #tpu.pipeline_mode<synchronous>, transform_indices = @transform_7, window_bounds = array<i64: 64, 32>}, {pipeline_mode = #tpu.pipeline_mode<synchronous>, transform_indices = @transform_8, window_bounds = array<i64: 8, 32>}, {transform_indices = @transform_9, window_bounds = array<i64: 64, 32>}, {transform_indices = @transform_10, window_bounds = array<i64: 8, 1, 32>}]} {
    %c0 = arith.constant 0 : index
    %c0_0 = arith.constant 0 : index
    %0 = vector.load %arg1[%c0, %c0_0] : memref<64x32xf32, #tpu.memory_space<vmem>>, vector<64x32xf32>
    %c0_1 = arith.constant 0 : index
    %c0_2 = arith.constant 0 : index
    %1 = vector.load %arg2[%c0_1, %c0_2] : memref<8x8xf32, #tpu.memory_space<vmem>>, vector<8x8xf32>
    %c0_3 = arith.constant 0 : index
    %c0_4 = arith.constant 0 : index
    %2 = vector.load %arg9[%c0_3, %c0_4] : memref<8x32xf32, #tpu.memory_space<vmem>>, vector<8x32xf32>
    %c0_5 = arith.constant 0 : index
    %c0_6 = arith.constant 0 : index
    %3 = vector.load %arg3[%c0_5, %c0_6] : memref<32x128xf32, #tpu.memory_space<vmem>>, vector<32x128xf32>
    %cst = arith.constant dense<0.000000e+00> : vector<64x128xf32>
    %4 = tpu.matmul %0, %3, %cst {dimension_numbers = #tpu.dot_dimension_numbers<[1], [0], [0], [1], [0, 0, 1, 1], [], []>} : vector<64x32xf32>, vector<32x128xf32>, vector<64x128xf32> -> vector<64x128xf32>
    %c0_7 = arith.constant 0 : index
    %c0_8 = arith.constant 0 : index
    %5 = vector.load %arg4[%c0_7, %c0_8] : memref<1x128xf32, #tpu.memory_space<vmem>>, vector<1x128xf32>
    %6 = vector.broadcast %5 : vector<1x128xf32> to vector<64x128xf32>
    %7 = arith.addf %4, %6 : vector<64x128xf32>
    %8 = vector.extract_strided_slice %7 {offsets = [0, 0], sizes = [64, 32], strides = [1, 1]} : vector<64x128xf32> to vector<64x32xf32>
    %9 = vector.extract_strided_slice %7 {offsets = [0, 32], sizes = [64, 32], strides = [1, 1]} : vector<64x128xf32> to vector<64x32xf32>
    %10 = vector.extract_strided_slice %7 {offsets = [0, 64], sizes = [64, 32], strides = [1, 1]} : vector<64x128xf32> to vector<64x32xf32>
    %11 = vector.extract_strided_slice %7 {offsets = [0, 96], sizes = [64, 32], strides = [1, 1]} : vector<64x128xf32> to vector<64x32xf32>
    %12 = vector.shape_cast %9 : vector<64x32xf32> to vector<8x8x32xf32>
    %13 = vector.shape_cast %10 : vector<64x32xf32> to vector<8x8x32xf32>
    %14 = vector.shape_cast %11 : vector<64x32xf32> to vector<8x8x32xf32>
    %cst_9 = arith.constant 1.000000e+00 : f32
    %15 = vector.broadcast %cst_9 : f32 to vector<8x8xf32>
    %16 = arith.subf %1, %15 : vector<8x8xf32>
    %cst_10 = arith.constant 1.000000e+04 : f32
    %17 = vector.broadcast %cst_10 : f32 to vector<8x8xf32>
    %18 = arith.mulf %16, %17 : vector<8x8xf32>
    %19 = vector.shape_cast %18 : vector<8x8xf32> to vector<8x1x8xf32>
    %20 = vector.extract_strided_slice %12 {offsets = [0, 0, 0], sizes = [8, 8, 8], strides = [1, 1, 1]} : vector<8x8x32xf32> to vector<8x8x8xf32>
    %21 = vector.extract_strided_slice %13 {offsets = [0, 0, 0], sizes = [8, 8, 8], strides = [1, 1, 1]} : vector<8x8x32xf32> to vector<8x8x8xf32>
    %22 = vector.extract_strided_slice %14 {offsets = [0, 0, 0], sizes = [8, 8, 8], strides = [1, 1, 1]} : vector<8x8x32xf32> to vector<8x8x8xf32>
    "tpu.trace_start"() <{level = 10 : i32, message = "bqd,bkd->bqk"}> : () -> ()
    %cst_11 = arith.constant dense<0.000000e+00> : vector<8x8x8xf32>
    %23 = tpu.matmul %20, %21, %cst_11 {dimension_numbers = #tpu.dot_dimension_numbers<[2], [2], [1], [1], [0, 0, 0, 1, 1, 1], [0], [0]>} : vector<8x8x8xf32>, vector<8x8x8xf32>, vector<8x8x8xf32> -> vector<8x8x8xf32>
    "tpu.trace_stop"() : () -> ()
    %cst_12 = arith.constant 0.353553385 : f32
    %24 = vector.broadcast %cst_12 : f32 to vector<8x8x8xf32>
    %25 = arith.mulf %23, %24 : vector<8x8x8xf32>
    %26 = vector.broadcast %19 : vector<8x1x8xf32> to vector<8x8x8xf32>
    %27 = arith.addf %25, %26 : vector<8x8x8xf32>
    %cst_13 = arith.constant dense<0xFF800000> : vector<8x8xf32>
    %28 = vector.multi_reduction <maximumf>, %27, %cst_13 [2] : vector<8x8x8xf32> to vector<8x8xf32>
    %29 = vector.shape_cast %28 : vector<8x8xf32> to vector<8x8x1xf32>
    %30 = vector.broadcast %29 : vector<8x8x1xf32> to vector<8x8x8xf32>
    %31 = arith.subf %27, %30 : vector<8x8x8xf32>
    %32 = math.exp %31 : vector<8x8x8xf32>
    %cst_14 = arith.constant dense<0.000000e+00> : vector<8x8xf32>
    %33 = vector.multi_reduction <add>, %32, %cst_14 [2] : vector<8x8x8xf32> to vector<8x8xf32>
    %34 = vector.shape_cast %33 : vector<8x8xf32> to vector<8x8x1xf32>
    %35 = tpu.reciprocal %34 {approx = true} : vector<8x8x1xf32> -> vector<8x8x1xf32>
    %36 = vector.broadcast %35 : vector<8x8x1xf32> to vector<8x8x8xf32>
    %37 = arith.mulf %32, %36 : vector<8x8x8xf32>
    "tpu.trace_start"() <{level = 10 : i32, message = "bqk,bkd->bqd"}> : () -> ()
    %cst_15 = arith.constant dense<0.000000e+00> : vector<8x8x8xf32>
    %38 = tpu.matmul %37, %22, %cst_15 {dimension_numbers = #tpu.dot_dimension_numbers<[2], [1], [1], [2], [0, 0, 0, 1, 1, 2], [0], [0]>} : vector<8x8x8xf32>, vector<8x8x8xf32>, vector<8x8x8xf32> -> vector<8x8x8xf32>
    "tpu.trace_stop"() : () -> ()
    %39 = vector.extract_strided_slice %12 {offsets = [0, 0, 8], sizes = [8, 8, 8], strides = [1, 1, 1]} : vector<8x8x32xf32> to vector<8x8x8xf32>
    %40 = vector.extract_strided_slice %13 {offsets = [0, 0, 8], sizes = [8, 8, 8], strides = [1, 1, 1]} : vector<8x8x32xf32> to vector<8x8x8xf32>
    %41 = vector.extract_strided_slice %14 {offsets = [0, 0, 8], sizes = [8, 8, 8], strides = [1, 1, 1]} : vector<8x8x32xf32> to vector<8x8x8xf32>
    "tpu.trace_start"() <{level = 10 : i32, message = "bqd,bkd->bqk"}> : () -> ()
    %cst_16 = arith.constant dense<0.000000e+00> : vector<8x8x8xf32>
    %42 = tpu.matmul %39, %40, %cst_16 {dimension_numbers = #tpu.dot_dimension_numbers<[2], [2], [1], [1], [0, 0, 0, 1, 1, 1], [0], [0]>} : vector<8x8x8xf32>, vector<8x8x8xf32>, vector<8x8x8xf32> -> vector<8x8x8xf32>
    "tpu.trace_stop"() : () -> ()
    %cst_17 = arith.constant 0.353553385 : f32
    %43 = vector.broadcast %cst_17 : f32 to vector<8x8x8xf32>
    %44 = arith.mulf %42, %43 : vector<8x8x8xf32>
    %45 = vector.broadcast %19 : vector<8x1x8xf32> to vector<8x8x8xf32>
    %46 = arith.addf %44, %45 : vector<8x8x8xf32>
    %cst_18 = arith.constant dense<0xFF800000> : vector<8x8xf32>
    %47 = vector.multi_reduction <maximumf>, %46, %cst_18 [2] : vector<8x8x8xf32> to vector<8x8xf32>
    %48 = vector.shape_cast %47 : vector<8x8xf32> to vector<8x8x1xf32>
    %49 = vector.broadcast %48 : vector<8x8x1xf32> to vector<8x8x8xf32>
    %50 = arith.subf %46, %49 : vector<8x8x8xf32>
    %51 = math.exp %50 : vector<8x8x8xf32>
    %cst_19 = arith.constant dense<0.000000e+00> : vector<8x8xf32>
    %52 = vector.multi_reduction <add>, %51, %cst_19 [2] : vector<8x8x8xf32> to vector<8x8xf32>
    %53 = vector.shape_cast %52 : vector<8x8xf32> to vector<8x8x1xf32>
    %54 = tpu.reciprocal %53 {approx = true} : vector<8x8x1xf32> -> vector<8x8x1xf32>
    %55 = vector.broadcast %54 : vector<8x8x1xf32> to vector<8x8x8xf32>
    %56 = arith.mulf %51, %55 : vector<8x8x8xf32>
    "tpu.trace_start"() <{level = 10 : i32, message = "bqk,bkd->bqd"}> : () -> ()
    %cst_20 = arith.constant dense<0.000000e+00> : vector<8x8x8xf32>
    %57 = tpu.matmul %56, %41, %cst_20 {dimension_numbers = #tpu.dot_dimension_numbers<[2], [1], [1], [2], [0, 0, 0, 1, 1, 2], [0], [0]>} : vector<8x8x8xf32>, vector<8x8x8xf32>, vector<8x8x8xf32> -> vector<8x8x8xf32>
    "tpu.trace_stop"() : () -> ()
    %58 = vector.extract_strided_slice %12 {offsets = [0, 0, 16], sizes = [8, 8, 8], strides = [1, 1, 1]} : vector<8x8x32xf32> to vector<8x8x8xf32>
    %59 = vector.extract_strided_slice %13 {offsets = [0, 0, 16], sizes = [8, 8, 8], strides = [1, 1, 1]} : vector<8x8x32xf32> to vector<8x8x8xf32>
    %60 = vector.extract_strided_slice %14 {offsets = [0, 0, 16], sizes = [8, 8, 8], strides = [1, 1, 1]} : vector<8x8x32xf32> to vector<8x8x8xf32>
    "tpu.trace_start"() <{level = 10 : i32, message = "bqd,bkd->bqk"}> : () -> ()
    %cst_21 = arith.constant dense<0.000000e+00> : vector<8x8x8xf32>
    %61 = tpu.matmul %58, %59, %cst_21 {dimension_numbers = #tpu.dot_dimension_numbers<[2], [2], [1], [1], [0, 0, 0, 1, 1, 1], [0], [0]>} : vector<8x8x8xf32>, vector<8x8x8xf32>, vector<8x8x8xf32> -> vector<8x8x8xf32>
    "tpu.trace_stop"() : () -> ()
    %cst_22 = arith.constant 0.353553385 : f32
    %62 = vector.broadcast %cst_22 : f32 to vector<8x8x8xf32>
    %63 = arith.mulf %61, %62 : vector<8x8x8xf32>
    %64 = vector.broadcast %19 : vector<8x1x8xf32> to vector<8x8x8xf32>
    %65 = arith.addf %63, %64 : vector<8x8x8xf32>
    %cst_23 = arith.constant dense<0xFF800000> : vector<8x8xf32>
    %66 = vector.multi_reduction <maximumf>, %65, %cst_23 [2] : vector<8x8x8xf32> to vector<8x8xf32>
    %67 = vector.shape_cast %66 : vector<8x8xf32> to vector<8x8x1xf32>
    %68 = vector.broadcast %67 : vector<8x8x1xf32> to vector<8x8x8xf32>
    %69 = arith.subf %65, %68 : vector<8x8x8xf32>
    %70 = math.exp %69 : vector<8x8x8xf32>
    %cst_24 = arith.constant dense<0.000000e+00> : vector<8x8xf32>
    %71 = vector.multi_reduction <add>, %70, %cst_24 [2] : vector<8x8x8xf32> to vector<8x8xf32>
    %72 = vector.shape_cast %71 : vector<8x8xf32> to vector<8x8x1xf32>
    %73 = tpu.reciprocal %72 {approx = true} : vector<8x8x1xf32> -> vector<8x8x1xf32>
    %74 = vector.broadcast %73 : vector<8x8x1xf32> to vector<8x8x8xf32>
    %75 = arith.mulf %70, %74 : vector<8x8x8xf32>
    "tpu.trace_start"() <{level = 10 : i32, message = "bqk,bkd->bqd"}> : () -> ()
    %cst_25 = arith.constant dense<0.000000e+00> : vector<8x8x8xf32>
    %76 = tpu.matmul %75, %60, %cst_25 {dimension_numbers = #tpu.dot_dimension_numbers<[2], [1], [1], [2], [0, 0, 0, 1, 1, 2], [0], [0]>} : vector<8x8x8xf32>, vector<8x8x8xf32>, vector<8x8x8xf32> -> vector<8x8x8xf32>
    "tpu.trace_stop"() : () -> ()
    %77 = vector.extract_strided_slice %12 {offsets = [0, 0, 24], sizes = [8, 8, 8], strides = [1, 1, 1]} : vector<8x8x32xf32> to vector<8x8x8xf32>
    %78 = vector.extract_strided_slice %13 {offsets = [0, 0, 24], sizes = [8, 8, 8], strides = [1, 1, 1]} : vector<8x8x32xf32> to vector<8x8x8xf32>
    %79 = vector.extract_strided_slice %14 {offsets = [0, 0, 24], sizes = [8, 8, 8], strides = [1, 1, 1]} : vector<8x8x32xf32> to vector<8x8x8xf32>
    "tpu.trace_start"() <{level = 10 : i32, message = "bqd,bkd->bqk"}> : () -> ()
    %cst_26 = arith.constant dense<0.000000e+00> : vector<8x8x8xf32>
    %80 = tpu.matmul %77, %78, %cst_26 {dimension_numbers = #tpu.dot_dimension_numbers<[2], [2], [1], [1], [0, 0, 0, 1, 1, 1], [0], [0]>} : vector<8x8x8xf32>, vector<8x8x8xf32>, vector<8x8x8xf32> -> vector<8x8x8xf32>
    "tpu.trace_stop"() : () -> ()
    %cst_27 = arith.constant 0.353553385 : f32
    %81 = vector.broadcast %cst_27 : f32 to vector<8x8x8xf32>
    %82 = arith.mulf %80, %81 : vector<8x8x8xf32>
    %83 = vector.broadcast %19 : vector<8x1x8xf32> to vector<8x8x8xf32>
    %84 = arith.addf %82, %83 : vector<8x8x8xf32>
    %cst_28 = arith.constant dense<0xFF800000> : vector<8x8xf32>
    %85 = vector.multi_reduction <maximumf>, %84, %cst_28 [2] : vector<8x8x8xf32> to vector<8x8xf32>
    %86 = vector.shape_cast %85 : vector<8x8xf32> to vector<8x8x1xf32>
    %87 = vector.broadcast %86 : vector<8x8x1xf32> to vector<8x8x8xf32>
    %88 = arith.subf %84, %87 : vector<8x8x8xf32>
    %89 = math.exp %88 : vector<8x8x8xf32>
    %cst_29 = arith.constant dense<0.000000e+00> : vector<8x8xf32>
    %90 = vector.multi_reduction <add>, %89, %cst_29 [2] : vector<8x8x8xf32> to vector<8x8xf32>
    %91 = vector.shape_cast %90 : vector<8x8xf32> to vector<8x8x1xf32>
    %92 = tpu.reciprocal %91 {approx = true} : vector<8x8x1xf32> -> vector<8x8x1xf32>
    %93 = vector.broadcast %92 : vector<8x8x1xf32> to vector<8x8x8xf32>
    %94 = arith.mulf %89, %93 : vector<8x8x8xf32>
    "tpu.trace_start"() <{level = 10 : i32, message = "bqk,bkd->bqd"}> : () -> ()
    %cst_30 = arith.constant dense<0.000000e+00> : vector<8x8x8xf32>
    %95 = tpu.matmul %94, %79, %cst_30 {dimension_numbers = #tpu.dot_dimension_numbers<[2], [1], [1], [2], [0, 0, 0, 1, 1, 2], [0], [0]>} : vector<8x8x8xf32>, vector<8x8x8xf32>, vector<8x8x8xf32> -> vector<8x8x8xf32>
    "tpu.trace_stop"() : () -> ()
    %96 = tpu.concatenate %38, %57, %76, %95 in 2 : vector<8x8x8xf32>, vector<8x8x8xf32>, vector<8x8x8xf32>, vector<8x8x8xf32> -> vector<8x8x32xf32>
    %97 = vector.shape_cast %96 : vector<8x8x32xf32> to vector<64x32xf32>
    %c0_31 = arith.constant 0 : index
    %c0_32 = arith.constant 0 : index
    %98 = vector.load %arg5[%c0_31, %c0_32] : memref<32x32xf32, #tpu.memory_space<vmem>>, vector<32x32xf32>
    %cst_33 = arith.constant dense<0.000000e+00> : vector<64x32xf32>
    %99 = tpu.matmul %97, %98, %cst_33 {dimension_numbers = #tpu.dot_dimension_numbers<[1], [0], [0], [1], [0, 0, 1, 1], [], []>} : vector<64x32xf32>, vector<32x32xf32>, vector<64x32xf32> -> vector<64x32xf32>
    %100 = vector.extract_strided_slice %2 {offsets = [0, 0], sizes = [1, 32], strides = [1, 1]} : vector<8x32xf32> to vector<1x32xf32>
    %101 = vector.broadcast %100 : vector<1x32xf32> to vector<64x32xf32>
    %102 = arith.addf %99, %101 : vector<64x32xf32>
    %103 = arith.addf %102, %8 : vector<64x32xf32>
    %104 = vector.extract_strided_slice %2 {offsets = [1, 0], sizes = [1, 32], strides = [1, 1]} : vector<8x32xf32> to vector<1x32xf32>
    %105 = vector.extract_strided_slice %2 {offsets = [2, 0], sizes = [1, 32], strides = [1, 1]} : vector<8x32xf32> to vector<1x32xf32>
    %cst_34 = arith.constant dense<0.000000e+00> : vector<64xf32>
    %106 = vector.multi_reduction <add>, %103, %cst_34 [1] : vector<64x32xf32> to vector<64xf32>
    %107 = vector.shape_cast %106 : vector<64xf32> to vector<64x1xf32>
    %cst_35 = arith.constant 3.200000e+01 : f32
    %108 = vector.broadcast %cst_35 : f32 to vector<64x1xf32>
    %109 = arith.divf %107, %108 : vector<64x1xf32>
    %110 = vector.broadcast %109 : vector<64x1xf32> to vector<64x32xf32>
    %111 = arith.subf %103, %110 : vector<64x32xf32>
    %112 = arith.mulf %111, %111 : vector<64x32xf32>
    %cst_36 = arith.constant dense<0.000000e+00> : vector<64xf32>
    %113 = vector.multi_reduction <add>, %112, %cst_36 [1] : vector<64x32xf32> to vector<64xf32>
    %114 = vector.shape_cast %113 : vector<64xf32> to vector<64x1xf32>
    %cst_37 = arith.constant 3.200000e+01 : f32
    %115 = vector.broadcast %cst_37 : f32 to vector<64x1xf32>
    %116 = arith.divf %114, %115 : vector<64x1xf32>
    %117 = vector.broadcast %109 : vector<64x1xf32> to vector<64x32xf32>
    %118 = arith.subf %103, %117 : vector<64x32xf32>
    %cst_38 = arith.constant 9.99999996E-13 : f32
    %119 = vector.broadcast %cst_38 : f32 to vector<64x1xf32>
    %120 = arith.addf %116, %119 : vector<64x1xf32>
    %121 = math.rsqrt %120 : vector<64x1xf32>
    %122 = vector.broadcast %121 : vector<64x1xf32> to vector<64x32xf32>
    %123 = arith.mulf %118, %122 : vector<64x32xf32>
    %124 = vector.broadcast %104 : vector<1x32xf32> to vector<64x32xf32>
    %125 = arith.mulf %123, %124 : vector<64x32xf32>
    %126 = vector.broadcast %105 : vector<1x32xf32> to vector<64x32xf32>
    %127 = arith.addf %125, %126 : vector<64x32xf32>
    %c0_39 = arith.constant 0 : index
    %c0_40 = arith.constant 0 : index
    %128 = vector.load %arg6[%c0_39, %c0_40] : memref<32x64xf32, #tpu.memory_space<vmem>>, vector<32x64xf32>
    %cst_41 = arith.constant dense<0.000000e+00> : vector<64x64xf32>
    %129 = tpu.matmul %127, %128, %cst_41 {dimension_numbers = #tpu.dot_dimension_numbers<[1], [0], [0], [1], [0, 0, 1, 1], [], []>} : vector<64x32xf32>, vector<32x64xf32>, vector<64x64xf32> -> vector<64x64xf32>
    %c0_42 = arith.constant 0 : index
    %c0_43 = arith.constant 0 : index
    %130 = vector.load %arg7[%c0_42, %c0_43] : memref<1x64xf32, #tpu.memory_space<vmem>>, vector<1x64xf32>
    %131 = vector.broadcast %130 : vector<1x64xf32> to vector<64x64xf32>
    %132 = arith.addf %129, %131 : vector<64x64xf32>
    %cst_44 = arith.constant 5.000000e-01 : f32
    %133 = vector.broadcast %cst_44 : f32 to vector<64x64xf32>
    %134 = arith.mulf %133, %132 : vector<64x64xf32>
    %cst_45 = arith.constant 4.471500e-02 : f32
    %135 = vector.broadcast %cst_45 : f32 to vector<64x64xf32>
    %136 = arith.mulf %135, %132 : vector<64x64xf32>
    %137 = arith.mulf %136, %132 : vector<64x64xf32>
    %138 = arith.mulf %137, %132 : vector<64x64xf32>
    %139 = arith.addf %132, %138 : vector<64x64xf32>
    %cst_46 = arith.constant 0.797884583 : f32
    %140 = vector.broadcast %cst_46 : f32 to vector<64x64xf32>
    %141 = arith.mulf %140, %139 : vector<64x64xf32>
    %142 = math.tanh %141 : vector<64x64xf32>
    %cst_47 = arith.constant 1.000000e+00 : f32
    %143 = vector.broadcast %cst_47 : f32 to vector<64x64xf32>
    %144 = arith.addf %143, %142 : vector<64x64xf32>
    %145 = arith.mulf %134, %144 : vector<64x64xf32>
    %c0_48 = arith.constant 0 : index
    %c0_49 = arith.constant 0 : index
    %146 = vector.load %arg8[%c0_48, %c0_49] : memref<64x32xf32, #tpu.memory_space<vmem>>, vector<64x32xf32>
    %cst_50 = arith.constant dense<0.000000e+00> : vector<64x32xf32>
    %147 = tpu.matmul %145, %146, %cst_50 {dimension_numbers = #tpu.dot_dimension_numbers<[1], [0], [0], [1], [0, 0, 1, 1], [], []>} : vector<64x64xf32>, vector<64x32xf32>, vector<64x32xf32> -> vector<64x32xf32>
    %148 = vector.extract_strided_slice %2 {offsets = [3, 0], sizes = [1, 32], strides = [1, 1]} : vector<8x32xf32> to vector<1x32xf32>
    %149 = vector.broadcast %148 : vector<1x32xf32> to vector<64x32xf32>
    %150 = arith.addf %147, %149 : vector<64x32xf32>
    %151 = arith.addf %150, %127 : vector<64x32xf32>
    %152 = vector.extract_strided_slice %2 {offsets = [4, 0], sizes = [1, 32], strides = [1, 1]} : vector<8x32xf32> to vector<1x32xf32>
    %153 = vector.extract_strided_slice %2 {offsets = [5, 0], sizes = [1, 32], strides = [1, 1]} : vector<8x32xf32> to vector<1x32xf32>
    %cst_51 = arith.constant dense<0.000000e+00> : vector<64xf32>
    %154 = vector.multi_reduction <add>, %151, %cst_51 [1] : vector<64x32xf32> to vector<64xf32>
    %155 = vector.shape_cast %154 : vector<64xf32> to vector<64x1xf32>
    %cst_52 = arith.constant 3.200000e+01 : f32
    %156 = vector.broadcast %cst_52 : f32 to vector<64x1xf32>
    %157 = arith.divf %155, %156 : vector<64x1xf32>
    %158 = vector.broadcast %157 : vector<64x1xf32> to vector<64x32xf32>
    %159 = arith.subf %151, %158 : vector<64x32xf32>
    %160 = arith.mulf %159, %159 : vector<64x32xf32>
    %cst_53 = arith.constant dense<0.000000e+00> : vector<64xf32>
    %161 = vector.multi_reduction <add>, %160, %cst_53 [1] : vector<64x32xf32> to vector<64xf32>
    %162 = vector.shape_cast %161 : vector<64xf32> to vector<64x1xf32>
    %cst_54 = arith.constant 3.200000e+01 : f32
    %163 = vector.broadcast %cst_54 : f32 to vector<64x1xf32>
    %164 = arith.divf %162, %163 : vector<64x1xf32>
    %165 = vector.broadcast %157 : vector<64x1xf32> to vector<64x32xf32>
    %166 = arith.subf %151, %165 : vector<64x32xf32>
    %cst_55 = arith.constant 9.99999996E-13 : f32
    %167 = vector.broadcast %cst_55 : f32 to vector<64x1xf32>
    %168 = arith.addf %164, %167 : vector<64x1xf32>
    %169 = math.rsqrt %168 : vector<64x1xf32>
    %170 = vector.broadcast %169 : vector<64x1xf32> to vector<64x32xf32>
    %171 = arith.mulf %166, %170 : vector<64x32xf32>
    %172 = vector.broadcast %152 : vector<1x32xf32> to vector<64x32xf32>
    %173 = arith.mulf %171, %172 : vector<64x32xf32>
    %174 = vector.broadcast %153 : vector<1x32xf32> to vector<64x32xf32>
    %175 = arith.addf %173, %174 : vector<64x32xf32>
    %c0_56 = arith.constant 0 : index
    %c0_57 = arith.constant 0 : index
    %176 = vector.load %arg10[%c0_56, %c0_57] : memref<64x32xf32, #tpu.memory_space<vmem>>, vector<64x32xf32>
    tpu.vector_store %arg10[%c0_56, %c0_57], %175 {strides = array<i32>} : memref<64x32xf32, #tpu.memory_space<vmem>>, vector<64x32xf32>,
    %177 = vector.shape_cast %175 : vector<64x32xf32> to vector<8x8x32xf32>
    %178 = vector.extract_strided_slice %2 {offsets = [6, 0], sizes = [1, 32], strides = [1, 1]} : vector<8x32xf32> to vector<1x32xf32>
    %179 = vector.shape_cast %178 : vector<1x32xf32> to vector<1x1x32xf32>
    %180 = vector.broadcast %179 : vector<1x1x32xf32> to vector<8x8x32xf32>
    %181 = arith.mulf %177, %180 : vector<8x8x32xf32>
    %cst_58 = arith.constant dense<0.000000e+00> : vector<8x8xf32>
    %182 = vector.multi_reduction <add>, %181, %cst_58 [2] : vector<8x8x32xf32> to vector<8x8xf32>
    %cst_59 = arith.constant 0.176776692 : f32
    %183 = vector.broadcast %cst_59 : f32 to vector<8x8xf32>
    %184 = arith.mulf %182, %183 : vector<8x8xf32>
    %cst_60 = arith.constant 5.000000e-01 : f32
    %185 = vector.broadcast %cst_60 : f32 to vector<8x8xf32>
    %186 = arith.cmpf ogt, %1, %185 : vector<8x8xf32>
    %cst_61 = arith.constant -1.000000e+09 : f32
    %187 = vector.broadcast %cst_61 : f32 to vector<8x8xf32>
    %188 = arith.select %186, %184, %187 : vector<8x8xi1>, vector<8x8xf32>
    %cst_62 = arith.constant dense<0xFF800000> : vector<8xf32>
    %189 = vector.multi_reduction <maximumf>, %188, %cst_62 [1] : vector<8x8xf32> to vector<8xf32>
    %190 = vector.shape_cast %189 : vector<8xf32> to vector<8x1xf32>
    %191 = vector.broadcast %190 : vector<8x1xf32> to vector<8x8xf32>
    %192 = arith.subf %188, %191 : vector<8x8xf32>
    %193 = math.exp %192 : vector<8x8xf32>
    %cst_63 = arith.constant dense<0.000000e+00> : vector<8xf32>
    %194 = vector.multi_reduction <add>, %193, %cst_63 [1] : vector<8x8xf32> to vector<8xf32>
    %195 = vector.shape_cast %194 : vector<8xf32> to vector<8x1xf32>
    %196 = tpu.reciprocal %195 {approx = true} : vector<8x1xf32> -> vector<8x1xf32>
    %197 = vector.broadcast %196 : vector<8x1xf32> to vector<8x8xf32>
    %198 = arith.mulf %193, %197 : vector<8x8xf32>
    %199 = vector.shape_cast %198 : vector<8x8xf32> to vector<8x1x8xf32>
    "tpu.trace_start"() <{level = 10 : i32, message = "bqk,bkd->bqd"}> : () -> ()
    %cst_64 = arith.constant dense<0.000000e+00> : vector<8x1x32xf32>
    %200 = tpu.matmul %199, %177, %cst_64 {dimension_numbers = #tpu.dot_dimension_numbers<[2], [1], [1], [2], [0, 0, 0, 1, 1, 2], [0], [0]>} : vector<8x1x8xf32>, vector<8x8x32xf32>, vector<8x1x32xf32> -> vector<8x1x32xf32>
    "tpu.trace_stop"() : () -> ()
    %c0_65 = arith.constant 0 : index
    %c0_66 = arith.constant 0 : index
    %c0_67 = arith.constant 0 : index
    %201 = vector.load %arg11[%c0_65, %c0_66, %c0_67] : memref<8x1x32xf32, #tpu.memory_space<vmem>>, vector<8x1x32xf32>
    tpu.vector_store %arg11[%c0_65, %c0_66, %c0_67], %200 {strides = array<i32>} : memref<8x1x32xf32, #tpu.memory_space<vmem>>, vector<8x1x32xf32>,
    return
  }
  func.func @transform_0(%arg0: i32) -> (i32, i32) {
    %c0_i32 = arith.constant 0 : i32
    %c0_i32_0 = arith.constant 0 : i32
    return %arg0, %c0_i32 : i32, i32
  }
  func.func @transform_1(%arg0: i32) -> (i32, i32) {
    %c0_i32 = arith.constant 0 : i32
    %c0_i32_0 = arith.constant 0 : i32
    return %arg0, %c0_i32 : i32, i32
  }
  func.func @transform_2(%arg0: i32) -> (i32, i32) {
    %c0_i32 = arith.constant 0 : i32
    %c0_i32_0 = arith.constant 0 : i32
    %c0_i32_1 = arith.constant 0 : i32
    return %c0_i32, %c0_i32_0 : i32, i32
  }
  func.func @transform_3(%arg0: i32) -> (i32, i32) {
    %c0_i32 = arith.constant 0 : i32
    %c0_i32_0 = arith.constant 0 : i32
    %c0_i32_1 = arith.constant 0 : i32
    return %c0_i32, %c0_i32_0 : i32, i32
  }
  func.func @transform_4(%arg0: i32) -> (i32, i32) {
    %c0_i32 = arith.constant 0 : i32
    %c0_i32_0 = arith.constant 0 : i32
    %c0_i32_1 = arith.constant 0 : i32
    return %c0_i32, %c0_i32_0 : i32, i32
  }
  func.func @transform_5(%arg0: i32) -> (i32, i32) {
    %c0_i32 = arith.constant 0 : i32
    %c0_i32_0 = arith.constant 0 : i32
    %c0_i32_1 = arith.constant 0 : i32
    return %c0_i32, %c0_i32_0 : i32, i32
  }
  func.func @transform_6(%arg0: i32) -> (i32, i32) {
    %c0_i32 = arith.constant 0 : i32
    %c0_i32_0 = arith.constant 0 : i32
    %c0_i32_1 = arith.constant 0 : i32
    return %c0_i32, %c0_i32_0 : i32, i32
  }
  func.func @transform_7(%arg0: i32) -> (i32, i32) {
    %c0_i32 = arith.constant 0 : i32
    %c0_i32_0 = arith.constant 0 : i32
    %c0_i32_1 = arith.constant 0 : i32
    return %c0_i32, %c0_i32_0 : i32, i32
  }
  func.func @transform_8(%arg0: i32) -> (i32, i32) {
    %c0_i32 = arith.constant 0 : i32
    %c0_i32_0 = arith.constant 0 : i32
    %c0_i32_1 = arith.constant 0 : i32
    return %c0_i32, %c0_i32_0 : i32, i32
  }
  func.func @transform_9(%arg0: i32) -> (i32, i32) {
    %c0_i32 = arith.constant 0 : i32
    %c0_i32_0 = arith.constant 0 : i32
    return %arg0, %c0_i32 : i32, i32
  }
  func.func @transform_10(%arg0: i32) -> (i32, i32, i32) {
    %c0_i32 = arith.constant 0 : i32
    %c0_i32_0 = arith.constant 0 : i32
    %c0_i32_1 = arith.constant 0 : i32
    return %arg0, %c0_i32, %c0_i32_0 : i32, i32, i32
  }
}

</mosaic_0001>

<bundles_post_ra>
// kernel: tpu_custom_call.1
= control target key start
LH: loop header
LB: loop body
LE: loop exit
PB: predicated region body
PF: predicated region fallthrough
CT: control target
= control target key end

     0   :  { %s5123_s0 = inlined_call_operand.vmem [shape: f32[64,32], index: 0, kind: input, shape index: {}]   ;;  %s5124_s1 = inlined_call_operand.vmem [shape: f32[8,8], index: 1, kind: input, shape index: {}]   ;;  %s5125_s2 = inlined_call_operand.vmem [shape: f32[32,128], index: 2, kind: input, shape index: {}]   ;;  %s5126_s3 = inlined_call_operand.vmem [shape: f32[1,128], index: 3, kind: input, shape index: {}]   ;;  %s5127_s4 = inlined_call_operand.vmem [shape: f32[32,32], index: 4, kind: input, shape index: {}]   ;;  %s5128_s5 = inlined_call_operand.vmem [shape: f32[32,64], index: 5, kind: input, shape index: {}]   ;;  %s5129_s6 = inlined_call_operand.vmem [shape: f32[1,64], index: 6, kind: input, shape index: {}]   ;;  %s5130_s7 = inlined_call_operand.vmem [shape: f32[64,32], index: 7, kind: input, shape index: {}]   ;;  %s5131_s8 = inlined_call_operand.vmem [shape: f32[8,32], index: 8, kind: input, shape index: {}]   ;;  %s5132_s9 = inlined_call_operand.vmem [shape: f32[64,32], index: 9, kind: output, shape index: {0}]   ;;  %s5133_s10 = inlined_call_operand.hbm [shape: f32[8,1,32], index: 10, kind: output, shape index: {1}]  }
   0x1   :  { %v48_v0 = vld [vmem:[%s5125_s2 + $0x18] sm:$0xff]  ;;  %v47_v1 = vld [vmem:[%s5125_s2 + $0x10] sm:$0xff]  ;;  %v46_v2 = vld [vmem:[%s5125_s2 + $0x8] sm:$0xff] }
   0x2   :  { %90 = vmatpush.msra.mxu0 %v48_v0 }
   0x4   :  { %91 = vmatpush.msra.mxu0 %v47_v1 }
   0x5   :  { %16 = vsyncpa [#allocation3], 0  ;;  %v45_v3 = vld [vmem:[%s5125_s2] sm:$0xff]  ;;  %vm53_vm0 = vcmask 261120   ;;  %v36_v5 = vld [vmem:[%s5123_s0 + $0x8] sm:$0xff]  ;;  %s3859_s18 = smov 96  }
   0x6   :  { %92 = vmatpush.msra.mxu0 %v46_v2  ;;  %v35_v4 = vld [vmem:[%s5123_s0] sm:$0xff]  ;;  %v37_v6 = vld [vmem:[%s5123_s0 + $0x10] sm:$0xff]  ;;  %v38_v7 = vld [vmem:[%s5123_s0 + $0x18] sm:$0xff]  ;;  %s3860_s19 = smov 64   ;;  %s3863_s20 = smov 88   ;;  %vm134_vm1 = vcmask 64512  }
   0x7   :  { %v39_v8 = vld [vmem:[%s5123_s0 + $0x20] sm:$0xff]  ;;  %v40_v9 = vld [vmem:[%s5123_s0 + $0x28] sm:$0xff]  ;;  %v41_v10 = vld [vmem:[%s5123_s0 + $0x30] sm:$0xff]  ;;  %s3864_s23 = smov 24   ;;  %s3865_s24 = smov 48   ;;  %vm2411_vm2 = vcmask 195584  }
   0x8   :  { %93 = vmatpush.msra.mxu0 %v45_v3  ;;  %v42_v11 = vld [vmem:[%s5123_s0 + $0x38] sm:$0xff]  ;;  %v3648_v12 = vld [vmem:[%s5126_s3] ss:$0 sm:$0xff]  ;;  %s3861_s0 = smov 32   ;;  %s3862_s3 = smov 56   ;;  %vm2402_vm3 = vcmask 130048  }
   0x9   :  { %3431 = vmatmul.msk.f32.vlgmr.msra.gmra.mxu0 %vm53_vm0, %v35_v4  ;;  %v43_v58 = vld [vmem:[%s5124_s1] sm:$0xff]  ;;  %s3866_s25 = smov 80   ;;  %s3867_s26 = smov 16  }
   0xa   :  { %v3439_v59 = vadd.f32 -1.0, %v43_v58  ;;  %s3868_s2 = smov 40   ;;  %s3869_s27 = smov 72  }
   0xb   :  { %s3870_s28 = smov 8   ;;  %s3417_s13 = sshll.u32 %s5133_s10, 4  ;;  %s3418_s13 = int_to_ptr.hbm [resolvable:$true] %s3417_s13 }
   0xc   :  { %v120_v60 = vmul.f32 10000.0, %v3439_v59  ;;  %s3873_s14 = smov 1  }
   0xe   :  { %v4064_v61 = vperm.slane %v120_v60, 0  ;;  %v122_v2 = vrot.slane %v120_v60, 1 }
  0x10   :  { %v4068_v3 = vperm.slane %v122_v2, 0 }
  0x11   :  { %3432 = vmatmul.msk.f32.gmra.mxu0 %vm53_vm0, %v36_v5 }
  0x19   :  { %3433 = vmatmul.msk.f32.gmra.mxu0 %vm53_vm0, %v37_v6 }
  0x21   :  { %3434 = vmatmul.msk.f32.gmra.mxu0 %vm53_vm0, %v38_v7  ;;  %v123_v7 = vrot.slane %v120_v60, 2 }
  0x29   :  { %3435 = vmatmul.msk.f32.gmra.mxu0 %vm53_vm0, %v39_v8 }
  0x31   :  { %3436 = vmatmul.msk.f32.gmra.mxu0 %vm53_vm0, %v40_v9  ;;  %v4072_v9 = vperm.slane %v123_v7, 0 }
  0x39   :  { %3437 = vmatmul.msk.f32.gmra.mxu0 %vm53_vm0, %v41_v10 }
  0x41   :  { %3438 = vmatmul.msk.f32.gmra.mxu0 %vm53_vm0, %v42_v11 }
  0x86   :  { %v95_v13 = vpop.f32.mrf.mxu0 }
  0x87   :  { %v3976_v14 = vadd.f32 %v3648_v12, %v95_v13  ;;  %v124_v13 = vrot.slane %v120_v60, 3 }
  0x89   :  { %130 = vrot.lane.b32.xlu1 %v3976_v14, %s3859_s18  ;;  %132 = vrot.lane.b32.xlu0 %v3976_v14, %s3860_s19 }
  0x8e   :  { %v98_v15 = vpop.f32.mrf.mxu0 }
  0x8f   :  { %v3981_v16 = vadd.f32 %v3648_v12, %v98_v15 }
  0x91   :  { %160 = vrot.lane.b32.xlu2 %v3981_v16, %s3859_s18  ;;  %162 = vrot.lane.b32.xlu0 %v3981_v16, %s3860_s19  ;;  %v4022_v30 = vpack.i.bf16 %v3981_v16, %v3976_v14 }
  0x96   :  { %v101_v17 = vpop.f32.mrf.mxu0 }
  0x97   :  { %v3986_v18 = vadd.f32 %v3648_v12, %v101_v17  ;;  %v4079_v17 = vperm.slane %v124_v13, 0 }
  0x99   :  { %189 = vrot.lane.b32.xlu2 %v3986_v18, %s3859_s18  ;;  %191 = vrot.lane.b32.xlu1 %v3986_v18, %s3860_s19 }
  0x9e   :  { %v104_v19 = vpop.f32.mrf.mxu0 }
  0x9f   :  { %v3991_v20 = vadd.f32 %v3648_v12, %v104_v19  ;;  %v126_v19 = vrot.slane %v120_v60, 5 }
  0xa1   :  { %220 = vrot.lane.b32.xlu0 %v3991_v20, %s3860_s19  ;;  %v4018_v29 = vpack.i.bf16 %v3991_v20, %v3986_v18 }
  0xa6   :  { %v107_v21 = vpop.f32.mrf.mxu0 }
  0xa7   :  { %v3994_v22 = vadd.f32 %v3648_v12, %v107_v21 }
  0xa9   :  { %249 = vrot.lane.b32.xlu1 %v3994_v22, %s3860_s19  ;;  %218 = vrot.lane.b32.xlu0 %v3991_v20, %s3859_s18 }
  0xae   :  { %v110_v23 = vpop.f32.mrf.mxu0 }
  0xaf   :  { %v3999_v24 = vadd.f32 %v3648_v12, %v110_v23 }
  0xb1   :  { %278 = vrot.lane.b32.xlu2 %v3999_v24, %s3860_s19  ;;  %247 = vrot.lane.b32.xlu1 %v3994_v22, %s3859_s18  ;;  %v4032_v32 = vpack.i.bf16 %v3999_v24, %v3994_v22 }
  0xb6   :  { %v113_v25 = vpop.f32.mrf.mxu0 }
  0xb7   :  { %v4004_v26 = vadd.f32 %v3648_v12, %v113_v25 }
  0xb9   :  { %276 = vrot.lane.b32.xlu2 %v3999_v24, %s3859_s18  ;;  %307 = vrot.lane.b32.xlu0 %v4004_v26, %s3860_s19 }
  0xbe   :  { %v116_v27 = vpop.f32.mrf.mxu0 }
  0xbf   :  { %v4009_v28 = vadd.f32 %v3648_v12, %v116_v27 }
  0xc1   :  { %305 = vrot.lane.b32.xlu2 %v4004_v26, %s3859_s18  ;;  %336 = vrot.lane.b32.xlu1 %v4009_v28, %s3860_s19  ;;  %v3598_v31 = vpack.i.bf16 %v4009_v28, %v4004_v26 }
  0xc2   :  { %334 = vrot.lane.b32.xlu0 %v4009_v28, %s3859_s18 }
  0xc9   :  { %3589 = vrot.lane.b32.xlu2 %v4018_v29, %s3861_s0  ;;  %776 = vrot.lane.b32.xlu1 %v3991_v20, %s3862_s3 }
  0xca   :  { %3584 = vrot.lane.b32.xlu0 %v4022_v30, %s3861_s0 }
  0xd1   :  { %690 = vrot.lane.b32.xlu2 %v3976_v14, %s3863_s20  ;;  %3599 = vrot.lane.b32.xlu1 %v3598_v31, %s3861_s0 }
  0xd2   :  { %3594 = vrot.lane.b32.xlu0 %v4032_v32, %s3861_s0 }
  0xd9   :  { %748 = vrot.lane.b32.xlu2 %v3986_v18, %s3862_s3 }
  0xda   :  { %692 = vrot.lane.b32.xlu0 %v3976_v14, %s3862_s3 }
  0xe2   :  { %720 = vrot.lane.b32.xlu0 %v3981_v16, %s3862_s3 }
  0xea   :  { %718 = vrot.lane.b32.xlu0 %v3981_v16, %s3863_s20 }
  0xeb   :  { %v161_v33 = vpop.permute.xlu2 %160 }
  0xf3   :  { %v190_v37 = vpop.permute.xlu2 %189 }
  0xfb   :  { %v133_v34 = vpop.permute.xlu0 %132  ;;  %v131_v35 = vpop.permute.xlu1 %130 }
  0xfc   :  { %3440 = vmatpush.xpose.msk.msra.mxu1 %vm134_vm1, %v133_v34 }
  0xff   :  { %3441 = vmatmul.msk.f32.vlgmr.msra.gmra.mxu1 %vm134_vm1, %v131_v35 }
 0x103   :  { %v163_v36 = vpop.permute.xlu0 %162 }
 0x104   :  { %3442 = vmatpush.xpose.msk.msra.mxu2 %vm134_vm1, %v163_v36  ;;  %v125_v36 = vrot.slane %v120_v60, 4 }
 0x107   :  { %3443 = vmatmul.msk.f32.vlgmr.msra.gmra.mxu2 %vm134_vm1, %v161_v33  ;;  %v4084_v33 = vperm.slane %v126_v19, 0 }
 0x10b   :  { %v192_v38 = vpop.permute.xlu1 %191  ;;  %v279_v39 = vpop.permute.xlu2 %278 }
 0x10c   :  { %3444 = vmatpush.xpose.msk.msra.mxu3 %vm134_vm1, %v192_v38  ;;  %v4093_v38 = vperm.slane %v125_v36, 0 }
 0x10f   :  { %3445 = vmatmul.msk.f32.vlgmr.msra.gmra.mxu3 %vm134_vm1, %v190_v37 }
 0x110   :  { %3450 = vmatpush.xpose.msk.msrb.mxu3 %vm134_vm1, %v279_v39 }
 0x113   :  { %v221_v40 = vpop.permute.xlu0 %220  ;;  %v277_v41 = vpop.permute.xlu2 %276 }
 0x114   :  { %3446 = vmatpush.xpose.msk.msrb.mxu1 %vm134_vm1, %v221_v40  ;;  %v127_v40 = vrot.slane %v120_v60, 6 }
 0x117   :  { %3451 = vmatmul.msk.f32.vlgmr.msrb.gmra.mxu3 %vm134_vm1, %v277_v41 }
 0x11b   :  { %v250_v42 = vpop.permute.xlu1 %249  ;;  %v219_v43 = vpop.permute.xlu0 %218 }
 0x11c   :  { %3448 = vmatpush.xpose.msk.msrb.mxu2 %vm134_vm1, %v250_v42  ;;  %3447 = vmatmul.msk.f32.vlgmr.msrb.gmra.mxu1 %vm134_vm1, %v219_v43  ;;  %v306_v45 = vpop.permute.xlu2 %305  ;;  %v4096_v43 = vperm.slane %v127_v40, 0 }
 0x123   :  { %v248_v44 = vpop.permute.xlu1 %247 }
 0x124   :  { %3449 = vmatmul.msk.f32.vlgmr.msrb.gmra.mxu2 %vm134_vm1, %v248_v44  ;;  %v3590_v47 = vpop.permute.xlu2 %3589 }
 0x125   :  { %v3591_v48 = vunpack.i.l.bf16 %v3590_v47  ;;  %v3592_v54 = vunpack.i.h.bf16 %v3590_v47 }
 0x12b   :  { %v308_v46 = vpop.permute.xlu0 %307 }
 0x12c   :  { %3452 = vmatpush.xpose.msk.msra.mxu1 %vm134_vm1, %v308_v46 }
 0x12f   :  { %3453 = vmatmul.msk.f32.vlgmr.msra.gmra.mxu1 %vm134_vm1, %v306_v45 }
 0x133   :  { %v337_v49 = vpop.permute.xlu1 %336 }
 0x134   :  { %v335_v50 = vpop.permute.xlu0 %334  ;;  %3454 = vmatpush.xpose.msk.msra.mxu2 %vm134_vm1, %v337_v49  ;;  %v128_v49 = vrot.slane %v120_v60, 7 }
 0x137   :  { %3455 = vmatmul.msk.f32.vlgmr.msra.gmra.mxu2 %vm134_vm1, %v335_v50 }
 0x138   :  { %555 = vmatpush.msrb.mxu2 %v3591_v48 }
 0x13c   :  { %v3585_v51 = vpop.permute.xlu0 %3584 }
 0x13d   :  { %v3587_v52 = vunpack.i.h.bf16 %v3585_v51  ;;  %v3586_v53 = vunpack.i.l.bf16 %v3585_v51  ;;  %v4110_v51 = vpop.permute.xlu1 %776 }
 0x13f   :  { %503 = vmatpush.msra.mxu3 %v3586_v53  ;;  %529 = vmatpush.msrb.mxu1 %v3587_v52  ;;  %v4112_v53 = vperm.slane %v128_v49, 0 }
 0x141   :  { %581 = vmatpush.msrb.mxu3 %v3592_v54 }
 0x144   :  { %v3595_v55 = vpop.permute.xlu0 %3594 }
 0x145   :  { %v3597_v56 = vunpack.i.h.bf16 %v3595_v55  ;;  %v3596_v57 = vunpack.i.l.bf16 %v3595_v55  ;;  %v4117_v55 = vpop.permute.xlu1 %3599 }
 0x147   :  { %607 = vmatpush.msra.mxu1 %v3596_v57  ;;  %633 = vmatpush.msra.mxu2 %v3597_v56  ;;  %v4121_v57 = vpop.permute.xlu2 %690 }
 0x14c   :  { %v4129_v2 = vpop.permute.xlu0 %692 }
 0x17c   :  { %v156_v62 = vpop.f32.mrf.mxu1 }
 0x17d   :  { %v362_v63 = vmul.f32 0.35355338, %v156_v62  ;;  %v4123_v62 = vpop.permute.xlu2 %748 }
 0x17f   :  { %v386_v0 = vadd.f32 %v4064_v61, %v362_v63 }
 0x181   :  { %v394_v1 = vsel %vm134_vm1, %v386_v0, -inf }
 0x182   :  { %395 = vmax.xlane.f32.xlu1 %v394_v1 }
 0x18a   :  { %v185_v4 = vpop.f32.mrf.mxu2 }
 0x18b   :  { %v363_v5 = vmul.f32 0.35355338, %v185_v4 }
 0x18d   :  { %v387_v6 = vadd.f32 %v4068_v3, %v363_v5 }
 0x18f   :  { %v397_v8 = vsel %vm134_vm1, %v387_v6, -inf }
 0x190   :  { %398 = vmax.xlane.f32.xlu2 %v397_v8 }
 0x192   :  { %v214_v10 = vpop.f32.mrf.mxu3 }
 0x193   :  { %v364_v11 = vmul.f32 0.35355338, %v214_v10 }
 0x195   :  { %v4075_v12 = vadd.f32 %v4072_v9, %v364_v11 }
 0x197   :  { %v400_v15 = vsel %vm134_vm1, %v4075_v12, -inf }
 0x198   :  { %401 = vmax.xlane.f32.xlu0 %v400_v15 }
 0x199   :  { %v243_v21 = vpop.f32.mrf.mxu1 }
 0x19a   :  { %v301_v23 = vpop.f32.mrf.mxu3  ;;  %v365_v25 = vmul.f32 0.35355338, %v243_v21 }
 0x19b   :  { %v367_v31 = vmul.f32 0.35355338, %v301_v23 }
 0x19c   :  { %v4082_v27 = vadd.f32 %v4079_v17, %v365_v25 }
 0x19d   :  { %v4089_v35 = vadd.f32 %v4084_v33, %v367_v31 }
 0x19e   :  { %v403_v34 = vsel %vm134_vm1, %v4082_v27, -inf }
 0x19f   :  { %404 = vmax.xlane.f32.xlu2 %v403_v34  ;;  %v409_v37 = vsel %vm134_vm1, %v4089_v35, -inf }
 0x1a7   :  { %v272_v39 = vpop.f32.mrf.mxu2  ;;  %410 = vmax.xlane.f32.xlu2 %v409_v37 }
 0x1a8   :  { %v366_v41 = vmul.f32 0.35355338, %v272_v39 }
 0x1aa   :  { %v390_v42 = vadd.f32 %v4093_v38, %v366_v41 }
 0x1ac   :  { %v330_v44 = vpop.f32.mrf.mxu1  ;;  %v406_v45 = vsel %vm134_vm1, %v390_v42, -inf }
 0x1ad   :  { %v368_v46 = vmul.f32 0.35355338, %v330_v44  ;;  %407 = vmax.xlane.f32.xlu1 %v406_v45 }
 0x1af   :  { %v4100_v47 = vadd.f32 %v4096_v43, %v368_v46 }
 0x1b1   :  { %v412_v48 = vsel %vm134_vm1, %v4100_v47, -inf }
 0x1b2   :  { %413 = vmax.xlane.f32.xlu0 %v412_v48 }
 0x1ba   :  { %v359_v50 = vpop.f32.mrf.mxu2 }
 0x1bb   :  { %v369_v52 = vmul.f32 0.35355338, %v359_v50  ;;  %v3608_v50 = vpack.i.bf16 %v3976_v14, %v3999_v24 }
 0x1bd   :  { %v4115_v54 = vadd.f32 %v4112_v53, %v369_v52 }
 0x1bf   :  { %774 = vrot.lane.b32.xlu2 %v3991_v20, %s3863_s20  ;;  %v415_v56 = vsel %vm134_vm1, %v4115_v54, -inf }
 0x1c6   :  { %832 = vrot.lane.b32.xlu1 %v3999_v24, %s3862_s3  ;;  %746 = vrot.lane.b32.xlu0 %v3986_v18, %s3863_s20 }
 0x1f0   :  { %416 = vmax.xlane.f32.xlu1 %v415_v56 }
 0x1f5   :  { %v396_v58 = vpop.xlane.xlu1 %395 }
 0x1f6   :  { %v418_v59 = vsub.f32 %v386_v0, %v396_v58  ;;  %v4133_v0 = vpop.permute.xlu0 %720 }
 0x1f8   :  { %v426_v60 = vmul.f32 1.442695, %v418_v59 }
 0x1fa   :  { %3650 = vpow2.f32 %v426_v60 }
 0x1fe   :  { %v4139_v11 = vpop.permute.xlu0 %718 }
 0x200   :  { %v4125_v63 = vpop.eup %3650 }
 0x201   :  { %v442_v1 = vsel %vm134_vm1, %v4125_v63, 0.0 }
 0x202   :  { %443 = vadd.xlane.f32.xlu2 %v442_v1 }
 0x203   :  { %v399_v4 = vpop.xlane.xlu2 %398 }
 0x204   :  { %v419_v5 = vsub.f32 %v387_v6, %v399_v4 }
 0x206   :  { %v428_v7 = vmul.f32 1.442695, %v419_v5 }
 0x208   :  { %3652 = vpow2.f32 %v428_v7 }
 0x209   :  { %804 = vrot.lane.b32.xlu1 %v3994_v22, %s3862_s3 }
 0x20b   :  { %v402_v13 = vpop.xlane.xlu0 %401 }
 0x20c   :  { %v420_v6 = vsub.f32 %v4075_v12, %v402_v13 }
 0x20e   :  { %v4135_v8 = vpop.eup %3652  ;;  %v430_v15 = vmul.f32 1.442695, %v420_v6  ;;  %v3601_v6 = vunpack.i.l.bf16 %v4117_v55 }
 0x20f   :  { %v445_v10 = vsel %vm134_vm1, %v4135_v8, 0.0 }
 0x210   :  { %446 = vadd.xlane.f32.xlu0 %v445_v10  ;;  %3654 = vpow2.f32 %v430_v15 }
 0x212   :  { %v405_v23 = vpop.xlane.xlu2 %404 }
 0x213   :  { %v421_v34 = vsub.f32 %v4082_v27, %v405_v23  ;;  %v3603_v27 = vpack.i.bf16 %v3986_v18, %v3981_v16 }
 0x215   :  { %v432_v36 = vmul.f32 1.442695, %v421_v34 }
 0x216   :  { %v4148_v31 = vpop.eup %3654 }
 0x217   :  { %v448_v12 = vsel %vm134_vm1, %v4148_v31, 0.0 }
 0x21a   :  { %830 = vrot.lane.b32.xlu2 %v3999_v24, %s3863_s20  ;;  %v411_v37 = vpop.xlane.xlu2 %410 }
 0x21b   :  { %v423_v40 = vsub.f32 %v4089_v35, %v411_v37 }
 0x220   :  { %v408_v19 = vpop.xlane.xlu1 %407 }
 0x221   :  { %v422_v21 = vsub.f32 %v390_v42, %v408_v19  ;;  %v436_v42 = vmul.f32 1.442695, %v423_v40 }
 0x222   :  { %v4185_v56 = vpop.permute.xlu2 %774 }
 0x223   :  { %v434_v25 = vmul.f32 1.442695, %v422_v21 }
 0x224   :  { %860 = vrot.lane.b32.xlu0 %v4004_v26, %s3862_s3 }
 0x225   :  { %3656 = vpow2.f32 %v434_v25  ;;  %v414_v48 = vpop.xlane.xlu0 %413  ;;  %v3613_v25 = vpack.i.bf16 %v3994_v22, %v4004_v26 }
 0x226   :  { %3658 = vpow2.f32 %v432_v36  ;;  %v424_v52 = vsub.f32 %v4100_v47, %v414_v48 }
 0x227   :  { %3660 = vpow2.f32 %v436_v42 }
 0x228   :  { %v438_v58 = vmul.f32 1.442695, %v424_v52 }
 0x22a   :  { %3662 = vpow2.f32 %v438_v58 }
 0x22b   :  { %v4155_v39 = vpop.eup %3656 }
 0x22c   :  { %858 = vrot.lane.b32.xlu0 %v4004_v26, %s3863_s20  ;;  %v454_v41 = vsel %vm134_vm1, %v4155_v39, 0.0  ;;  %v4163_v44 = vpop.eup %3658 }
 0x22d   :  { %v451_v45 = vsel %vm134_vm1, %v4163_v44, 0.0  ;;  %v4169_v35 = vpop.eup %3660 }
 0x22e   :  { %v457_v46 = vsel %vm134_vm1, %v4169_v35, 0.0 }
 0x230   :  { %v4190_v5 = vpop.eup %3662 }
 0x231   :  { %v460_v13 = vsel %vm134_vm1, %v4190_v5, 0.0 }
 0x233   :  { %449 = vadd.xlane.f32.xlu1 %v448_v12 }
 0x234   :  { %886 = vrot.lane.b32.xlu0 %v4009_v28, %s3863_s20 }
 0x238   :  { %v4179_v49 = vpop.permute.xlu1 %832  ;;  %v4192_v7 = vpop.permute.xlu0 %746 }
 0x23b   :  { %455 = vadd.xlane.f32.xlu1 %v454_v41 }
 0x23c   :  { %3604 = vrot.lane.b32.xlu0 %v3603_v27, %s3864_s23 }
 0x243   :  { %452 = vadd.xlane.f32.xlu2 %v451_v45 }
 0x244   :  { %1256 = vrot.lane.b32.xlu0 %v3981_v16, %s3865_s24 }
 0x24b   :  { %458 = vadd.xlane.f32.xlu2 %v457_v46 }
 0x24c   :  { %1254 = vrot.lane.b32.xlu0 %v3981_v16, %s3866_s25 }
 0x254   :  { %888 = vrot.lane.b32.xlu1 %v4009_v28, %s3862_s3 }
 0x263   :  { %802 = vrot.lane.b32.xlu2 %v3994_v22, %s3863_s20  ;;  %v417_v59 = vpop.xlane.xlu1 %416 }
 0x264   :  { %v425_v60 = vsub.f32 %v4115_v54, %v417_v59 }
 0x266   :  { %v440_v4 = vmul.f32 1.442695, %v425_v60 }
 0x26b   :  { %3609 = vrot.lane.b32.xlu2 %v3608_v50, %s3864_s23 }
 0x273   :  { %1284 = vrot.lane.b32.xlu2 %v3986_v18, %s3865_s24 }
 0x275   :  { %v444_v1 = vpop.xlane.xlu2 %443 }
 0x276   :  { %3664 = vrcp.f32 %v444_v1 }
 0x277   :  { %3666 = vpow2.f32 %v440_v4 }
 0x27b   :  { %v805_v34 = vpop.permute.xlu1 %804 }
 0x27c   :  { %v3665_v10 = vpop.eup %3664 }
 0x27d   :  { %v474_v47 = vmul.f32 %v3665_v10, %v4125_v63  ;;  %v3667_v54 = vpop.eup %3666  ;;  %v3602_v63 = vunpack.i.h.bf16 %v4117_v55  ;;  %v831_v37 = vpop.permute.xlu2 %830 }
 0x27e   :  { %461 = vadd.xlane.f32.xlu1 %v460_v13  ;;  %v463_v19 = vsel %vm134_vm1, %v3667_v54, 0.0 }
 0x27f   :  { %3456 = vmatmul.msk.f32.vlgmr.msra.gmra.mxu3 %vm134_vm1, %v474_v47 }
 0x280   :  { %659 = vmatpush.msra.mxu3 %v3601_v6 }
 0x283   :  { %v447_v15 = vpop.xlane.xlu0 %446 }
 0x284   :  { %3668 = vrcp.f32 %v447_v15 }
 0x286   :  { %464 = vadd.xlane.f32.xlu1 %v463_v19 }
 0x28a   :  { %v3669_v21 = vpop.eup %3668 }
 0x28b   :  { %v475_v23 = vmul.f32 %v3669_v21, %v4135_v8 }
 0x28d   :  { %3457 = vmatmul.msk.f32.vlgmr.msrb.gmra.mxu1 %vm134_vm1, %v475_v23 }
 0x28e   :  { %685 = vmatpush.msrb.mxu1 %v3602_v63 }
 0x296   :  { %v861_v8 = vpop.permute.xlu0 %860 }
 0x29e   :  { %v859_v48 = vpop.permute.xlu0 %858 }
 0x29f   :  { %3614 = vrot.lane.b32.xlu1 %v3613_v25, %s3864_s23 }
 0x2a6   :  { %v450_v12 = vpop.xlane.xlu1 %449 }
 0x2a7   :  { %3670 = vrcp.f32 %v450_v12 }
 0x2ad   :  { %v3671_v36 = vpop.eup %3670 }
 0x2ae   :  { %v476_v40 = vmul.f32 %v3671_v36, %v4148_v31  ;;  %v456_v41 = vpop.xlane.xlu1 %455 }
 0x2af   :  { %3672 = vrcp.f32 %v456_v41 }
 0x2b0   :  { %3458 = vmatmul.msk.f32.vlgmr.msrb.gmra.mxu2 %vm134_vm1, %v476_v40 }
 0x2b1   :  { %3464 = vmatpush.xpose.msk.msrb.mxu2 %vm134_vm1, %v4129_v2 }
 0x2b5   :  { %v3673_v55 = vpop.eup %3672 }
 0x2b6   :  { %v478_v27 = vmul.f32 %v3673_v55, %v4155_v39  ;;  %v453_v42 = vpop.xlane.xlu2 %452 }
 0x2b7   :  { %3674 = vrcp.f32 %v453_v42 }
 0x2b8   :  { %3460 = vmatmul.msk.f32.vlgmr.msra.gmra.mxu1 %vm134_vm1, %v478_v27 }
 0x2b9   :  { %3468 = vmatpush.xpose.msk.msra.mxu1 %vm134_vm1, %v4123_v62  ;;  %v887_v62 = vpop.permute.xlu0 %886 }
 0x2bd   :  { %v3675_v45 = vpop.eup %3674 }
 0x2be   :  { %v477_v31 = vmul.f32 %v3675_v45, %v4163_v44  ;;  %v459_v46 = vpop.xlane.xlu2 %458 }
 0x2bf   :  { %3676 = vrcp.f32 %v459_v46 }
 0x2c0   :  { %3459 = vmatmul.msk.f32.vlgmr.msrb.gmra.mxu3 %vm134_vm1, %v477_v31 }
 0x2c1   :  { %3466 = vmatpush.xpose.msk.msrb.mxu3 %vm134_vm1, %v4133_v0  ;;  %v3605_v50 = vpop.permute.xlu0 %3604 }
 0x2c2   :  { %v3606_v52 = vunpack.i.l.bf16 %v3605_v50  ;;  %v3607_v4 = vunpack.i.h.bf16 %v3605_v50 }
 0x2c5   :  { %v3677_v2 = vpop.eup %3676 }
 0x2c6   :  { %v479_v39 = vmul.f32 %v3677_v2, %v4169_v35  ;;  %v803_v44 = vpop.permute.xlu2 %802  ;;  %v889_v58 = vpop.permute.xlu1 %888 }
 0x2c8   :  { %3461 = vmatmul.msk.f32.vlgmr.msra.gmra.mxu2 %vm134_vm1, %v479_v39 }
 0x2c9   :  { %3470 = vmatpush.xpose.msk.msra.mxu2 %vm134_vm1, %v4110_v51 }
 0x2ce   :  { %v3610_v0 = vpop.permute.xlu2 %3609 }
 0x2cf   :  { %v3611_v35 = vunpack.i.l.bf16 %v3610_v0 }
 0x2d0   :  { %3465 = vmatmul.msk.f32.vlgmr.msrb.gmra.mxu2 %vm134_vm1, %v4121_v57 }
 0x2d1   :  { %3476 = vmatpush.xpose.msk.msrb.mxu2 %vm134_vm1, %v861_v8 }
 0x2d8   :  { %3471 = vmatmul.msk.f32.vlgmr.msra.gmra.mxu2 %vm134_vm1, %v4185_v56 }
 0x2d9   :  { %1065 = vmatpush.msra.mxu2 %v3606_v52 }
 0x2e0   :  { %3477 = vmatmul.msk.f32.vlgmr.msrb.gmra.mxu2 %vm134_vm1, %v859_v48 }
 0x2e1   :  { %1169 = vmatpush.msrb.mxu2 %v3611_v35 }
 0x2f1   :  { %v462_v51 = vpop.xlane.xlu1 %461 }
 0x2f2   :  { %3678 = vrcp.f32 %v462_v51 }
 0x2f8   :  { %v3679_v59 = vpop.eup %3678 }
 0x2f9   :  { %v480_v57 = vmul.f32 %v3679_v59, %v4190_v5  ;;  %v465_v60 = vpop.xlane.xlu1 %464  ;;  %v3612_v5 = vunpack.i.h.bf16 %v3610_v0 }
 0x2fa   :  { %3680 = vrcp.f32 %v465_v60 }
 0x2fb   :  { %3462 = vmatmul.msk.f32.vlgmr.msra.gmra.mxu3 %vm134_vm1, %v480_v57  ;;  %v4288_v57 = vpop.permute.xlu2 %1284 }
 0x2fc   :  { %3472 = vmatpush.xpose.msk.msra.mxu3 %vm134_vm1, %v805_v34 }
 0x300   :  { %v3681_v1 = vpop.eup %3680 }
 0x301   :  { %v481_v56 = vmul.f32 %v3681_v1, %v3667_v54 }
 0x302   :  { %v4248_v19 = vpop.f32.mrf.mxu3 }
 0x303   :  { %3463 = vmatmul.msk.f32.vlgmr.msrb.gmra.mxu1 %vm134_vm1, %v481_v56  ;;  %3467 = vmatmul.msk.f32.vlgmr.msrb.gmra.mxu3 %vm134_vm1, %v4139_v11 }
 0x304   :  { %3474 = vmatpush.xpose.msk.msrb.mxu1 %vm134_vm1, %v4179_v49  ;;  %3478 = vmatpush.xpose.msk.msrb.mxu3 %vm134_vm1, %v889_v58 }
 0x30a   :  { %v4250_v21 = vpop.f32.mrf.mxu1 }
 0x30b   :  { %3469 = vmatmul.msk.f32.vlgmr.msra.gmra.mxu1 %vm134_vm1, %v4192_v7  ;;  %3473 = vmatmul.msk.f32.vlgmr.msra.gmra.mxu3 %vm134_vm1, %v803_v44 }
 0x30c   :  { %1039 = vmatpush.msra.mxu1 %v3612_v5  ;;  %1091 = vmatpush.msra.mxu3 %v3607_v4 }
 0x311   :  { %v3615_v10 = vpop.permute.xlu1 %3614 }
 0x312   :  { %v3617_v47 = vunpack.i.h.bf16 %v3615_v10  ;;  %v3616_v13 = vunpack.i.l.bf16 %v3615_v10 }
 0x313   :  { %3475 = vmatmul.msk.f32.vlgmr.msrb.gmra.mxu1 %vm134_vm1, %v831_v37  ;;  %3479 = vmatmul.msk.f32.vlgmr.msrb.gmra.mxu3 %vm134_vm1, %v887_v62 }
 0x314   :  { %1143 = vmatpush.msrb.mxu1 %v3617_v47  ;;  %1195 = vmatpush.msrb.mxu3 %v3616_v13 }
 0x333   :  { %v4242_v11 = vpop.f32.mrf.mxu2 }
 0x335   :  { %v4254_v63 = vpop.f32.mrf.mxu1 }
 0x343   :  { %v4252_v23 = vpop.f32.mrf.mxu3 }
 0x34b   :  { %v4244_v49 = vpop.f32.mrf.mxu2 }
 0x353   :  { %v715_v6 = vpop.f32.mrf.mxu2 }
 0x354   :  { %v914_v54 = vmul.f32 0.35355338, %v715_v6 }
 0x356   :  { %v922_v7 = vadd.f32 %v914_v54, %v4064_v61 }
 0x358   :  { %v930_v15 = vsel %vm134_vm1, %v922_v7, -inf }
 0x359   :  { %931 = vmax.xlane.f32.xlu2 %v930_v15 }
 0x35b   :  { %v799_v34 = vpop.f32.mrf.mxu2 }
 0x35c   :  { %v917_v27 = vmul.f32 0.35355338, %v799_v34 }
 0x35e   :  { %v925_v39 = vadd.f32 %v917_v27, %v4079_v17 }
 0x360   :  { %v939_v0 = vsel %vm134_vm1, %v925_v39, -inf }
 0x363   :  { %v883_v8 = vpop.f32.mrf.mxu2 }
 0x364   :  { %v920_v31 = vmul.f32 0.35355338, %v883_v8 }
 0x366   :  { %v4267_v50 = vadd.f32 %v920_v31, %v4096_v43 }
 0x368   :  { %v948_v58 = vsel %vm134_vm1, %v4267_v50, -inf }
 0x37e   :  { %v4256_v25 = vpop.f32.mrf.mxu3 }
 0x380   :  { %v4258_v12 = vpop.f32.mrf.mxu1 }
 0x386   :  { %v743_v36 = vpop.f32.mrf.mxu3 }
 0x387   :  { %v915_v37 = vmul.f32 0.35355338, %v743_v36 }
 0x388   :  { %v771_v40 = vpop.f32.mrf.mxu1 }
 0x389   :  { %v916_v41 = vmul.f32 0.35355338, %v771_v40  ;;  %v923_v55 = vadd.f32 %v915_v37, %v4068_v3 }
 0x38b   :  { %v933_v42 = vsel %vm134_vm1, %v923_v55, -inf  ;;  %v924_v45 = vadd.f32 %v916_v41, %v4072_v9 }
 0x38c   :  { %934 = vmax.xlane.f32.xlu2 %v933_v42 }
 0x38d   :  { %v936_v46 = vsel %vm134_vm1, %v924_v45, -inf }
 0x38e   :  { %937 = vmax.xlane.f32.xlu1 %v936_v46  ;;  %v827_v48 = vpop.f32.mrf.mxu3 }
 0x38f   :  { %v918_v2 = vmul.f32 0.35355338, %v827_v48 }
 0x390   :  { %v855_v62 = vpop.f32.mrf.mxu1 }
 0x391   :  { %v926_v44 = vadd.f32 %v918_v2, %v4093_v38  ;;  %v919_v52 = vmul.f32 0.35355338, %v855_v62 }
 0x393   :  { %v942_v35 = vsel %vm134_vm1, %v926_v44, -inf  ;;  %v4274_v51 = vadd.f32 %v919_v52, %v4084_v33 }
 0x394   :  { %940 = vmax.xlane.f32.xlu2 %v939_v0  ;;  %943 = vmax.xlane.f32.xlu0 %v942_v35 }
 0x395   :  { %v945_v59 = vsel %vm134_vm1, %v4274_v51, -inf }
 0x396   :  { %949 = vmax.xlane.f32.xlu1 %v948_v58  ;;  %v911_v4 = vpop.f32.mrf.mxu3 }
 0x397   :  { %v921_v5 = vmul.f32 0.35355338, %v911_v4 }
 0x399   :  { %v4295_v13 = vadd.f32 %v921_v5, %v4112_v53 }
 0x39b   :  { %v951_v6 = vsel %vm134_vm1, %v4295_v13, -inf }
 0x39c   :  { %946 = vmax.xlane.f32.xlu0 %v945_v59 }
 0x3ac   :  { %1228 = vrot.lane.b32.xlu2 %v3976_v14, %s3865_s24 }
 0x3af   :  { %1282 = vrot.lane.b32.xlu1 %v3986_v18, %s3866_s25 }
 0x3b0   :  { %1368 = vrot.lane.b32.xlu0 %v3999_v24, %s3865_s24 }
 0x3b4   :  { %1366 = vrot.lane.b32.xlu2 %v3999_v24, %s3866_s25 }
 0x3b7   :  { %1226 = vrot.lane.b32.xlu1 %v3976_v14, %s3866_s25 }
 0x3cc   :  { %v932_v60 = vpop.xlane.xlu2 %931 }
 0x3cd   :  { %v954_v1 = vsub.f32 %v922_v7, %v932_v60 }
 0x3cf   :  { %v962_v56 = vmul.f32 1.442695, %v954_v1 }
 0x3d1   :  { %3682 = vpow2.f32 %v962_v56 }
 0x3d7   :  { %v4290_v10 = vpop.eup %3682 }
 0x3d8   :  { %v978_v47 = vsel %vm134_vm1, %v4290_v10, 0.0 }
 0x3dd   :  { %979 = vadd.xlane.f32.xlu2 %v978_v47 }
 0x3e1   :  { %952 = vmax.xlane.f32.xlu1 %v951_v6 }
 0x3fa   :  { %1340 = vrot.lane.b32.xlu1 %v3994_v22, %s3865_s24 }
 0x3ff   :  { %v935_v54 = vpop.xlane.xlu2 %934 }
 0x400   :  { %v955_v7 = vsub.f32 %v923_v55, %v935_v54 }
 0x401   :  { %v938_v15 = vpop.xlane.xlu1 %937 }
 0x402   :  { %v964_v34 = vmul.f32 1.442695, %v955_v7  ;;  %v956_v36 = vsub.f32 %v924_v45, %v938_v15  ;;  %1394 = vrot.lane.b32.xlu1 %v4004_v26, %s3866_s25  ;;  %v4311_v45 = vpop.permute.xlu0 %1256 }
 0x404   :  { %3684 = vpow2.f32 %v964_v34  ;;  %v966_v37 = vmul.f32 1.442695, %v956_v36 }
 0x406   :  { %3686 = vpow2.f32 %v966_v37 }
 0x407   :  { %v941_v40 = vpop.xlane.xlu2 %940 }
 0x408   :  { %v957_v41 = vsub.f32 %v925_v39, %v941_v40 }
 0x409   :  { %v950_v0 = vpop.xlane.xlu1 %949 }
 0x40a   :  { %v4303_v8 = vpop.eup %3684  ;;  %v968_v27 = vmul.f32 1.442695, %v957_v41  ;;  %1096 = vrot.lane.b32.xlu1 %v3991_v20, %s3864_s23  ;;  %v4319_v2 = vpop.permute.xlu0 %1254  ;;  %v960_v35 = vsub.f32 %v4267_v50, %v950_v0 }
 0x40b   :  { %v981_v55 = vsel %vm134_vm1, %v4303_v8, 0.0 }
 0x40c   :  { %v4309_v42 = vpop.eup %3686  ;;  %3688 = vpow2.f32 %v968_v27  ;;  %982 = vadd.xlane.f32.xlu0 %v981_v55  ;;  %v974_v58 = vmul.f32 1.442695, %v960_v35 }
 0x40d   :  { %v984_v31 = vsel %vm134_vm1, %v4309_v42, 0.0 }
 0x40e   :  { %985 = vadd.xlane.f32.xlu2 %v984_v31 }
 0x40f   :  { %v1229_v50 = vpop.permute.xlu2 %1228 }
 0x412   :  { %v4315_v46 = vpop.eup %3688  ;;  %v944_v39 = vpop.xlane.xlu0 %943 }
 0x413   :  { %v987_v48 = vsel %vm134_vm1, %v4315_v46, 0.0  ;;  %v958_v62 = vsub.f32 %v926_v44, %v944_v39 }
 0x414   :  { %988 = vadd.xlane.f32.xlu0 %v987_v48 }
 0x415   :  { %v970_v52 = vmul.f32 1.442695, %v958_v62  ;;  %v3618_v62 = vpack.i.bf16 %v3976_v14, %v3981_v16 }
 0x417   :  { %3690 = vpow2.f32 %v970_v52 }
 0x418   :  { %3692 = vpow2.f32 %v974_v58 }
 0x41a   :  { %v947_v59 = vpop.xlane.xlu0 %946 }
 0x41b   :  { %v959_v44 = vsub.f32 %v4274_v51, %v947_v59  ;;  %v4340_v51 = vpop.permute.xlu2 %1366 }
 0x41d   :  { %v4326_v60 = vpop.eup %3690  ;;  %v972_v56 = vmul.f32 1.442695, %v959_v44 }
 0x41e   :  { %v990_v1 = vsel %vm134_vm1, %v4326_v60, 0.0  ;;  %v3693_v4 = vpop.eup %3692 }
 0x41f   :  { %3694 = vpow2.f32 %v972_v56  ;;  %v996_v5 = vsel %vm134_vm1, %v3693_v4, 0.0 }
 0x421   :  { %v4336_v6 = vpop.permute.xlu1 %1282 }
 0x422   :  { %v1369_v31 = vpop.permute.xlu0 %1368 }
 0x425   :  { %v4334_v47 = vpop.eup %3694 }
 0x426   :  { %1396 = vrot.lane.b32.xlu2 %v4004_v26, %s3865_s24  ;;  %v993_v54 = vsel %vm134_vm1, %v4334_v47, 0.0 }
 0x428   :  { %1338 = vrot.lane.b32.xlu0 %v3994_v22, %s3866_s25 }
 0x429   :  { %v1227_v7 = vpop.permute.xlu1 %1226 }
 0x430   :  { %1424 = vrot.lane.b32.xlu0 %v4009_v28, %s3865_s24 }
 0x434   :  { %991 = vadd.xlane.f32.xlu1 %v990_v1 }
 0x43c   :  { %997 = vadd.xlane.f32.xlu1 %v996_v5 }
 0x444   :  { %994 = vadd.xlane.f32.xlu1 %v993_v54 }
 0x450   :  { %v980_v15 = vpop.xlane.xlu2 %979 }
 0x451   :  { %3696 = vrcp.f32 %v980_v15 }
 0x454   :  { %v953_v34 = vpop.xlane.xlu1 %952 }
 0x455   :  { %v961_v36 = vsub.f32 %v4295_v13, %v953_v34 }
 0x457   :  { %v3697_v37 = vpop.eup %3696  ;;  %v976_v40 = vmul.f32 1.442695, %v961_v36 }
 0x458   :  { %v1010_v41 = vmul.f32 %v3697_v37, %v4290_v10 }
 0x459   :  { %3698 = vpow2.f32 %v976_v40 }
 0x45a   :  { %3480 = vmatmul.msk.f32.vlgmr.msra.gmra.mxu1 %vm134_vm1, %v1010_v41 }
 0x45b   :  { %3488 = vmatpush.xpose.msk.msra.mxu1 %vm134_vm1, %v1229_v50 }
 0x45d   :  { %1200 = vrot.lane.b32.xlu1 %v4009_v28, %s3864_s23 }
 0x45f   :  { %v4348_v27 = vpop.eup %3698 }
 0x460   :  { %v999_v55 = vsel %vm134_vm1, %v4348_v27, 0.0 }
 0x461   :  { %1000 = vadd.xlane.f32.xlu2 %v999_v55 }
 0x465   :  { %1312 = vrot.lane.b32.xlu1 %v3991_v20, %s3865_s24 }
 0x46c   :  { %v1341_v13 = vpop.permute.xlu1 %1340 }
 0x46d   :  { %1310 = vrot.lane.b32.xlu1 %v3991_v20, %s3866_s25 }
 0x474   :  { %v1395_v10 = vpop.permute.xlu1 %1394 }
 0x479   :  { %1422 = vrot.lane.b32.xlu2 %v4009_v28, %s3866_s25 }
 0x47c   :  { %v1097_v48 = vpop.permute.xlu1 %1096 }
 0x47d   :  { %1117 = vmatpush.msrb.mxu0 %v1097_v48 }
 0x47f   :  { %v983_v39 = vpop.xlane.xlu0 %982 }
 0x480   :  { %3700 = vrcp.f32 %v983_v39 }
 0x481   :  { %v986_v52 = vpop.xlane.xlu2 %985  ;;  %3619 = vrot.lane.b32.xlu2 %v3618_v62, %s3867_s26 }
 0x482   :  { %3702 = vrcp.f32 %v986_v52 }
 0x486   :  { %v3701_v0 = vpop.eup %3700 }
 0x487   :  { %v1011_v35 = vmul.f32 %v3701_v0, %v4303_v8  ;;  %v989_v58 = vpop.xlane.xlu0 %988 }
 0x488   :  { %v3703_v59 = vpop.eup %3702  ;;  %3704 = vrcp.f32 %v989_v58 }
 0x489   :  { %v1012_v44 = vmul.f32 %v3703_v59, %v4309_v42  ;;  %3481 = vmatmul.msk.f32.vlgmr.msra.gmra.mxu2 %vm134_vm1, %v1011_v35 }
 0x48a   :  { %3490 = vmatpush.xpose.msk.msra.mxu2 %vm134_vm1, %v4311_v45 }
 0x48b   :  { %3482 = vmatmul.msk.f32.vlgmr.msra.gmra.mxu3 %vm134_vm1, %v1012_v44 }
 0x48c   :  { %3492 = vmatpush.xpose.msk.msra.mxu3 %vm134_vm1, %v4288_v57  ;;  %v1397_v57 = vpop.permute.xlu2 %1396 }
 0x48e   :  { %v3705_v1 = vpop.eup %3704 }
 0x48f   :  { %v1013_v56 = vmul.f32 %v3705_v1, %v4315_v46 }
 0x491   :  { %3483 = vmatmul.msk.f32.vlgmr.msrb.gmra.mxu0 %vm134_vm1, %v1013_v56 }
 0x49a   :  { %v1339_v34 = vpop.permute.xlu0 %1338 }
 0x4a2   :  { %v1425_v40 = vpop.permute.xlu0 %1424 }
 0x4a7   :  { %v992_v8 = vpop.xlane.xlu1 %991 }
 0x4a8   :  { %3706 = vrcp.f32 %v992_v8 }
 0x4ae   :  { %v3707_v5 = vpop.eup %3706 }
 0x4af   :  { %v1014_v42 = vmul.f32 %v3707_v5, %v4326_v60  ;;  %v998_v50 = vpop.xlane.xlu1 %997 }
 0x4b0   :  { %3708 = vrcp.f32 %v998_v50 }
 0x4b1   :  { %3484 = vmatmul.msk.f32.vlgmr.msrb.gmra.mxu1 %vm134_vm1, %v1014_v42 }
 0x4b2   :  { %3496 = vmatpush.xpose.msk.msrb.mxu1 %vm134_vm1, %v1341_v13 }
 0x4b6   :  { %v3709_v45 = vpop.eup %3708 }
 0x4b7   :  { %v1016_v54 = vmul.f32 %v3709_v45, %v3693_v4  ;;  %v995_v15 = vpop.xlane.xlu1 %994 }
 0x4b8   :  { %3710 = vrcp.f32 %v995_v15 }
 0x4b9   :  { %3486 = vmatmul.msk.f32.vlgmr.msrb.gmra.mxu3 %vm134_vm1, %v1016_v54  ;;  %3489 = vmatmul.msk.f32.vlgmr.msra.gmra.mxu1 %vm134_vm1, %v1227_v7 }
 0x4ba   :  { %3500 = vmatpush.xpose.msk.msrb.mxu3 %vm134_vm1, %v1397_v57 }
 0x4be   :  { %v3711_v46 = vpop.eup %3710 }
 0x4bf   :  { %v1015_v60 = vmul.f32 %v3711_v46, %v4334_v47 }
 0x4c1   :  { %3485 = vmatmul.msk.f32.vlgmr.msrb.gmra.mxu2 %vm134_vm1, %v1015_v60  ;;  %3493 = vmatmul.msk.f32.vlgmr.msra.gmra.mxu3 %vm134_vm1, %v4336_v6 }
 0x4c2   :  { %3497 = vmatmul.msk.f32.vlgmr.msrb.gmra.mxu1 %vm134_vm1, %v1339_v34  ;;  %3498 = vmatpush.xpose.msk.msrb.mxu2 %vm134_vm1, %v1369_v31 }
 0x4c9   :  { %3491 = vmatmul.msk.f32.vlgmr.msra.gmra.mxu2 %vm134_vm1, %v4319_v2  ;;  %3501 = vmatmul.msk.f32.vlgmr.msrb.gmra.mxu3 %vm134_vm1, %v1395_v10 }
 0x4cf   :  { %v1201_v4 = vpop.permute.xlu1 %1200 }
 0x4d0   :  { %1221 = vmatpush.msra.mxu0 %v1201_v4 }
 0x4d1   :  { %3499 = vmatmul.msk.f32.vlgmr.msrb.gmra.mxu2 %vm134_vm1, %v4340_v51 }
 0x4d4   :  { %v1001_v47 = vpop.xlane.xlu2 %1000 }
 0x4d5   :  { %3712 = vrcp.f32 %v1001_v47 }
 0x4d7   :  { %v1313_v7 = vpop.permute.xlu1 %1312  ;;  %v4394_v51 = vpop.f32.mrf.mxu1 }
 0x4d8   :  { %3494 = vmatpush.xpose.msk.msrb.mxu0 %vm134_vm1, %v1313_v7 }
 0x4db   :  { %v3713_v6 = vpop.eup %3712 }
 0x4dc   :  { %v1017_v36 = vmul.f32 %v3713_v6, %v4348_v27  ;;  %v1423_v37 = vpop.permute.xlu2 %1422 }
 0x4de   :  { %3487 = vmatmul.msk.f32.vlgmr.msra.gmra.mxu0 %vm134_vm1, %v1017_v36 }
 0x4df   :  { %3502 = vmatpush.xpose.msk.msra.mxu0 %vm134_vm1, %v1425_v40  ;;  %v1311_v41 = vpop.permute.xlu1 %1310 }
 0x4e4   :  { %v3620_v2 = vpop.permute.xlu2 %3619 }
 0x4e5   :  { %v3622_v55 = vunpack.i.h.bf16 %v3620_v2  ;;  %v3621_v13 = vunpack.i.l.bf16 %v3620_v2 }
 0x4e6   :  { %3495 = vmatmul.msk.f32.vlgmr.msrb.gmra.mxu0 %vm134_vm1, %v1311_v41 }
 0x4e7   :  { %1575 = vmatpush.msra.mxu1 %v3622_v55  ;;  %1601 = vmatpush.msra.mxu2 %v3621_v13 }
 0x4ee   :  { %3503 = vmatmul.msk.f32.vlgmr.msra.gmra.mxu0 %vm134_vm1, %v1423_v37 }
 0x50c   :  { %v4402_v52 = vpop.f32.mrf.mxu2 }
 0x50e   :  { %v4398_v27 = vpop.f32.mrf.mxu3  ;;  %v4414_v57 = vpop.f32.mrf.mxu0 }
 0x52e   :  { %v4396_v10 = vpop.f32.mrf.mxu1 }
 0x536   :  { %v1251_v31 = vpop.f32.mrf.mxu1 }
 0x537   :  { %v1450_v48 = vmul.f32 0.35355338, %v1251_v31 }
 0x539   :  { %v1458_v39 = vadd.f32 %v1450_v48, %v4064_v61  ;;  %v3628_v48 = vpack.i.bf16 %v4004_v26, %v3994_v22 }
 0x53b   :  { %v1466_v62 = vsel %vm134_vm1, %v1458_v39, -inf }
 0x53c   :  { %1467 = vmax.xlane.f32.xlu0 %v1466_v62  ;;  %v4404_v0 = vpop.f32.mrf.mxu3 }
 0x53f   :  { %v1363_v35 = vpop.f32.mrf.mxu1 }
 0x540   :  { %v1454_v58 = vmul.f32 0.35355338, %v1363_v35 }
 0x542   :  { %v1462_v59 = vadd.f32 %v1454_v58, %v4093_v38  ;;  %v3623_v58 = vpack.i.bf16 %v3999_v24, %v3986_v18 }
 0x544   :  { %v1478_v44 = vsel %vm134_vm1, %v1462_v59, -inf  ;;  %v4408_v1 = vpop.f32.mrf.mxu2  ;;  %v1307_v56 = vpop.f32.mrf.mxu3 }
 0x545   :  { %1479 = vmax.xlane.f32.xlu0 %v1478_v44  ;;  %v1452_v8 = vmul.f32 0.35355338, %v1307_v56 }
 0x547   :  { %v1460_v5 = vadd.f32 %v1452_v8, %v4072_v9 }
 0x549   :  { %v1472_v42 = vsel %vm134_vm1, %v1460_v5, -inf }
 0x54a   :  { %1473 = vmax.xlane.f32.xlu2 %v1472_v42 }
 0x54c   :  { %v1279_v50 = vpop.f32.mrf.mxu2  ;;  %v1419_v55 = vpop.f32.mrf.mxu3 }
 0x54d   :  { %v1451_v45 = vmul.f32 0.35355338, %v1279_v50  ;;  %v1456_v13 = vmul.f32 0.35355338, %v1419_v55 }
 0x54f   :  { %v1459_v54 = vadd.f32 %v1451_v45, %v4068_v3  ;;  %v1464_v62 = vadd.f32 %v1456_v13, %v4096_v43 }
 0x551   :  { %v1469_v15 = vsel %vm134_vm1, %v1459_v54, -inf  ;;  %v1484_v35 = vsel %vm134_vm1, %v1464_v62, -inf }
 0x552   :  { %1470 = vmax.xlane.f32.xlu1 %v1469_v15 }
 0x554   :  { %v1391_v36 = vpop.f32.mrf.mxu2 }
 0x555   :  { %v1455_v40 = vmul.f32 0.35355338, %v1391_v36 }
 0x557   :  { %v1463_v41 = vadd.f32 %v1455_v40, %v4084_v33 }
 0x559   :  { %v1481_v31 = vsel %vm134_vm1, %v1463_v41, -inf }
 0x55b   :  { %v4416_v46 = vpop.f32.mrf.mxu0 }
 0x562   :  { %1792 = vrot.lane.b32.xlu2 %v3981_v16, %s3868_s2 }
 0x563   :  { %v1335_v60 = vpop.f32.mrf.mxu0 }
 0x564   :  { %v1453_v34 = vmul.f32 0.35355338, %v1335_v60 }
 0x566   :  { %v1461_v4 = vadd.f32 %v1453_v34, %v4079_v17 }
 0x568   :  { %v1475_v47 = vsel %vm134_vm1, %v1461_v4, -inf }
 0x569   :  { %1476 = vmax.xlane.f32.xlu0 %v1475_v47 }
 0x56a   :  { %1790 = vrot.lane.b32.xlu2 %v3981_v16, %s3869_s27 }
 0x56b   :  { %v1447_v7 = vpop.f32.mrf.mxu0 }
 0x56c   :  { %v1457_v6 = vmul.f32 0.35355338, %v1447_v7 }
 0x56e   :  { %v4425_v37 = vadd.f32 %v1457_v6, %v4112_v53 }
 0x570   :  { %v1487_v2 = vsel %vm134_vm1, %v4425_v37, -inf }
 0x571   :  { %1488 = vmax.xlane.f32.xlu1 %v1487_v2 }
 0x579   :  { %1482 = vmax.xlane.f32.xlu1 %v1481_v31 }
 0x57d   :  { %3629 = vrot.lane.b32.xlu0 %v3628_v48, %s3867_s26 }
 0x581   :  { %1485 = vmax.xlane.f32.xlu1 %v1484_v35 }
 0x585   :  { %1764 = vrot.lane.b32.xlu0 %v3976_v14, %s3868_s2 }
 0x59a   :  { %3624 = vrot.lane.b32.xlu1 %v3623_v58, %s3867_s26 }
 0x5af   :  { %v1468_v44 = vpop.xlane.xlu0 %1467 }
 0x5b0   :  { %v1490_v56 = vsub.f32 %v1458_v39, %v1468_v44 }
 0x5b2   :  { %v1498_v8 = vmul.f32 1.442695, %v1490_v56 }
 0x5b4   :  { %3714 = vpow2.f32 %v1498_v8 }
 0x5b8   :  { %v1480_v42 = vpop.xlane.xlu0 %1479 }
 0x5b9   :  { %v1494_v50 = vsub.f32 %v1462_v59, %v1480_v42 }
 0x5ba   :  { %v4441_v45 = vpop.eup %3714 }
 0x5bb   :  { %v1506_v15 = vmul.f32 1.442695, %v1494_v50  ;;  %v1514_v60 = vsel %vm134_vm1, %v4441_v45, 0.0 }
 0x5bc   :  { %1515 = vadd.xlane.f32.xlu2 %v1514_v60 }
 0x5bd   :  { %3716 = vpow2.f32 %v1506_v15  ;;  %v1474_v34 = vpop.xlane.xlu2 %1473 }
 0x5be   :  { %v1492_v47 = vsub.f32 %v1460_v5, %v1474_v34 }
 0x5c0   :  { %v1502_v7 = vmul.f32 1.442695, %v1492_v47 }
 0x5c2   :  { %3718 = vpow2.f32 %v1502_v7 }
 0x5c3   :  { %v4445_v6 = vpop.eup %3716 }
 0x5c4   :  { %v1526_v39 = vsel %vm134_vm1, %v4445_v6, 0.0 }
 0x5c5   :  { %1527 = vadd.xlane.f32.xlu1 %v1526_v39  ;;  %v1471_v36 = vpop.xlane.xlu1 %1470 }
 0x5c6   :  { %v1491_v59 = vsub.f32 %v1459_v54, %v1471_v36 }
 0x5c8   :  { %v1500_v40 = vmul.f32 1.442695, %v1491_v59  ;;  %v4449_v2 = vpop.eup %3718 }
 0x5c9   :  { %v1520_v55 = vsel %vm134_vm1, %v4449_v2, 0.0 }
 0x5ca   :  { %3720 = vpow2.f32 %v1500_v40 }
 0x5cd   :  { %1521 = vadd.xlane.f32.xlu1 %v1520_v55 }
 0x5d0   :  { %v4453_v13 = vpop.eup %3720 }
 0x5d1   :  { %v1517_v5 = vsel %vm134_vm1, %v4453_v13, 0.0 }
 0x5d2   :  { %1518 = vadd.xlane.f32.xlu0 %v1517_v5 }
 0x5d4   :  { %1762 = vrot.lane.b32.xlu2 %v3976_v14, %s3869_s27 }
 0x5dc   :  { %1818 = vrot.lane.b32.xlu2 %v3986_v18, %s3869_s27  ;;  %v1477_v54 = vpop.xlane.xlu0 %1476 }
 0x5dd   :  { %v1493_v31 = vsub.f32 %v1461_v4, %v1477_v54  ;;  %v1793_v54 = vpop.permute.xlu2 %1792 }
 0x5df   :  { %v1504_v48 = vmul.f32 1.442695, %v1493_v31 }
 0x5e1   :  { %3722 = vpow2.f32 %v1504_v48 }
 0x5e4   :  { %1632 = vrot.lane.b32.xlu2 %v3991_v20, %s3867_s26  ;;  %v1489_v44 = vpop.xlane.xlu1 %1488 }
 0x5e5   :  { %v1497_v36 = vsub.f32 %v4425_v37, %v1489_v44  ;;  %v1791_v48 = vpop.permute.xlu2 %1790 }
 0x5e6   :  { %1820 = vrot.lane.b32.xlu0 %v3986_v18, %s3868_s2 }
 0x5e7   :  { %v4465_v35 = vpop.eup %3722  ;;  %v1512_v40 = vmul.f32 1.442695, %v1497_v36 }
 0x5e8   :  { %v1523_v58 = vsel %vm134_vm1, %v4465_v35, 0.0 }
 0x5e9   :  { %1524 = vadd.xlane.f32.xlu1 %v1523_v58 }
 0x5ec   :  { %1736 = vrot.lane.b32.xlu2 %v4009_v28, %s3867_s26  ;;  %v1483_v8 = vpop.xlane.xlu1 %1482 }
 0x5ed   :  { %v1495_v42 = vsub.f32 %v1463_v41, %v1483_v8 }
 0x5ef   :  { %v3630_v56 = vpop.permute.xlu0 %3629  ;;  %v1508_v50 = vmul.f32 1.442695, %v1495_v42 }
 0x5f0   :  { %v3631_v4 = vunpack.i.l.bf16 %v3630_v56  ;;  %v3632_v59 = vunpack.i.h.bf16 %v3630_v56 }
 0x5f1   :  { %3724 = vpow2.f32 %v1508_v50 }
 0x5f2   :  { %1679 = vmatpush.msrb.mxu1 %v3631_v4 }
 0x5f4   :  { %1848 = vrot.lane.b32.xlu2 %v3991_v20, %s3868_s2  ;;  %v1486_v15 = vpop.xlane.xlu1 %1485 }
 0x5f5   :  { %v1496_v60 = vsub.f32 %v1464_v62, %v1486_v15 }
 0x5f7   :  { %v1510_v34 = vmul.f32 1.442695, %v1496_v60  ;;  %v4481_v47 = vpop.eup %3724  ;;  %v1765_v42 = vpop.permute.xlu0 %1764 }
 0x5f8   :  { %v1529_v62 = vsel %vm134_vm1, %v4481_v47, 0.0 }
 0x5f9   :  { %3726 = vpow2.f32 %v1510_v34 }
 0x5fa   :  { %3728 = vpow2.f32 %v1512_v40 }
 0x5fc   :  { %1904 = vrot.lane.b32.xlu2 %v3999_v24, %s3868_s2 }
 0x5ff   :  { %v4490_v55 = vpop.eup %3726 }
 0x600   :  { %v1532_v37 = vsel %vm134_vm1, %v4490_v55, 0.0  ;;  %v4496_v5 = vpop.eup %3728 }
 0x601   :  { %v1535_v31 = vsel %vm134_vm1, %v4496_v5, 0.0 }
 0x602   :  { %1846 = vrot.lane.b32.xlu1 %v3991_v20, %s3869_s27 }
 0x604   :  { %1902 = vrot.lane.b32.xlu2 %v3999_v24, %s3869_s27 }
 0x60a   :  { %1932 = vrot.lane.b32.xlu1 %v4004_v26, %s3868_s2 }
 0x60c   :  { %1874 = vrot.lane.b32.xlu2 %v3994_v22, %s3869_s27  ;;  %v3625_v41 = vpop.permute.xlu1 %3624 }
 0x60d   :  { %v3627_v7 = vunpack.i.h.bf16 %v3625_v41  ;;  %v3626_v39 = vunpack.i.l.bf16 %v3625_v41 }
 0x60f   :  { %1627 = vmatpush.msra.mxu3 %v3626_v39  ;;  %1705 = vmatpush.msrb.mxu2 %v3627_v7 }
 0x610   :  { %1530 = vadd.xlane.f32.xlu0 %v1529_v62 }
 0x611   :  { %1731 = vmatpush.msrb.mxu3 %v3632_v59 }
 0x612   :  { %1960 = vrot.lane.b32.xlu1 %v4009_v28, %s3868_s2 }
 0x614   :  { %1930 = vrot.lane.b32.xlu2 %v4004_v26, %s3869_s27 }
 0x618   :  { %1533 = vadd.xlane.f32.xlu0 %v1532_v37 }
 0x61c   :  { %1958 = vrot.lane.b32.xlu2 %v4009_v28, %s3869_s27 }
 0x620   :  { %1536 = vadd.xlane.f32.xlu0 %v1535_v31 }
 0x62f   :  { %v1516_v58 = vpop.xlane.xlu2 %1515 }
 0x630   :  { %3730 = vrcp.f32 %v1516_v58 }
 0x634   :  { %1876 = vrot.lane.b32.xlu0 %v3994_v22, %s3868_s2 }
 0x636   :  { %v3731_v44 = vpop.eup %3730 }
 0x637   :  { %v1546_v56 = vmul.f32 %v3731_v44, %v4441_v45  ;;  %v1763_v4 = vpop.permute.xlu2 %1762 }
 0x638   :  { %v1528_v8 = vpop.xlane.xlu1 %1527 }
 0x639   :  { %3732 = vrcp.f32 %v1528_v8  ;;  %3504 = vmatmul.msk.f32.vlgmr.msra.gmra.mxu1 %vm134_vm1, %v1546_v56 }
 0x63a   :  { %3512 = vmatpush.xpose.msk.msra.mxu1 %vm134_vm1, %v1765_v42 }
 0x63f   :  { %v3733_v50 = vpop.eup %3732  ;;  %v1819_v15 = vpop.permute.xlu2 %1818 }
 0x640   :  { %v1550_v60 = vmul.f32 %v3733_v50, %v4445_v6  ;;  %v1522_v34 = vpop.xlane.xlu1 %1521 }
 0x641   :  { %3734 = vrcp.f32 %v1522_v34 }
 0x642   :  { %3508 = vmatmul.msk.f32.vlgmr.msrb.gmra.mxu1 %vm134_vm1, %v1550_v60 }
 0x645   :  { %v1519_v41 = vpop.xlane.xlu0 %1518 }
 0x646   :  { %3736 = vrcp.f32 %v1519_v41 }
 0x647   :  { %v3735_v7 = vpop.eup %3734  ;;  %v1633_v45 = vpop.permute.xlu2 %1632 }
 0x648   :  { %v1548_v39 = vmul.f32 %v3735_v7, %v4449_v2  ;;  %1653 = vmatpush.msrb.mxu0 %v1633_v45 }
 0x64a   :  { %3506 = vmatmul.msk.f32.vlgmr.msra.gmra.mxu3 %vm134_vm1, %v1548_v39  ;;  %3513 = vmatmul.msk.f32.vlgmr.msra.gmra.mxu1 %vm134_vm1, %v1763_v4 }
 0x64c   :  { %v3737_v36 = vpop.eup %3736 }
 0x64d   :  { %v1547_v59 = vmul.f32 %v3737_v36, %v4453_v13 }
 0x64f   :  { %v1737_v62 = vpop.permute.xlu2 %1736  ;;  %3505 = vmatmul.msk.f32.vlgmr.msra.gmra.mxu2 %vm134_vm1, %v1547_v59 }
 0x650   :  { %3514 = vmatpush.xpose.msk.msra.mxu2 %vm134_vm1, %v1793_v54  ;;  %1757 = vmatpush.msra.mxu0 %v1737_v62 }
 0x657   :  { %v1849_v31 = vpop.permute.xlu2 %1848 }
 0x658   :  { %v1821_v6 = vpop.permute.xlu0 %1820 }
 0x659   :  { %3516 = vmatpush.xpose.msk.msra.mxu3 %vm134_vm1, %v1821_v6 }
 0x65c   :  { %v1525_v40 = vpop.xlane.xlu1 %1524 }
 0x65d   :  { %3738 = vrcp.f32 %v1525_v40 }
 0x65f   :  { %v1905_v58 = vpop.permute.xlu2 %1904 }
 0x663   :  { %v3739_v2 = vpop.eup %3738 }
 0x664   :  { %v1549_v37 = vmul.f32 %v3739_v2, %v4465_v35 }
 0x666   :  { %3507 = vmatmul.msk.f32.vlgmr.msrb.gmra.mxu0 %vm134_vm1, %v1549_v37 }
 0x667   :  { %3518 = vmatpush.xpose.msk.msrb.mxu0 %vm134_vm1, %v1849_v31  ;;  %v1903_v8 = vpop.permute.xlu2 %1902 }
 0x674   :  { %v1847_v44 = vpop.permute.xlu1 %1846 }
 0x67c   :  { %v1933_v42 = vpop.permute.xlu1 %1932 }
 0x683   :  { %v1531_v13 = vpop.xlane.xlu0 %1530 }
 0x684   :  { %3740 = vrcp.f32 %v1531_v13  ;;  %v1961_v7 = vpop.permute.xlu1 %1960 }
 0x68a   :  { %v3741_v56 = vpop.eup %3740 }
 0x68b   :  { %v1551_v54 = vmul.f32 %v3741_v56, %v4481_v47  ;;  %v1534_v4 = vpop.xlane.xlu0 %1533  ;;  %v1875_v47 = vpop.permute.xlu2 %1874 }
 0x68c   :  { %3742 = vrcp.f32 %v1534_v4 }
 0x68d   :  { %3509 = vmatmul.msk.f32.vlgmr.msrb.gmra.mxu2 %vm134_vm1, %v1551_v54 }
 0x68e   :  { %3522 = vmatpush.xpose.msk.msrb.mxu2 %vm134_vm1, %v1905_v58 }
 0x692   :  { %v3743_v35 = vpop.eup %3742 }
 0x693   :  { %v1552_v50 = vmul.f32 %v3743_v35, %v4490_v55  ;;  %v1537_v60 = vpop.xlane.xlu0 %1536  ;;  %v1931_v55 = vpop.permute.xlu2 %1930 }
 0x694   :  { %3744 = vrcp.f32 %v1537_v60 }
 0x695   :  { %3510 = vmatmul.msk.f32.vlgmr.msrb.gmra.mxu3 %vm134_vm1, %v1552_v50  ;;  %3515 = vmatmul.msk.f32.vlgmr.msra.gmra.mxu2 %vm134_vm1, %v1791_v48 }
 0x696   :  { %3524 = vmatpush.xpose.msk.msrb.mxu3 %vm134_vm1, %v1933_v42 }
 0x69a   :  { %v3745_v34 = vpop.eup %3744 }
 0x69b   :  { %v1553_v41 = vmul.f32 %v3745_v34, %v4496_v5  ;;  %v1959_v5 = vpop.permute.xlu2 %1958 }
 0x69d   :  { %3511 = vmatmul.msk.f32.vlgmr.msra.gmra.mxu0 %vm134_vm1, %v1553_v41  ;;  %3517 = vmatmul.msk.f32.vlgmr.msra.gmra.mxu3 %vm134_vm1, %v1819_v15 }
 0x69e   :  { %3523 = vmatmul.msk.f32.vlgmr.msrb.gmra.mxu2 %vm134_vm1, %v1903_v8  ;;  %3526 = vmatpush.xpose.msk.msra.mxu0 %vm134_vm1, %v1961_v7 }
 0x6a5   :  { %3519 = vmatmul.msk.f32.vlgmr.msrb.gmra.mxu0 %vm134_vm1, %v1847_v44  ;;  %3525 = vmatmul.msk.f32.vlgmr.msrb.gmra.mxu3 %vm134_vm1, %v1931_v55 }
 0x6a6   :  { %v1877_v48 = vpop.permute.xlu0 %1876 }
 0x6a7   :  { %3520 = vmatpush.xpose.msk.msrb.mxu1 %vm134_vm1, %v1877_v48 }
 0x6aa   :  { %3521 = vmatmul.msk.f32.vlgmr.msrb.gmra.mxu1 %vm134_vm1, %v1875_v47 }
 0x6ad   :  { %3527 = vmatmul.msk.f32.vlgmr.msra.gmra.mxu0 %vm134_vm1, %v1959_v5 }
 0x6b6   :  { %v4536_v45 = vpop.f32.mrf.mxu1 }
 0x6bf   :  { %v4538_v15 = vpop.f32.mrf.mxu1 }
 0x6c7   :  { %v1787_v39 = vpop.f32.mrf.mxu1 }
 0x6c8   :  { %v1986_v36 = vmul.f32 0.35355338, %v1787_v39 }
 0x6ca   :  { %v1994_v59 = vadd.f32 %v1986_v36, %v4064_v61 }
 0x6cc   :  { %v2002_v62 = vsel %vm134_vm1, %v1994_v59, -inf }
 0x6cd   :  { %2003 = vmax.xlane.f32.xlu0 %v2002_v62  ;;  %v4544_v40 = vpop.f32.mrf.mxu3 }
 0x6d2   :  { %v4542_v6 = vpop.f32.mrf.mxu2 }
 0x6e3   :  { %v4548_v37 = vpop.f32.mrf.mxu0 }
 0x710   :  { %v4546_v2 = vpop.f32.mrf.mxu2 }
 0x718   :  { %v4550_v31 = vpop.f32.mrf.mxu3  ;;  %v1815_v13 = vpop.f32.mrf.mxu2 }
 0x719   :  { %v1987_v58 = vmul.f32 0.35355338, %v1815_v13 }
 0x71a   :  { %v4552_v44 = vpop.f32.mrf.mxu0 }
 0x71b   :  { %v1995_v56 = vadd.f32 %v1987_v58, %v4068_v3 }
 0x71d   :  { %v2005_v61 = vsel %vm134_vm1, %v1995_v56, -inf }
 0x71e   :  { %2006 = vmax.xlane.f32.xlu1 %v2005_v61 }
 0x720   :  { %v1843_v4 = vpop.f32.mrf.mxu3 }
 0x721   :  { %v1927_v54 = vpop.f32.mrf.mxu2  ;;  %v1988_v5 = vmul.f32 0.35355338, %v1843_v4 }
 0x722   :  { %v1991_v8 = vmul.f32 0.35355338, %v1927_v54  ;;  %v1871_v35 = vpop.f32.mrf.mxu0 }
 0x723   :  { %v1989_v42 = vmul.f32 0.35355338, %v1871_v35  ;;  %v1996_v13 = vadd.f32 %v1988_v5, %v4072_v9 }
 0x724   :  { %v1999_v50 = vadd.f32 %v1991_v8, %v4084_v33 }
 0x725   :  { %v1997_v60 = vadd.f32 %v1989_v42, %v4079_v17  ;;  %v2008_v58 = vsel %vm134_vm1, %v1996_v13, -inf }
 0x726   :  { %v2017_v47 = vsel %vm134_vm1, %v1999_v50, -inf }
 0x727   :  { %2018 = vmax.xlane.f32.xlu1 %v2017_v47  ;;  %v1899_v34 = vpop.f32.mrf.mxu1  ;;  %v2011_v41 = vsel %vm134_vm1, %v1997_v60, -inf }
 0x728   :  { %v1990_v7 = vmul.f32 0.35355338, %v1899_v34  ;;  %2012 = vmax.xlane.f32.xlu0 %v2011_v41  ;;  %v1955_v39 = vpop.f32.mrf.mxu3 }
 0x729   :  { %v1992_v36 = vmul.f32 0.35355338, %v1955_v39 }
 0x72a   :  { %v1983_v3 = vpop.f32.mrf.mxu0  ;;  %v4561_v55 = vadd.f32 %v1990_v7, %v4093_v38 }
 0x72b   :  { %v1993_v48 = vmul.f32 0.35355338, %v1983_v3  ;;  %v2000_v38 = vadd.f32 %v1992_v36, %v4096_v43 }
 0x72c   :  { %v2014_v33 = vsel %vm134_vm1, %v4561_v55, -inf }
 0x72d   :  { %2015 = vmax.xlane.f32.xlu2 %v2014_v33  ;;  %v4566_v17 = vadd.f32 %v1993_v48, %v4112_v53  ;;  %v2020_v61 = vsel %vm134_vm1, %v2000_v38, -inf }
 0x72f   :  { %v2023_v62 = vsel %vm134_vm1, %v4566_v17, -inf }
 0x730   :  { %2024 = vmax.xlane.f32.xlu0 %v2023_v62 }
 0x735   :  { %2009 = vmax.xlane.f32.xlu2 %v2008_v58 }
 0x738   :  { %2021 = vmax.xlane.f32.xlu0 %v2020_v61 }
 0x740   :  { %v2004_v53 = vpop.xlane.xlu0 %2003 }
 0x741   :  { %v2026_v54 = vsub.f32 %v1994_v59, %v2004_v53 }
 0x743   :  { %v2034_v4 = vmul.f32 1.442695, %v2026_v54 }
 0x745   :  { %3746 = vpow2.f32 %v2034_v4 }
 0x74b   :  { %v4578_v9 = vpop.eup %3746 }
 0x74c   :  { %3639 = vrot.lane.b32.xlu0 %v4018_v29, %s3870_s28  ;;  %v2050_v43 = vsel %vm134_vm1, %v4578_v9, 0.0 }
 0x74d   :  { %3634 = vrot.lane.b32.xlu2 %v4022_v30, %s3870_s28 }
 0x776   :  { %2051 = vadd.xlane.f32.xlu2 %v2050_v43 }
 0x78e   :  { %3644 = vrot.lane.b32.xlu2 %v4032_v32, %s3870_s28 }
 0x791   :  { %v2007_v8 = vpop.xlane.xlu1 %2006 }
 0x792   :  { %v2027_v35 = vsub.f32 %v1995_v56, %v2007_v8 }
 0x794   :  { %v2036_v42 = vmul.f32 1.442695, %v2027_v35 }
 0x796   :  { %3748 = vpow2.f32 %v2036_v42  ;;  %2246 = vrot.lane.b32.xlu2 %v4004_v26, %s3870_s28 }
 0x79a   :  { %v2019_v29 = vpop.xlane.xlu1 %2018 }
 0x79b   :  { %v2031_v30 = vsub.f32 %v1999_v50, %v2019_v29  ;;  %v2013_v56 = vpop.xlane.xlu0 %2012 }
 0x79c   :  { %v4586_v59 = vpop.eup %3748  ;;  %v2029_v48 = vsub.f32 %v1997_v60, %v2013_v56 }
 0x79d   :  { %v2044_v47 = vmul.f32 1.442695, %v2031_v30  ;;  %v2053_v34 = vsel %vm134_vm1, %v4586_v59, 0.0 }
 0x79e   :  { %2054 = vadd.xlane.f32.xlu1 %v2053_v34  ;;  %2272 = vrot.lane.b32.xlu2 %v4009_v28, %s3870_s28  ;;  %v2040_v33 = vmul.f32 1.442695, %v2029_v48 }
 0x79f   :  { %3750 = vpow2.f32 %v2044_v47 }
 0x7a0   :  { %v2016_v32 = vpop.xlane.xlu2 %2015 }
 0x7a3   :  { %v2025_v39 = vpop.xlane.xlu0 %2024 }
 0x7a4   :  { %v2033_v29 = vsub.f32 %v4566_v17, %v2025_v39 }
 0x7a5   :  { %v4592_v41 = vpop.eup %3750 }
 0x7a6   :  { %2338 = vrot.lane.b32.xlu2 %v4536_v45, %s3867_s26  ;;  %v2065_v50 = vsel %vm134_vm1, %v4592_v41, 0.0  ;;  %v2030_v45 = vsub.f32 %v4561_v55, %v2016_v32 }
 0x7a7   :  { %2066 = vadd.xlane.f32.xlu0 %v2065_v50 }
 0x7a8   :  { %v2010_v7 = vpop.xlane.xlu2 %2009  ;;  %v2042_v53 = vmul.f32 1.442695, %v2030_v45 }
 0x7a9   :  { %v2028_v3 = vsub.f32 %v1996_v13, %v2010_v7 }
 0x7ab   :  { %v2038_v5 = vmul.f32 1.442695, %v2028_v3  ;;  %v2022_v13 = vpop.xlane.xlu0 %2021 }
 0x7ad   :  { %3752 = vpow2.f32 %v2038_v5 }
 0x7ae   :  { %2308 = vrot.lane.b32.xlu2 %v4402_v52, %s3870_s28  ;;  %3754 = vpow2.f32 %v2040_v33  ;;  %v2032_v52 = vsub.f32 %v2000_v38, %v2022_v13 }
 0x7af   :  { %3756 = vpow2.f32 %v2042_v53 }
 0x7b0   :  { %v3635_v36 = vpop.permute.xlu2 %3634  ;;  %v2046_v43 = vmul.f32 1.442695, %v2032_v52 }
 0x7b1   :  { %v3637_v62 = vunpack.i.h.bf16 %v3635_v36  ;;  %v3636_v58 = vunpack.i.l.bf16 %v3635_v36 }
 0x7b2   :  { %3758 = vpow2.f32 %v2046_v43 }
 0x7b3   :  { %v4600_v61 = vpop.eup %3752  ;;  %2111 = vmatpush.msra.mxu1 %v3636_v58  ;;  %2137 = vmatpush.msra.mxu2 %v3637_v62 }
 0x7b4   :  { %v2056_v60 = vsel %vm134_vm1, %v4600_v61, 0.0  ;;  %v4605_v54 = vpop.eup %3754 }
 0x7b5   :  { %2057 = vadd.xlane.f32.xlu1 %v2056_v60  ;;  %v2059_v4 = vsel %vm134_vm1, %v4605_v54, 0.0  ;;  %v3757_v42 = vpop.eup %3756 }
 0x7b6   :  { %v2062_v38 = vsel %vm134_vm1, %v3757_v42, 0.0 }
 0x7b8   :  { %v3759_v30 = vpop.eup %3758 }
 0x7b9   :  { %v2068_v47 = vsel %vm134_vm1, %v3759_v30, 0.0 }
 0x7bb   :  { %2340 = vrot.lane.b32.xlu0 %v4542_v6, %s3867_s26  ;;  %v2048_v6 = vmul.f32 1.442695, %v2033_v29 }
 0x7bd   :  { %2060 = vadd.xlane.f32.xlu1 %v2059_v4  ;;  %3760 = vpow2.f32 %v2048_v6 }
 0x7be   :  { %v3640_v55 = vpop.permute.xlu0 %3639 }
 0x7bf   :  { %v3642_v8 = vunpack.i.h.bf16 %v3640_v55  ;;  %v3641_v35 = vunpack.i.l.bf16 %v3640_v55 }
 0x7c1   :  { %2163 = vmatpush.msra.mxu3 %v3641_v35  ;;  %2189 = vmatpush.msrb.mxu0 %v3642_v8  ;;  %v2423_v8 = vld [vmem:[%s5127_s4 + $0x18] sm:$0xff]  ;;  %v2422_v35 = vld [vmem:[%s5127_s4 + $0x10] sm:$0xff] }
 0x7c3   :  { %2344 = vrot.lane.b32.xlu0 %v4548_v37, %s3867_s26  ;;  %v3761_v34 = vpop.eup %3760 }
 0x7c4   :  { %v2071_v17 = vsel %vm134_vm1, %v3761_v34, 0.0 }
 0x7c5   :  { %2063 = vadd.xlane.f32.xlu1 %v2062_v38 }
 0x7cb   :  { %2346 = vrot.lane.b32.xlu0 %v4538_v15, %s3867_s26 }
 0x7cd   :  { %2069 = vadd.xlane.f32.xlu1 %v2068_v47 }
 0x7d3   :  { %2348 = vrot.lane.b32.xlu0 %v4546_v2, %s3867_s26 }
 0x7d5   :  { %2072 = vadd.xlane.f32.xlu1 %v2071_v17 }
 0x7db   :  { %2350 = vrot.lane.b32.xlu0 %v4550_v31, %s3867_s26 }
 0x7e3   :  { %2352 = vrot.lane.b32.xlu0 %v4552_v44, %s3867_s26 }
 0x7e9   :  { %v2052_v37 = vpop.xlane.xlu2 %2051 }
 0x7ea   :  { %3762 = vrcp.f32 %v2052_v37 }
 0x7ee   :  { %2306 = vrot.lane.b32.xlu1 %v4394_v51, %s3870_s28 }
 0x7f0   :  { %v3763_v15 = vpop.eup %3762 }
 0x7f1   :  { %v2082_v32 = vmul.f32 %v3763_v15, %v4578_v9  ;;  %v3645_v56 = vpop.permute.xlu2 %3644 }
 0x7f2   :  { %v3647_v50 = vunpack.i.h.bf16 %v3645_v56  ;;  %v3646_v2 = vunpack.i.l.bf16 %v3645_v56 }
 0x7f3   :  { %3528 = vmatmul.msk.f32.vlgmr.msra.gmra.mxu1 %vm134_vm1, %v2082_v32 }
 0x7f4   :  { %2215 = vmatpush.msrb.mxu1 %v3646_v2  ;;  %2241 = vmatpush.msrb.mxu2 %v3647_v50 }
 0x7f6   :  { %2461 = vmatpush.msra.mxu1 %v2423_v8 }
 0x7f8   :  { %2462 = vmatpush.msra.mxu1 %v2422_v35 }
 0x7f9   :  { %v2247_v7 = vpop.permute.xlu2 %2246 }
 0x7fa   :  { %2267 = vmatpush.msrb.mxu3 %v2247_v7 }
 0x801   :  { %v2273_v31 = vpop.permute.xlu2 %2272 }
 0x802   :  { %2293 = vmatpush.msra.mxu0 %v2273_v31 }
 0x811   :  { %v2055_v44 = vpop.xlane.xlu1 %2054 }
 0x812   :  { %3764 = vrcp.f32 %v2055_v44 }
 0x818   :  { %v3765_v3 = vpop.eup %3764 }
 0x819   :  { %v2083_v48 = vmul.f32 %v3765_v3, %v4586_v59 }
 0x81a   :  { %v2067_v51 = vpop.xlane.xlu0 %2066 }
 0x81b   :  { %3766 = vrcp.f32 %v2067_v51  ;;  %3529 = vmatmul.msk.f32.vlgmr.msra.gmra.mxu2 %vm134_vm1, %v2083_v48 }
 0x821   :  { %v3767_v9 = vpop.eup %3766 }
 0x822   :  { %v2087_v5 = vmul.f32 %v3767_v9, %v4592_v41 }
 0x824   :  { %3533 = vmatmul.msk.f32.vlgmr.msrb.gmra.mxu2 %vm134_vm1, %v2087_v5 }
 0x828   :  { %v2058_v39 = vpop.xlane.xlu1 %2057 }
 0x829   :  { %3768 = vrcp.f32 %v2058_v39 }
 0x82d   :  { %v2341_v15 = vpop.permute.xlu0 %2340 }
 0x82f   :  { %v3769_v33 = vpop.eup %3768 }
 0x830   :  { %v2084_v36 = vmul.f32 %v3769_v33, %v4600_v61  ;;  %v2061_v62 = vpop.xlane.xlu1 %2060 }
 0x831   :  { %3770 = vrcp.f32 %v2061_v62 }
 0x832   :  { %3530 = vmatmul.msk.f32.vlgmr.msra.gmra.mxu3 %vm134_vm1, %v2084_v36 }
 0x835   :  { %v2345_v44 = vpop.permute.xlu0 %2344 }
 0x837   :  { %v3771_v58 = vpop.eup %3770 }
 0x838   :  { %v2085_v59 = vmul.f32 %v3771_v58, %v4605_v54  ;;  %v2064_v45 = vpop.xlane.xlu1 %2063 }
 0x839   :  { %3772 = vrcp.f32 %v2064_v45 }
 0x83a   :  { %3531 = vmatmul.msk.f32.vlgmr.msrb.gmra.mxu0 %vm134_vm1, %v2085_v59 }
 0x83d   :  { %v2347_v39 = vpop.permute.xlu0 %2346 }
 0x83f   :  { %v3773_v60 = vpop.eup %3772 }
 0x840   :  { %v2086_v41 = vmul.f32 %v3773_v60, %v3757_v42  ;;  %v2070_v13 = vpop.xlane.xlu1 %2069  ;;  %v2421_v42 = vld [vmem:[%s5127_s4 + $0x8] sm:$0xff] }
 0x841   :  { %3774 = vrcp.f32 %v2070_v13  ;;  %2463 = vmatpush.msra.mxu1 %v2421_v42 }
 0x842   :  { %3532 = vmatmul.msk.f32.vlgmr.msrb.gmra.mxu1 %vm134_vm1, %v2086_v41 }
 0x845   :  { %v2349_v45 = vpop.permute.xlu0 %2348 }
 0x847   :  { %v3775_v53 = vpop.eup %3774 }
 0x848   :  { %v2088_v52 = vmul.f32 %v3775_v53, %v3759_v30  ;;  %v2073_v61 = vpop.xlane.xlu1 %2072 }
 0x849   :  { %3776 = vrcp.f32 %v2073_v61 }
 0x84a   :  { %3534 = vmatmul.msk.f32.vlgmr.msrb.gmra.mxu3 %vm134_vm1, %v2088_v52 }
 0x84d   :  { %v2351_v52 = vpop.permute.xlu0 %2350 }
 0x84f   :  { %v3777_v4 = vpop.eup %3776 }
 0x850   :  { %v2089_v55 = vmul.f32 %v3777_v4, %v3761_v34 }
 0x852   :  { %3535 = vmatmul.msk.f32.vlgmr.msra.gmra.mxu0 %vm134_vm1, %v2089_v55 }
 0x860   :  { %v2307_v30 = vpop.permute.xlu1 %2306 }
 0x870   :  { %v2113_v54 = vpop.f32.mrf.mxu1 }
 0x871   :  { %2370 = vrot.lane.b32.xlu2 %v2113_v54, %s3864_s23 }
 0x879   :  { %2310 = vrot.lane.b32.xlu2 %v4398_v27, %s3870_s28  ;;  %v2420_v27 = vld [vmem:[%s5127_s4] sm:$0xff] }
 0x87a   :  { %2464 = vmatpush.msra.mxu1 %v2420_v27 }
 0x89e   :  { %v2139_v43 = vpop.f32.mrf.mxu2 }
 0x89f   :  { %2372 = vrot.lane.b32.xlu1 %v2139_v43, %s3864_s23 }
 0x8a7   :  { %2342 = vrot.lane.b32.xlu1 %v4544_v40, %s3867_s26  ;;  %v2339_v40 = vpop.permute.xlu2 %2338  ;;  %v2243_v37 = vpop.f32.mrf.mxu2 }
 0x8af   :  { %2312 = vrot.lane.b32.xlu1 %v4414_v57, %s3870_s28  ;;  %v2309_v6 = vpop.permute.xlu2 %2308  ;;  %v2394_v57 = vsel %vm134_vm1, %v4248_v19, %v2307_v30 }
 0x8b0   :  { %v2403_v34 = vsel %vm2402_vm3, %v2394_v57, %v2339_v40  ;;  %v2395_v32 = vsel %vm134_vm1, %v4250_v21, %v2309_v6 }
 0x8b1   :  { %v2404_v56 = vsel %vm2402_vm3, %v2395_v32, %v2341_v15  ;;  %v3871_v32 = vmov 32.0  }
 0x8b2   :  { %3778 = vrcp.f32 %v3871_v32 }
 0x8b5   :  { %v2165_v29 = vpop.f32.mrf.mxu3 }
 0x8b6   :  { %2374 = vrot.lane.b32.xlu2 %v2165_v29, %s3864_s23 }
 0x8b7   :  { %2314 = vrot.lane.b32.xlu1 %v4396_v10, %s3870_s28  ;;  %v2191_v38 = vpop.f32.mrf.mxu0 }
 0x8be   :  { %2376 = vrot.lane.b32.xlu2 %v2191_v38, %s3864_s23 }
 0x8bf   :  { %2316 = vrot.lane.b32.xlu1 %v4408_v1, %s3870_s28  ;;  %v2217_v47 = vpop.f32.mrf.mxu1 }
 0x8c6   :  { %2378 = vrot.lane.b32.xlu2 %v2217_v47, %s3864_s23 }
 0x8c7   :  { %2318 = vrot.lane.b32.xlu1 %v4404_v0, %s3870_s28 }
 0x8cb   :  { %v2371_v10 = vpop.permute.xlu2 %2370 }
 0x8cc   :  { %v2412_v17 = vsel %vm2411_vm2, %v2403_v34, %v2371_v10 }
 0x8cd   :  { %3536 = vmatmul.msk.f32.vlgmr.msra.gmra.mxu1 %vm53_vm0, %v2412_v17  ;;  %v2269_v1 = vpop.f32.mrf.mxu3 }
 0x8ce   :  { %2380 = vrot.lane.b32.xlu2 %v2243_v37, %s3864_s23 }
 0x8cf   :  { %2320 = vrot.lane.b32.xlu1 %v4416_v46, %s3870_s28  ;;  %v2295_v0 = vpop.f32.mrf.mxu0 }
 0x8d3   :  { %v2311_v19 = vpop.permute.xlu2 %2310 }
 0x8d4   :  { %v2396_v46 = vsel %vm134_vm1, %v4242_v11, %v2311_v19 }
 0x8d6   :  { %2382 = vrot.lane.b32.xlu2 %v2269_v1, %s3864_s23 }
 0x8de   :  { %2384 = vrot.lane.b32.xlu2 %v2295_v0, %s3864_s23 }
 0x910   :  { %v2375_v50 = vpop.permute.xlu2 %2374 }
 0x911   :  { %v2373_v2 = vpop.permute.xlu1 %2372 }
 0x912   :  { %v2413_v7 = vsel %vm2411_vm2, %v2404_v56, %v2373_v2  ;;  %v3779_v2 = vpop.eup %3778 }
 0x913   :  { %3537 = vmatmul.msk.f32.gmra.mxu1 %vm53_vm0, %v2413_v7  ;;  %vm2527_vm4 = vweird.f32 %v3779_v2 }
 0x918   :  { %v2377_v48 = vpop.permute.xlu2 %2376 }
 0x919   :  { %v2343_v31 = vpop.permute.xlu1 %2342 }
 0x91a   :  { %v2405_v3 = vsel %vm2402_vm3, %v2396_v46, %v2343_v31 }
 0x91b   :  { %v2414_v51 = vsel %vm2411_vm2, %v2405_v3, %v2375_v50 }
 0x91c   :  { %3538 = vmatmul.msk.f32.gmra.mxu1 %vm53_vm0, %v2414_v51 }
 0x920   :  { %v2379_v36 = vpop.permute.xlu2 %2378 }
 0x921   :  { %v2313_v21 = vpop.permute.xlu1 %2312 }
 0x922   :  { %v2397_v9 = vsel %vm134_vm1, %v4252_v23, %v2313_v21 }
 0x923   :  { %v2406_v5 = vsel %vm2402_vm3, %v2397_v9, %v2345_v44 }
 0x924   :  { %v2415_v33 = vsel %vm2411_vm2, %v2406_v5, %v2377_v48 }
 0x925   :  { %3539 = vmatmul.msk.f32.gmra.mxu1 %vm53_vm0, %v2415_v33 }
 0x928   :  { %v2381_v23 = vpop.permute.xlu2 %2380 }
 0x929   :  { %v2315_v11 = vpop.permute.xlu1 %2314 }
 0x92a   :  { %v2398_v62 = vsel %vm134_vm1, %v4254_v63, %v2315_v11 }
 0x92b   :  { %v2407_v58 = vsel %vm2402_vm3, %v2398_v62, %v2347_v39 }
 0x92c   :  { %v2416_v59 = vsel %vm2411_vm2, %v2407_v58, %v2379_v36 }
 0x92d   :  { %3540 = vmatmul.msk.f32.gmra.mxu1 %vm53_vm0, %v2416_v59 }
 0x930   :  { %v2383_v63 = vpop.permute.xlu2 %2382 }
 0x931   :  { %v2317_v60 = vpop.permute.xlu1 %2316 }
 0x932   :  { %v2399_v41 = vsel %vm134_vm1, %v4244_v49, %v2317_v60  ;;  %v2353_v49 = vpop.permute.xlu0 %2352 }
 0x933   :  { %v2408_v13 = vsel %vm2402_vm3, %v2399_v41, %v2349_v45 }
 0x934   :  { %v2417_v53 = vsel %vm2411_vm2, %v2408_v13, %v2381_v23 }
 0x935   :  { %3541 = vmatmul.msk.f32.gmra.mxu1 %vm53_vm0, %v2417_v53 }
 0x938   :  { %v2385_v35 = vpop.permute.xlu2 %2384 }
 0x939   :  { %v2319_v61 = vpop.permute.xlu1 %2318 }
 0x93a   :  { %v2400_v4 = vsel %vm134_vm1, %v4256_v25, %v2319_v61  ;;  %v4716_v25 = vld [vmem:[%s5131_s8] sm:$0xff] }
 0x93b   :  { %v2409_v55 = vsel %vm2402_vm3, %v2400_v4, %v2351_v52  ;;  %v2424_v29 = vperm.slane %v4716_v25, 0 }
 0x93c   :  { %v2418_v54 = vsel %vm2411_vm2, %v2409_v55, %v2383_v63 }
 0x93d   :  { %3542 = vmatmul.msk.f32.gmra.mxu1 %vm53_vm0, %v2418_v54 }
 0x941   :  { %v2321_v43 = vpop.permute.xlu1 %2320 }
 0x942   :  { %v2401_v8 = vsel %vm134_vm1, %v4258_v12, %v2321_v43 }
 0x943   :  { %v2410_v42 = vsel %vm2402_vm3, %v2401_v8, %v2353_v49 }
 0x944   :  { %v2419_v27 = vsel %vm2411_vm2, %v2410_v42, %v2385_v35 }
 0x945   :  { %3543 = vmatmul.msk.f32.gmra.mxu1 %vm53_vm0, %v2419_v27 }
 0x94a   :  { %v2466_v40 = vpop.f32.mrf.mxu1 }
 0x94b   :  { %v2467_v38 = vadd.f32 %v2466_v40, %v2424_v29 }
 0x94d   :  { %v2490_v6 = vadd.f32 %v2467_v38, %v3976_v14 }
 0x94f   :  { %v2498_v12 = vsel %vm53_vm0, %v2490_v6, 0.0 }
 0x950   :  { %2499 = vadd.xlane.f32.xlu1 %v2498_v12 }
 0x990   :  { %v2469_v30 = vpop.f32.mrf.mxu1 }
 0x991   :  { %v2470_v47 = vadd.f32 %v2469_v30, %v2424_v29 }
 0x993   :  { %v2491_v57 = vadd.f32 %v2470_v47, %v3981_v16 }
 0x995   :  { %v2501_v10 = vsel %vm53_vm0, %v2491_v57, 0.0 }
 0x996   :  { %2502 = vadd.xlane.f32.xlu0 %v2501_v10 }
 0x999   :  { %v2472_v34 = vpop.f32.mrf.mxu1 }
 0x99a   :  { %v2473_v17 = vadd.f32 %v2472_v34, %v2424_v29  ;;  %v2702_v34 = vld [vmem:[%s5128_s5 + $0x18] sm:$0xff] }
 0x99b   :  { %2743 = vmatpush.msra.mxu2 %v2702_v34 }
 0x99c   :  { %v2492_v37 = vadd.f32 %v2473_v17, %v3986_v18  ;;  %v2523_v18 = vmul.f32 32.0, %v3779_v2 }
 0x99e   :  { %v2504_v1 = vsel %vm53_vm0, %v2492_v37, 0.0  ;;  %v2524_v3 = vsub.f32 1.0, %v2523_v18 }
 0x99f   :  { %2505 = vadd.xlane.f32.xlu2 %v2504_v1  ;;  %v2700_v1 = vld [vmem:[%s5128_s5 + $0x8] sm:$0xff] }
 0x9a0   :  { %v2525_v48 = vmul.f32 %v3779_v2, %v2524_v3 }
 0x9a2   :  { %v2475_v0 = vpop.f32.mrf.mxu1  ;;  %v2526_v5 = vadd.f32 %v3779_v2, %v2525_v48 }
 0x9a3   :  { %v2476_v19 = vadd.f32 %v2475_v0, %v2424_v29 }
 0x9a4   :  { %v4734_v39 = vsel %vm2527_vm4, %v3779_v2, %v2526_v5  ;;  %v4804_v5 = vperm.slane %v4716_v25, 2 }
 0x9a5   :  { %v2493_v14 = vadd.f32 %v2476_v19, %v3991_v20  ;;  %v2699_v19 = vld [vmem:[%s5128_s5] sm:$0xff] }
 0x9a7   :  { %v2507_v15 = vsel %vm53_vm0, %v2493_v14, 0.0 }
 0x9a8   :  { %2508 = vadd.xlane.f32.xlu1 %v2507_v15 }
 0x9aa   :  { %v2478_v16 = vpop.f32.mrf.mxu1 }
 0x9ab   :  { %v2479_v56 = vadd.f32 %v2478_v16, %v2424_v29 }
 0x9ad   :  { %v2494_v50 = vadd.f32 %v2479_v56, %v3994_v22 }
 0x9af   :  { %v2510_v7 = vsel %vm53_vm0, %v2494_v50, 0.0 }
 0x9b0   :  { %2511 = vadd.xlane.f32.xlu0 %v2510_v7 }
 0x9b2   :  { %v2481_v46 = vpop.f32.mrf.mxu1 }
 0x9b3   :  { %v2482_v31 = vadd.f32 %v2481_v46, %v2424_v29 }
 0x9b5   :  { %v2495_v44 = vadd.f32 %v2482_v31, %v3999_v24 }
 0x9b7   :  { %v2513_v20 = vsel %vm53_vm0, %v2495_v44, 0.0 }
 0x9b8   :  { %2514 = vadd.xlane.f32.xlu2 %v2513_v20 }
 0x9ba   :  { %v2484_v51 = vpop.f32.mrf.mxu1 }
 0x9bb   :  { %v2485_v21 = vadd.f32 %v2484_v51, %v2424_v29  ;;  %v4800_v51 = vperm.slane %v4716_v25, 1 }
 0x9bd   :  { %v2496_v9 = vadd.f32 %v2485_v21, %v4004_v26 }
 0x9bf   :  { %v2516_v22 = vsel %vm53_vm0, %v2496_v9, 0.0 }
 0x9c0   :  { %2517 = vadd.xlane.f32.xlu0 %v2516_v22 }
 0x9c2   :  { %v2487_v11 = vpop.f32.mrf.mxu1 }
 0x9c3   :  { %v2500_v33 = vpop.xlane.xlu1 %2499  ;;  %v2488_v58 = vadd.f32 %v2487_v11, %v2424_v29 }
 0x9c4   :  { %v2529_v36 = vmul.f32 %v4734_v39, %v2500_v33 }
 0x9c5   :  { %v2497_v26 = vadd.f32 %v2488_v58, %v4009_v28 }
 0x9c6   :  { %v4737_v24 = vsub.f32 %v2490_v6, %v2529_v36 }
 0x9c7   :  { %v2519_v45 = vsel %vm53_vm0, %v2497_v26, 0.0 }
 0x9c8   :  { %v2545_v62 = vmul.f32 %v4737_v24, %v4737_v24 }
 0x9ca   :  { %v2553_v59 = vsel %vm53_vm0, %v2545_v62, 0.0 }
 0x9cb   :  { %2554 = vadd.xlane.f32.xlu1 %v2553_v59 }
 0x9d3   :  { %2520 = vadd.xlane.f32.xlu1 %v2519_v45 }
 0xa09   :  { %v2503_v23 = vpop.xlane.xlu0 %2502 }
 0xa0a   :  { %v2530_v60 = vmul.f32 %v4734_v39, %v2503_v23 }
 0xa0c   :  { %v4745_v41 = vsub.f32 %v2491_v57, %v2530_v60 }
 0xa0e   :  { %v2546_v13 = vmul.f32 %v4745_v41, %v4745_v41 }
 0xa10   :  { %v2556_v53 = vsel %vm53_vm0, %v2546_v13, 0.0 }
 0xa11   :  { %2557 = vadd.xlane.f32.xlu2 %v2556_v53 }
 0xa12   :  { %v2506_v52 = vpop.xlane.xlu2 %2505 }
 0xa13   :  { %v2531_v63 = vmul.f32 %v4734_v39, %v2506_v52 }
 0xa15   :  { %v4751_v61 = vsub.f32 %v2492_v37, %v2531_v63  ;;  %v2701_v37 = vld [vmem:[%s5128_s5 + $0x10] sm:$0xff] }
 0xa16   :  { %2744 = vmatpush.msra.mxu2 %v2701_v37 }
 0xa17   :  { %v2547_v28 = vmul.f32 %v4751_v61, %v4751_v61 }
 0xa18   :  { %2745 = vmatpush.msra.mxu2 %v2700_v1 }
 0xa19   :  { %v2559_v4 = vsel %vm53_vm0, %v2547_v28, 0.0 }
 0xa1a   :  { %2560 = vadd.xlane.f32.xlu0 %v2559_v4  ;;  %2746 = vmatpush.msra.mxu2 %v2699_v19 }
 0xa1b   :  { %v2509_v55 = vpop.xlane.xlu1 %2508 }
 0xa1c   :  { %v2532_v54 = vmul.f32 %v4734_v39, %v2509_v55 }
 0xa1e   :  { %v4757_v43 = vsub.f32 %v2493_v14, %v2532_v54 }
 0xa20   :  { %v2548_v49 = vmul.f32 %v4757_v43, %v4757_v43 }
 0xa22   :  { %v2562_v8 = vsel %vm53_vm0, %v2548_v49, 0.0 }
 0xa23   :  { %v2512_v35 = vpop.xlane.xlu0 %2511  ;;  %2563 = vadd.xlane.f32.xlu2 %v2562_v8 }
 0xa24   :  { %v2533_v42 = vmul.f32 %v4734_v39, %v2512_v35 }
 0xa26   :  { %v4763_v27 = vsub.f32 %v2494_v50, %v2533_v42 }
 0xa28   :  { %v2549_v29 = vmul.f32 %v4763_v27, %v4763_v27 }
 0xa2a   :  { %v2565_v40 = vsel %vm53_vm0, %v2549_v29, 0.0 }
 0xa2b   :  { %2566 = vadd.xlane.f32.xlu1 %v2565_v40  ;;  %v2515_v38 = vpop.xlane.xlu2 %2514 }
 0xa2c   :  { %v2534_v6 = vmul.f32 %v4734_v39, %v2515_v38 }
 0xa2e   :  { %v4769_v12 = vsub.f32 %v2495_v44, %v2534_v6 }
 0xa30   :  { %v2550_v30 = vmul.f32 %v4769_v12, %v4769_v12 }
 0xa32   :  { %v2568_v47 = vsel %vm53_vm0, %v2550_v30, 0.0 }
 0xa33   :  { %v2518_v57 = vpop.xlane.xlu0 %2517  ;;  %2569 = vadd.xlane.f32.xlu0 %v2568_v47 }
 0xa34   :  { %v2535_v10 = vmul.f32 %v4734_v39, %v2518_v57 }
 0xa36   :  { %v4778_v17 = vsub.f32 %v2496_v9, %v2535_v10 }
 0xa38   :  { %v2551_v0 = vmul.f32 %v4778_v17, %v4778_v17 }
 0xa3a   :  { %v2571_v14 = vsel %vm53_vm0, %v2551_v0, 0.0 }
 0xa3b   :  { %2572 = vadd.xlane.f32.xlu2 %v2571_v14 }
 0xa3e   :  { %v2555_v15 = vpop.xlane.xlu1 %2554 }
 0xa3f   :  { %v2577_v32 = vmul.f32 %v2555_v15, %v4734_v39 }
 0xa41   :  { %v2585_v16 = vadd.f32 1e-12, %v2577_v32 }
 0xa43   :  { %3780 = vrsqrt.f32 %v2585_v16  ;;  %vm2599_vm6 = vweird.f32 %v2585_v16 }
 0xa46   :  { %v2521_v56 = vpop.xlane.xlu1 %2520 }
 0xa47   :  { %v2536_v50 = vmul.f32 %v4734_v39, %v2521_v56 }
 0xa49   :  { %v3781_v2 = vpop.eup %3780  ;;  %v4794_v7 = vsub.f32 %v2497_v26, %v2536_v50 }
 0xa4a   :  { %v2594_v18 = vmul.f32 %v3781_v2, %v2585_v16  ;;  %vm2600_vm5 = vweird.f32 %v3781_v2 }
 0xa4b   :  { %v2552_v46 = vmul.f32 %v4794_v7, %v4794_v7  ;;  %vm2601_vm7 = vmor %vm2599_vm6, %vm2600_vm5 }
 0xa4c   :  { %v2595_v31 = vmul.f32 %v3781_v2, %v2594_v18 }
 0xa4d   :  { %v2574_v44 = vsel %vm53_vm0, %v2552_v46, 0.0 }
 0xa4e   :  { %v2596_v3 = vmul.f32 0.5, %v2595_v31  ;;  %2575 = vadd.xlane.f32.xlu1 %v2574_v44 }
 0xa50   :  { %v2597_v20 = vsub.f32 1.5, %v2596_v3 }
 0xa52   :  { %v2598_v48 = vmul.f32 %v3781_v2, %v2597_v20 }
 0xa54   :  { %v2602_v21 = vsel %vm2601_vm7, %v3781_v2, %v2598_v48 }
 0xa55   :  { %v2673_v9 = vmul.f32 %v2602_v21, %v4737_v24 }
 0xa57   :  { %v2682_v22 = vmul.f32 %v4800_v51, %v2673_v9 }
 0xa59   :  { %v4808_v33 = vadd.f32 %v4804_v5, %v2682_v22 }
 0xa5b   :  { %3544 = vmatmul.msk.f32.vlgmr.msra.gmra.mxu2 %vm53_vm0, %v4808_v33 }
 0xa84   :  { %v2558_v36 = vpop.xlane.xlu2 %2557 }
 0xa85   :  { %v2578_v11 = vmul.f32 %v2558_v36, %v4734_v39 }
 0xa87   :  { %v2586_v62 = vadd.f32 1e-12, %v2578_v11 }
 0xa89   :  { %3782 = vrsqrt.f32 %v2586_v62  ;;  %vm2609_vm9 = vweird.f32 %v2586_v62 }
 0xa8d   :  { %v2561_v58 = vpop.xlane.xlu0 %2560 }
 0xa8e   :  { %v2579_v59 = vmul.f32 %v2561_v58, %v4734_v39 }
 0xa8f   :  { %v3783_v24 = vpop.eup %3782 }
 0xa90   :  { %v2604_v26 = vmul.f32 %v3783_v24, %v2586_v62  ;;  %v2587_v45 = vadd.f32 1e-12, %v2579_v59  ;;  %vm2610_vm8 = vweird.f32 %v3783_v24 }
 0xa91   :  { %vm2611_vm10 = vmor %vm2609_vm9, %vm2610_vm8 }
 0xa92   :  { %v2605_v23 = vmul.f32 %v3783_v24, %v2604_v26  ;;  %3784 = vrsqrt.f32 %v2587_v45  ;;  %vm2619_vm12 = vweird.f32 %v2587_v45 }
 0xa94   :  { %v2606_v60 = vmul.f32 0.5, %v2605_v23 }
 0xa96   :  { %v2607_v13 = vsub.f32 1.5, %v2606_v60  ;;  %v2564_v53 = vpop.xlane.xlu2 %2563 }
 0xa97   :  { %v2580_v52 = vmul.f32 %v2564_v53, %v4734_v39 }
 0xa98   :  { %v3785_v63 = vpop.eup %3784  ;;  %v2608_v28 = vmul.f32 %v3783_v24, %v2607_v13 }
 0xa99   :  { %v2614_v4 = vmul.f32 %v3785_v63, %v2587_v45  ;;  %v2588_v55 = vadd.f32 1e-12, %v2580_v52  ;;  %vm2620_vm11 = vweird.f32 %v3785_v63 }
 0xa9a   :  { %v2612_v54 = vsel %vm2611_vm10, %v3783_v24, %v2608_v28  ;;  %vm2621_vm13 = vmor %vm2619_vm12, %vm2620_vm11 }
 0xa9b   :  { %v2615_v49 = vmul.f32 %v3785_v63, %v2614_v4  ;;  %3786 = vrsqrt.f32 %v2588_v55  ;;  %v2674_v8 = vmul.f32 %v2612_v54, %v4745_v41  ;;  %vm2629_vm15 = vweird.f32 %v2588_v55 }
 0xa9d   :  { %v2616_v35 = vmul.f32 0.5, %v2615_v49  ;;  %v2683_v42 = vmul.f32 %v4800_v51, %v2674_v8 }
 0xa9e   :  { %v2567_v29 = vpop.xlane.xlu1 %2566 }
 0xa9f   :  { %v2617_v40 = vsub.f32 1.5, %v2616_v35  ;;  %v2581_v38 = vmul.f32 %v2567_v29, %v4734_v39  ;;  %v4819_v6 = vadd.f32 %v4804_v5, %v2683_v42 }
 0xaa1   :  { %v3787_v30 = vpop.eup %3786  ;;  %v2618_v47 = vmul.f32 %v3785_v63, %v2617_v40  ;;  %v2589_v57 = vadd.f32 1e-12, %v2581_v38  ;;  %3545 = vmatmul.msk.f32.gmra.mxu2 %vm53_vm0, %v4819_v6  ;;  %v2851_v40 = vld [vmem:[%s5130_s7 + $0x38] sm:$0xff] }
 0xaa2   :  { %v2624_v41 = vmul.f32 %v3787_v30, %v2588_v55  ;;  %vm2630_vm14 = vweird.f32 %v3787_v30  ;;  %2886 = vmatpush.msra.mxu3 %v2851_v40 }
 0xaa3   :  { %v2622_v10 = vsel %vm2621_vm13, %v3785_v63, %v2618_v47  ;;  %3788 = vrsqrt.f32 %v2589_v57  ;;  %vm2631_vm2 = vmor %vm2629_vm15, %vm2630_vm14  ;;  %vm2639_vm4 = vweird.f32 %v2589_v57  ;;  %v2848_v47 = vld [vmem:[%s5130_s7 + $0x20] sm:$0xff]  ;;  %vm2853_vm15 = vcmask 523264  }
 0xaa4   :  { %v2625_v34 = vmul.f32 %v3787_v30, %v2624_v41  ;;  %v2675_v37 = vmul.f32 %v2622_v10, %v4751_v61  ;;  %v2847_v10 = vld [vmem:[%s5130_s7 + $0x18] sm:$0xff] }
 0xaa6   :  { %v2626_v1 = vmul.f32 0.5, %v2625_v34  ;;  %v2570_v0 = vpop.xlane.xlu0 %2569  ;;  %v2684_v19 = vmul.f32 %v4800_v51, %v2675_v37  ;;  %v2846_v37 = vld [vmem:[%s5130_s7 + $0x10] sm:$0xff] }
 0xaa7   :  { %v2582_v14 = vmul.f32 %v2570_v0, %v4734_v39  ;;  %v2845_v0 = vld [vmem:[%s5130_s7 + $0x8] sm:$0xff] }
 0xaa8   :  { %v2627_v15 = vsub.f32 1.5, %v2626_v1  ;;  %v4827_v32 = vadd.f32 %v4804_v5, %v2684_v19 }
 0xaa9   :  { %v3789_v16 = vpop.eup %3788  ;;  %v2590_v56 = vadd.f32 1e-12, %v2582_v14  ;;  %v2844_v14 = vld [vmem:[%s5130_s7] sm:$0xff] }
 0xaaa   :  { %v2628_v50 = vmul.f32 %v3787_v30, %v2627_v15  ;;  %v2634_v2 = vmul.f32 %v3789_v16, %v2589_v57  ;;  %3546 = vmatmul.msk.f32.gmra.mxu2 %vm53_vm0, %v4827_v32  ;;  %vm2640_vm3 = vweird.f32 %v3789_v16 }
 0xaab   :  { %3790 = vrsqrt.f32 %v2590_v56  ;;  %vm2641_vm5 = vmor %vm2639_vm4, %vm2640_vm3  ;;  %vm2649_vm7 = vweird.f32 %v2590_v56 }
 0xaac   :  { %v2632_v61 = vsel %vm2631_vm2, %v3787_v30, %v2628_v50  ;;  %v2635_v18 = vmul.f32 %v3789_v16, %v2634_v2  ;;  %v2850_v30 = vld [vmem:[%s5130_s7 + $0x30] sm:$0xff]  ;;  %v4890_v2 = vld [vmem:[%s5129_s6] ss:$0 sm:$0xff] }
 0xaad   :  { %v2676_v46 = vmul.f32 %v2632_v61, %v4757_v43  ;;  %2887 = vmatpush.msra.mxu3 %v2850_v30 }
 0xaae   :  { %v2636_v31 = vmul.f32 0.5, %v2635_v18  ;;  %v2573_v44 = vpop.xlane.xlu2 %2572 }
 0xaaf   :  { %v2583_v3 = vmul.f32 %v2573_v44, %v4734_v39  ;;  %v2685_v20 = vmul.f32 %v4800_v51, %v2676_v46 }
 0xab0   :  { %v2637_v48 = vsub.f32 1.5, %v2636_v31 }
 0xab1   :  { %v3791_v21 = vpop.eup %3790  ;;  %v2591_v9 = vadd.f32 1e-12, %v2583_v3  ;;  %v4835_v22 = vadd.f32 %v4804_v5, %v2685_v20 }
 0xab2   :  { %v2638_v36 = vmul.f32 %v3789_v16, %v2637_v48  ;;  %v2644_v11 = vmul.f32 %v3791_v21, %v2590_v56  ;;  %vm2650_vm6 = vweird.f32 %v3791_v21 }
 0xab3   :  { %3792 = vrsqrt.f32 %v2591_v9  ;;  %3547 = vmatmul.msk.f32.gmra.mxu2 %vm53_vm0, %v4835_v22  ;;  %vm2651_vm8 = vmor %vm2649_vm7, %vm2650_vm6  ;;  %vm2659_vm10 = vweird.f32 %v2591_v9 }
 0xab4   :  { %v2642_v43 = vsel %vm2641_vm5, %v3789_v16, %v2638_v36  ;;  %v2645_v62 = vmul.f32 %v3791_v21, %v2644_v11 }
 0xab5   :  { %v2677_v58 = vmul.f32 %v2642_v43, %v4763_v27 }
 0xab6   :  { %v2646_v59 = vmul.f32 0.5, %v2645_v62 }
 0xab7   :  { %v2686_v24 = vmul.f32 %v4800_v51, %v2677_v58 }
 0xab8   :  { %v2647_v26 = vsub.f32 1.5, %v2646_v59 }
 0xab9   :  { %v3793_v45 = vpop.eup %3792  ;;  %v4842_v23 = vadd.f32 %v4804_v5, %v2686_v24 }
 0xaba   :  { %v2648_v60 = vmul.f32 %v3791_v21, %v2647_v26  ;;  %v2654_v13 = vmul.f32 %v3793_v45, %v2591_v9  ;;  %vm2660_vm9 = vweird.f32 %v3793_v45 }
 0xabb   :  { %3548 = vmatmul.msk.f32.gmra.mxu2 %vm53_vm0, %v4842_v23  ;;  %vm2661_vm11 = vmor %vm2659_vm10, %vm2660_vm9 }
 0xabc   :  { %v2652_v53 = vsel %vm2651_vm8, %v3791_v21, %v2648_v60  ;;  %v2655_v52 = vmul.f32 %v3793_v45, %v2654_v13 }
 0xabd   :  { %v2678_v27 = vmul.f32 %v2652_v53, %v4769_v12 }
 0xabe   :  { %v2656_v63 = vmul.f32 0.5, %v2655_v52 }
 0xabf   :  { %v2687_v28 = vmul.f32 %v4800_v51, %v2678_v27 }
 0xac0   :  { %v2657_v4 = vsub.f32 1.5, %v2656_v63 }
 0xac1   :  { %v2576_v55 = vpop.xlane.xlu1 %2575  ;;  %v4849_v54 = vadd.f32 %v4804_v5, %v2687_v28 }
 0xac2   :  { %v2658_v49 = vmul.f32 %v3793_v45, %v2657_v4  ;;  %v2584_v8 = vmul.f32 %v2576_v55, %v4734_v39 }
 0xac3   :  { %3549 = vmatmul.msk.f32.gmra.mxu2 %vm53_vm0, %v4849_v54 }
 0xac4   :  { %v2662_v35 = vsel %vm2661_vm11, %v3793_v45, %v2658_v49  ;;  %v2592_v42 = vadd.f32 1e-12, %v2584_v8 }
 0xac5   :  { %v2679_v12 = vmul.f32 %v2662_v35, %v4778_v17  ;;  %v2849_v17 = vld [vmem:[%s5130_s7 + $0x28] sm:$0xff] }
 0xac6   :  { %3794 = vrsqrt.f32 %v2592_v42  ;;  %2888 = vmatpush.msra.mxu3 %v2849_v17  ;;  %vm2669_vm13 = vweird.f32 %v2592_v42 }
 0xac7   :  { %v2688_v29 = vmul.f32 %v4800_v51, %v2679_v12 }
 0xac8   :  { %2889 = vmatpush.msra.mxu3 %v2848_v47 }
 0xac9   :  { %v4860_v38 = vadd.f32 %v4804_v5, %v2688_v29 }
 0xaca   :  { %2890 = vmatpush.msra.mxu3 %v2847_v10 }
 0xacb   :  { %3550 = vmatmul.msk.f32.gmra.mxu2 %vm53_vm0, %v4860_v38 }
 0xacc   :  { %v3795_v57 = vpop.eup %3794  ;;  %2891 = vmatpush.msra.mxu3 %v2846_v37 }
 0xacd   :  { %v2664_v41 = vmul.f32 %v3795_v57, %v2592_v42  ;;  %vm2670_vm12 = vweird.f32 %v3795_v57 }
 0xace   :  { %2892 = vmatpush.msra.mxu3 %v2845_v0  ;;  %vm2671_vm14 = vmor %vm2669_vm13, %vm2670_vm12 }
 0xacf   :  { %v2665_v34 = vmul.f32 %v3795_v57, %v2664_v41 }
 0xad0   :  { %2893 = vmatpush.msra.mxu3 %v2844_v14 }
 0xad1   :  { %v2666_v1 = vmul.f32 0.5, %v2665_v34 }
 0xad3   :  { %v2667_v19 = vsub.f32 1.5, %v2666_v1 }
 0xad5   :  { %v2668_v15 = vmul.f32 %v3795_v57, %v2667_v19 }
 0xad7   :  { %v2672_v16 = vsel %vm2671_vm14, %v3795_v57, %v2668_v15 }
 0xad8   :  { %v2680_v56 = vmul.f32 %v2672_v16, %v4794_v7 }
 0xada   :  { %v2689_v50 = vmul.f32 %v4800_v51, %v2680_v56 }
 0xadc   :  { %v4893_v61 = vadd.f32 %v4804_v5, %v2689_v50 }
 0xade   :  { %v2748_v18 = vpop.f32.mrf.mxu2  ;;  %3551 = vmatmul.msk.f32.gmra.mxu2 %vm53_vm0, %v4893_v61 }
 0xadf   :  { %v2749_v46 = vadd.f32 %v4890_v2, %v2748_v18 }
 0xae1   :  { %v2780_v31 = vmul.f32 0.044715, %v2749_v46  ;;  %v2772_v48 = vmul.f32 0.5, %v2749_v46 }
 0xae3   :  { %v2788_v44 = vmul.f32 %v2780_v31, %v2749_v46 }
 0xae5   :  { %v2796_v3 = vmul.f32 %v2788_v44, %v2749_v46 }
 0xae7   :  { %v2804_v7 = vadd.f32 %v2796_v3, %v2749_v46 }
 0xae9   :  { %v2812_v20 = vmul.f32 0.7978846, %v2804_v7 }
 0xaeb   :  { %3796 = vtanh.f32 %v2812_v20 }
 0xaf1   :  { %v3797_v51 = vpop.eup %3796 }
 0xaf2   :  { %v2828_v21 = vadd.f32 1.0, %v3797_v51 }
 0xaf4   :  { %v2836_v9 = vmul.f32 %v2828_v21, %v2772_v48 }
 0xaf6   :  { %3552 = vmatmul.msk.f32.vlgmr.msra.gmra.mxu3 %vm2853_vm15, %v2836_v9 }
 0xb24   :  { %v2751_v5 = vpop.f32.mrf.mxu2 }
 0xb25   :  { %v2752_v36 = vadd.f32 %v4890_v2, %v2751_v5 }
 0xb27   :  { %v2781_v11 = vmul.f32 0.044715, %v2752_v36  ;;  %v2773_v28 = vmul.f32 0.5, %v2752_v36 }
 0xb29   :  { %v2789_v43 = vmul.f32 %v2781_v11, %v2752_v36 }
 0xb2b   :  { %v2797_v62 = vmul.f32 %v2789_v43, %v2752_v36 }
 0xb2d   :  { %v2754_v58 = vpop.f32.mrf.mxu2  ;;  %v2805_v59 = vadd.f32 %v2797_v62, %v2752_v36 }
 0xb2e   :  { %v2755_v24 = vadd.f32 %v4890_v2, %v2754_v58 }
 0xb2f   :  { %v2813_v26 = vmul.f32 0.7978846, %v2805_v59 }
 0xb30   :  { %v2782_v45 = vmul.f32 0.044715, %v2755_v24  ;;  %v2774_v47 = vmul.f32 0.5, %v2755_v24 }
 0xb31   :  { %3798 = vtanh.f32 %v2813_v26 }
 0xb32   :  { %v2790_v60 = vmul.f32 %v2782_v45, %v2755_v24 }
 0xb34   :  { %v2798_v13 = vmul.f32 %v2790_v60, %v2755_v24 }
 0xb36   :  { %v2757_v53 = vpop.f32.mrf.mxu2  ;;  %v2806_v52 = vadd.f32 %v2798_v13, %v2755_v24 }
 0xb37   :  { %v3799_v27 = vpop.eup %3798  ;;  %v2758_v63 = vadd.f32 %v4890_v2, %v2757_v53 }
 0xb38   :  { %v2829_v4 = vadd.f32 1.0, %v3799_v27  ;;  %v2814_v55 = vmul.f32 0.7978846, %v2806_v52 }
 0xb39   :  { %v2783_v49 = vmul.f32 0.044715, %v2758_v63  ;;  %v2775_v56 = vmul.f32 0.5, %v2758_v63 }
 0xb3a   :  { %v2837_v8 = vmul.f32 %v2829_v4, %v2773_v28  ;;  %3800 = vtanh.f32 %v2814_v55 }
 0xb3b   :  { %v2791_v35 = vmul.f32 %v2783_v49, %v2758_v63 }
 0xb3c   :  { %3553 = vmatmul.msk.f32.gmra.mxu3 %vm2853_vm15, %v2837_v8 }
 0xb3d   :  { %v2799_v42 = vmul.f32 %v2791_v35, %v2758_v63 }
 0xb3e   :  { %v2760_v12 = vpop.f32.mrf.mxu2 }
 0xb3f   :  { %v2761_v29 = vadd.f32 %v4890_v2, %v2760_v12  ;;  %v2807_v40 = vadd.f32 %v2799_v42, %v2758_v63  ;;  %v2852_v12 = vperm.slane %v4716_v25, 3 }
 0xb40   :  { %v3801_v30 = vpop.eup %3800 }
 0xb41   :  { %v2784_v17 = vmul.f32 0.044715, %v2761_v29  ;;  %v2830_v57 = vadd.f32 1.0, %v3801_v30  ;;  %v2815_v41 = vmul.f32 0.7978846, %v2807_v40  ;;  %v2776_v21 = vmul.f32 0.5, %v2761_v29 }
 0xb43   :  { %v2838_v10 = vmul.f32 %v2830_v57, %v2774_v47  ;;  %3802 = vtanh.f32 %v2815_v41  ;;  %v2792_v34 = vmul.f32 %v2784_v17, %v2761_v29 }
 0xb45   :  { %3554 = vmatmul.msk.f32.gmra.mxu3 %vm2853_vm15, %v2838_v10  ;;  %v2800_v37 = vmul.f32 %v2792_v34, %v2761_v29 }
 0xb46   :  { %v2763_v1 = vpop.f32.mrf.mxu2 }
 0xb47   :  { %v2764_v0 = vadd.f32 %v4890_v2, %v2763_v1  ;;  %v2808_v19 = vadd.f32 %v2800_v37, %v2761_v29 }
 0xb49   :  { %v3803_v14 = vpop.eup %3802  ;;  %v2785_v15 = vmul.f32 0.044715, %v2764_v0  ;;  %v2816_v16 = vmul.f32 0.7978846, %v2808_v19  ;;  %v2777_v59 = vmul.f32 0.5, %v2764_v0 }
 0xb4a   :  { %v2831_v50 = vadd.f32 1.0, %v3803_v14 }
 0xb4b   :  { %3804 = vtanh.f32 %v2816_v16  ;;  %v2793_v18 = vmul.f32 %v2785_v15, %v2764_v0 }
 0xb4c   :  { %v2839_v46 = vmul.f32 %v2831_v50, %v2775_v56 }
 0xb4d   :  { %v2801_v31 = vmul.f32 %v2793_v18, %v2764_v0 }
 0xb4e   :  { %v2766_v44 = vpop.f32.mrf.mxu2  ;;  %3555 = vmatmul.msk.f32.gmra.mxu3 %vm2853_vm15, %v2839_v46 }
 0xb4f   :  { %v2767_v3 = vadd.f32 %v4890_v2, %v2766_v44  ;;  %v2809_v7 = vadd.f32 %v2801_v31, %v2764_v0 }
 0xb51   :  { %v3805_v20 = vpop.eup %3804  ;;  %v2786_v51 = vmul.f32 0.044715, %v2767_v3  ;;  %v2817_v48 = vmul.f32 0.7978846, %v2809_v7  ;;  %v2778_v53 = vmul.f32 0.5, %v2767_v3 }
 0xb52   :  { %v2832_v9 = vadd.f32 1.0, %v3805_v20 }
 0xb53   :  { %v2794_v5 = vmul.f32 %v2786_v51, %v2767_v3  ;;  %3806 = vtanh.f32 %v2817_v48 }
 0xb54   :  { %v2840_v36 = vmul.f32 %v2832_v9, %v2776_v21 }
 0xb55   :  { %v2802_v11 = vmul.f32 %v2794_v5, %v2767_v3 }
 0xb56   :  { %3556 = vmatmul.msk.f32.gmra.mxu3 %vm2853_vm15, %v2840_v36 }
 0xb57   :  { %v2810_v43 = vadd.f32 %v2802_v11, %v2767_v3 }
 0xb59   :  { %v3807_v62 = vpop.eup %3806  ;;  %v2818_v58 = vmul.f32 0.7978846, %v2810_v43 }
 0xb5a   :  { %v2833_v24 = vadd.f32 1.0, %v3807_v62 }
 0xb5b   :  { %3808 = vtanh.f32 %v2818_v58 }
 0xb5c   :  { %v2841_v26 = vmul.f32 %v2833_v24, %v2777_v59 }
 0xb5e   :  { %3557 = vmatmul.msk.f32.gmra.mxu3 %vm2853_vm15, %v2841_v26 }
 0xb61   :  { %v3809_v45 = vpop.eup %3808  ;;  %v2769_v60 = vpop.f32.mrf.mxu2 }
 0xb62   :  { %v2770_v13 = vadd.f32 %v4890_v2, %v2769_v60  ;;  %v2834_v52 = vadd.f32 1.0, %v3809_v45 }
 0xb64   :  { %v2787_v27 = vmul.f32 0.044715, %v2770_v13  ;;  %v2842_v63 = vmul.f32 %v2834_v52, %v2778_v53  ;;  %v2779_v35 = vmul.f32 0.5, %v2770_v13 }
 0xb66   :  { %v2795_v28 = vmul.f32 %v2787_v27, %v2770_v13  ;;  %3558 = vmatmul.msk.f32.gmra.mxu3 %vm2853_vm15, %v2842_v63 }
 0xb68   :  { %v2803_v4 = vmul.f32 %v2795_v28, %v2770_v13 }
 0xb6a   :  { %v2811_v55 = vadd.f32 %v2803_v4, %v2770_v13 }
 0xb6c   :  { %v2819_v49 = vmul.f32 0.7978846, %v2811_v55 }
 0xb6e   :  { %3810 = vtanh.f32 %v2819_v49 }
 0xb74   :  { %v3811_v8 = vpop.eup %3810 }
 0xb75   :  { %v2835_v42 = vadd.f32 1.0, %v3811_v8 }
 0xb77   :  { %v2843_v29 = vmul.f32 %v2835_v42, %v2779_v35 }
 0xb79   :  { %v2895_v40 = vpop.f32.mrf.mxu3  ;;  %3559 = vmatmul.msk.f32.gmra.mxu3 %vm2853_vm15, %v2843_v29 }
 0xb7a   :  { %v2896_v2 = vadd.f32 %v2895_v40, %v2852_v12 }
 0xb7c   :  { %v2919_v30 = vadd.f32 %v2896_v2, %v4808_v33 }
 0xb7e   :  { %v2927_v17 = vsel %vm53_vm0, %v2919_v30, 0.0 }
 0xb7f   :  { %2928 = vadd.xlane.f32.xlu0 %v2927_v17 }
 0xbbf   :  { %v2898_v47 = vpop.f32.mrf.mxu3 }
 0xbc0   :  { %v2899_v57 = vadd.f32 %v2898_v47, %v2852_v12 }
 0xbc2   :  { %v2920_v41 = vadd.f32 %v2899_v57, %v4819_v6 }
 0xbc4   :  { %v2930_v10 = vsel %vm53_vm0, %v2920_v41, 0.0 }
 0xbc5   :  { %2931 = vadd.xlane.f32.xlu2 %v2930_v10 }
 0xbc8   :  { %v2901_v34 = vpop.f32.mrf.mxu3 }
 0xbc9   :  { %v2902_v37 = vadd.f32 %v2901_v34, %v2852_v12 }
 0xbcb   :  { %v2921_v1 = vadd.f32 %v2902_v37, %v4827_v32 }
 0xbcd   :  { %v2933_v0 = vsel %vm53_vm0, %v2921_v1, 0.0 }
 0xbce   :  { %2934 = vadd.xlane.f32.xlu1 %v2933_v0 }
 0xbd1   :  { %v2904_v19 = vpop.f32.mrf.mxu3 }
 0xbd2   :  { %v2905_v14 = vadd.f32 %v2904_v19, %v2852_v12 }
 0xbd4   :  { %v2922_v33 = vadd.f32 %v2905_v14, %v4835_v22 }
 0xbd6   :  { %v2936_v15 = vsel %vm53_vm0, %v2922_v33, 0.0 }
 0xbd7   :  { %2937 = vadd.xlane.f32.xlu0 %v2936_v15 }
 0xbd9   :  { %v2907_v16 = vpop.f32.mrf.mxu3 }
 0xbda   :  { %v2908_v56 = vadd.f32 %v2907_v16, %v2852_v12 }
 0xbdc   :  { %v2923_v6 = vadd.f32 %v2908_v56, %v4842_v23 }
 0xbde   :  { %v2939_v50 = vsel %vm53_vm0, %v2923_v6, 0.0 }
 0xbdf   :  { %2940 = vadd.xlane.f32.xlu2 %v2939_v50  ;;  %v4980_v50 = vperm.slane %v4716_v25, 4 }
 0xbe1   :  { %v2910_v18 = vpop.f32.mrf.mxu3 }
 0xbe2   :  { %v2911_v46 = vadd.f32 %v2910_v18, %v2852_v12 }
 0xbe4   :  { %v2924_v32 = vadd.f32 %v2911_v46, %v4849_v54 }
 0xbe6   :  { %v2942_v31 = vsel %vm53_vm0, %v2924_v32, 0.0 }
 0xbe7   :  { %2943 = vadd.xlane.f32.xlu1 %v2942_v31 }
 0xbe9   :  { %v2913_v44 = vpop.f32.mrf.mxu3 }
 0xbea   :  { %v2914_v3 = vadd.f32 %v2913_v44, %v2852_v12  ;;  %v4988_v44 = vperm.slane %v4716_v25, 6 }
 0xbec   :  { %v2925_v22 = vadd.f32 %v2914_v3, %v4860_v38 }
 0xbee   :  { %v2945_v7 = vsel %vm53_vm0, %v2925_v22, 0.0 }
 0xbef   :  { %2946 = vadd.xlane.f32.xlu0 %v2945_v7 }
 0xbf2   :  { %v2929_v20 = vpop.xlane.xlu0 %2928 }
 0xbf3   :  { %v2951_v23 = vmul.f32 %v2929_v20, %v4734_v39 }
 0xbf5   :  { %v4929_v51 = vsub.f32 %v2919_v30, %v2951_v23 }
 0xbf7   :  { %v2967_v48 = vmul.f32 %v4929_v51, %v4929_v51 }
 0xbf9   :  { %v2975_v54 = vsel %vm53_vm0, %v2967_v48, 0.0 }
 0xbfa   :  { %2976 = vadd.xlane.f32.xlu1 %v2975_v54 }
 0xbfc   :  { %v2916_v21 = vpop.f32.mrf.mxu3 }
 0xbfd   :  { %v2917_v9 = vadd.f32 %v2916_v21, %v2852_v12 }
 0xbff   :  { %v2926_v5 = vadd.f32 %v2917_v9, %v4893_v61 }
 0xc01   :  { %v2948_v38 = vsel %vm53_vm0, %v2926_v5, 0.0 }
 0xc02   :  { %2949 = vadd.xlane.f32.xlu2 %v2948_v38 }
 0xc38   :  { %v2932_v36 = vpop.xlane.xlu2 %2931 }
 0xc39   :  { %v2952_v11 = vmul.f32 %v2932_v36, %v4734_v39 }
 0xc3b   :  { %v4937_v43 = vsub.f32 %v2920_v41, %v2952_v11 }
 0xc3d   :  { %v2968_v62 = vmul.f32 %v4937_v43, %v4937_v43 }
 0xc3f   :  { %v2978_v58 = vsel %vm53_vm0, %v2968_v62, 0.0 }
 0xc40   :  { %2979 = vadd.xlane.f32.xlu0 %v2978_v58 }
 0xc41   :  { %v2935_v59 = vpop.xlane.xlu1 %2934 }
 0xc42   :  { %v2953_v24 = vmul.f32 %v2935_v59, %v4734_v39 }
 0xc44   :  { %v4943_v26 = vsub.f32 %v2921_v1, %v2953_v24 }
 0xc46   :  { %v2969_v61 = vmul.f32 %v4943_v26, %v4943_v26 }
 0xc48   :  { %v2981_v45 = vsel %vm53_vm0, %v2969_v61, 0.0 }
 0xc49   :  { %2982 = vadd.xlane.f32.xlu2 %v2981_v45 }
 0xc4a   :  { %v2938_v60 = vpop.xlane.xlu0 %2937 }
 0xc4b   :  { %v2954_v13 = vmul.f32 %v2938_v60, %v4734_v39 }
 0xc4d   :  { %v4949_v53 = vsub.f32 %v2922_v33, %v2954_v13 }
 0xc4f   :  { %v2970_v52 = vmul.f32 %v4949_v53, %v4949_v53 }
 0xc51   :  { %v2984_v27 = vsel %vm53_vm0, %v2970_v52, 0.0 }
 0xc52   :  { %v2941_v63 = vpop.xlane.xlu2 %2940  ;;  %2985 = vadd.xlane.f32.xlu1 %v2984_v27 }
 0xc53   :  { %v2955_v28 = vmul.f32 %v2941_v63, %v4734_v39 }
 0xc55   :  { %v4955_v4 = vsub.f32 %v2923_v6, %v2955_v28 }
 0xc57   :  { %v2971_v55 = vmul.f32 %v4955_v4, %v4955_v4 }
 0xc59   :  { %v2987_v49 = vsel %vm53_vm0, %v2971_v55, 0.0 }
 0xc5a   :  { %v2944_v8 = vpop.xlane.xlu1 %2943  ;;  %2988 = vadd.xlane.f32.xlu0 %v2987_v49 }
 0xc5b   :  { %v2956_v35 = vmul.f32 %v2944_v8, %v4734_v39 }
 0xc5d   :  { %v4961_v42 = vsub.f32 %v2924_v32, %v2956_v35  ;;  %v4984_v32 = vperm.slane %v4716_v25, 5 }
 0xc5f   :  { %v2972_v12 = vmul.f32 %v4961_v42, %v4961_v42 }
 0xc61   :  { %v2990_v29 = vsel %vm53_vm0, %v2972_v12, 0.0 }
 0xc62   :  { %2991 = vadd.xlane.f32.xlu2 %v2990_v29  ;;  %v2947_v40 = vpop.xlane.xlu0 %2946 }
 0xc63   :  { %v2957_v2 = vmul.f32 %v2947_v40, %v4734_v39 }
 0xc65   :  { %v4967_v30 = vsub.f32 %v2925_v22, %v2957_v2 }
 0xc67   :  { %v2973_v17 = vmul.f32 %v4967_v30, %v4967_v30 }
 0xc69   :  { %v2993_v47 = vsel %vm53_vm0, %v2973_v17, 0.0 }
 0xc6a   :  { %2994 = vadd.xlane.f32.xlu1 %v2993_v47 }
 0xc6d   :  { %v2977_v57 = vpop.xlane.xlu1 %2976 }
 0xc6e   :  { %v2999_v41 = vmul.f32 %v2977_v57, %v4734_v39 }
 0xc70   :  { %v3007_v10 = vadd.f32 1e-12, %v2999_v41 }
 0xc72   :  { %3812 = vrsqrt.f32 %v3007_v10  ;;  %vm3021_vm3 = vweird.f32 %v3007_v10 }
 0xc75   :  { %v2950_v34 = vpop.xlane.xlu2 %2949 }
 0xc76   :  { %v2958_v37 = vmul.f32 %v2950_v34, %v4734_v39 }
 0xc78   :  { %v3813_v1 = vpop.eup %3812  ;;  %v4974_v0 = vsub.f32 %v2926_v5, %v2958_v37 }
 0xc79   :  { %v3016_v19 = vmul.f32 %v3813_v1, %v3007_v10  ;;  %vm3022_vm2 = vweird.f32 %v3813_v1 }
 0xc7a   :  { %v2974_v14 = vmul.f32 %v4974_v0, %v4974_v0  ;;  %vm3023_vm4 = vmor %vm3021_vm3, %vm3022_vm2 }
 0xc7b   :  { %v3017_v33 = vmul.f32 %v3813_v1, %v3016_v19 }
 0xc7c   :  { %v2996_v15 = vsel %vm53_vm0, %v2974_v14, 0.0 }
 0xc7d   :  { %v3018_v16 = vmul.f32 0.5, %v3017_v33  ;;  %2997 = vadd.xlane.f32.xlu0 %v2996_v15 }
 0xc7f   :  { %v3019_v56 = vsub.f32 1.5, %v3018_v16 }
 0xc81   :  { %v3020_v6 = vmul.f32 %v3813_v1, %v3019_v56 }
 0xc83   :  { %v3024_v18 = vsel %vm3023_vm4, %v3813_v1, %v3020_v6 }
 0xc84   :  { %v3095_v46 = vmul.f32 %v3024_v18, %v4929_v51 }
 0xc86   :  { %v3104_v31 = vmul.f32 %v4980_v50, %v3095_v46 }
 0xc88   :  { %v3113_v3 = vadd.f32 %v4984_v32, %v3104_v31 }
 0xc8a   :  { %3121 = vst.msk [vmem:[%s5132_s9] sm:$0xff] %vm53_vm0, %v3113_v3  ;;  %3241 = vmatpush.msrb.mxu0 %v3113_v3  ;;  %v3130_v22 = vmul.f32 %v4988_v44, %v3113_v3 }
 0xc8c   :  { %v3138_v7 = vsel %vm53_vm0, %v3130_v22, 0.0 }
 0xc8d   :  { %3139 = vadd.xlane.f32.xlu2 %v3138_v7 }
 0xcb3   :  { %v2980_v20 = vpop.xlane.xlu0 %2979 }
 0xcb4   :  { %v3000_v23 = vmul.f32 %v2980_v20, %v4734_v39 }
 0xcb6   :  { %v3008_v51 = vadd.f32 1e-12, %v3000_v23 }
 0xcb8   :  { %3814 = vrsqrt.f32 %v3008_v51  ;;  %vm3031_vm6 = vweird.f32 %v3008_v51 }
 0xcbc   :  { %v2983_v25 = vpop.xlane.xlu2 %2982 }
 0xcbd   :  { %v3001_v48 = vmul.f32 %v2983_v25, %v4734_v39 }
 0xcbe   :  { %v3815_v54 = vpop.eup %3814 }
 0xcbf   :  { %v3026_v21 = vmul.f32 %v3815_v54, %v3008_v51  ;;  %v3009_v9 = vadd.f32 1e-12, %v3001_v48  ;;  %vm3032_vm5 = vweird.f32 %v3815_v54 }
 0xcc0   :  { %vm3033_vm7 = vmor %vm3031_vm6, %vm3032_vm5 }
 0xcc1   :  { %v3027_v5 = vmul.f32 %v3815_v54, %v3026_v21  ;;  %3816 = vrsqrt.f32 %v3009_v9  ;;  %vm3041_vm9 = vweird.f32 %v3009_v9 }
 0xcc3   :  { %v3028_v38 = vmul.f32 0.5, %v3027_v5 }
 0xcc5   :  { %v3029_v36 = vsub.f32 1.5, %v3028_v38  ;;  %v2986_v11 = vpop.xlane.xlu1 %2985 }
 0xcc6   :  { %v3002_v62 = vmul.f32 %v2986_v11, %v4734_v39 }
 0xcc7   :  { %v3817_v58 = vpop.eup %3816  ;;  %v3030_v59 = vmul.f32 %v3815_v54, %v3029_v36 }
 0xcc8   :  { %v3036_v24 = vmul.f32 %v3817_v58, %v3009_v9  ;;  %v3010_v61 = vadd.f32 1e-12, %v3002_v62  ;;  %vm3042_vm8 = vweird.f32 %v3817_v58 }
 0xcc9   :  { %v3034_v45 = vsel %vm3033_vm7, %v3815_v54, %v3030_v59  ;;  %vm3043_vm10 = vmor %vm3041_vm9, %vm3042_vm8 }
 0xcca   :  { %v3096_v60 = vmul.f32 %v3034_v45, %v4937_v43  ;;  %v3037_v13 = vmul.f32 %v3817_v58, %v3036_v24  ;;  %3818 = vrsqrt.f32 %v3010_v61  ;;  %vm3051_vm12 = vweird.f32 %v3010_v61 }
 0xccc   :  { %v3038_v52 = vmul.f32 0.5, %v3037_v13  ;;  %v3105_v27 = vmul.f32 %v4980_v50, %v3096_v60 }
 0xccd   :  { %v2989_v63 = vpop.xlane.xlu0 %2988 }
 0xcce   :  { %v3039_v28 = vsub.f32 1.5, %v3038_v52  ;;  %v3003_v55 = vmul.f32 %v2989_v63, %v4734_v39  ;;  %v3114_v49 = vadd.f32 %v4984_v32, %v3105_v27 }
 0xcd0   :  { %v3819_v8 = vpop.eup %3818  ;;  %v3040_v35 = vmul.f32 %v3817_v58, %v3039_v28  ;;  %v3011_v12 = vadd.f32 1e-12, %v3003_v55  ;;  %3122 = vst.msk [vmem:[%s5132_s9 + $0x8] sm:$0xff] %vm53_vm0, %v3114_v49  ;;  %3263 = vmatpush.msra.mxu0 %v3114_v49  ;;  %v3131_v43 = vmul.f32 %v4988_v44, %v3114_v49 }
 0xcd1   :  { %v3046_v29 = vmul.f32 %v3819_v8, %v3010_v61  ;;  %vm3052_vm11 = vweird.f32 %v3819_v8 }
 0xcd2   :  { %v3044_v40 = vsel %vm3043_vm10, %v3817_v58, %v3040_v35  ;;  %3820 = vrsqrt.f32 %v3011_v12  ;;  %v3141_v2 = vsel %vm53_vm0, %v3131_v43, 0.0  ;;  %vm3053_vm13 = vmor %vm3051_vm12, %vm3052_vm11  ;;  %vm3061_vm15 = vweird.f32 %v3011_v12 }
 0xcd3   :  { %v3097_v17 = vmul.f32 %v3044_v40, %v4943_v26  ;;  %v3047_v47 = vmul.f32 %v3819_v8, %v3046_v29  ;;  %3142 = vadd.xlane.f32.xlu1 %v3141_v2  ;;  %vm3189_vm12 = vcmask 1041409  }
 0xcd5   :  { %v3048_v57 = vmul.f32 0.5, %v3047_v47  ;;  %v2992_v41 = vpop.xlane.xlu2 %2991  ;;  %v3106_v10 = vmul.f32 %v4980_v50, %v3097_v17 }
 0xcd6   :  { %v3004_v34 = vmul.f32 %v2992_v41, %v4734_v39 }
 0xcd7   :  { %v3049_v37 = vsub.f32 1.5, %v3048_v57  ;;  %v5014_v1 = vadd.f32 %v4984_v32, %v3106_v10 }
 0xcd8   :  { %v3821_v19 = vpop.eup %3820  ;;  %v3012_v14 = vadd.f32 1e-12, %v3004_v34 }
 0xcd9   :  { %v3050_v33 = vmul.f32 %v3819_v8, %v3049_v37  ;;  %v3056_v15 = vmul.f32 %v3821_v19, %v3011_v12  ;;  %3123 = vst.msk [vmem:[%s5132_s9 + $0x10] sm:$0xff] %vm53_vm0, %v5014_v1  ;;  %v3132_v26 = vmul.f32 %v4988_v44, %v5014_v1  ;;  %vm3062_vm14 = vweird.f32 %v3821_v19 }
 0xcda   :  { %3822 = vrsqrt.f32 %v3012_v14  ;;  %vm3063_vm2 = vmor %vm3061_vm15, %vm3062_vm14  ;;  %vm3071_vm4 = vweird.f32 %v3012_v14  ;;  %vm3195_vm14 = vcmask 1044484   ;;  %vm3197_vm15 = vcmask 1045509  }
 0xcdb   :  { %v3054_v16 = vsel %vm3053_vm13, %v3819_v8, %v3050_v33  ;;  %v3057_v56 = vmul.f32 %v3821_v19, %v3056_v15  ;;  %v3144_v6 = vsel %vm53_vm0, %v3132_v26, 0.0  ;;  %vm3193_vm13 = vcmask 1043459  }
 0xcdc   :  { %v3098_v18 = vmul.f32 %v3054_v16, %v4949_v53  ;;  %3145 = vadd.xlane.f32.xlu0 %v3144_v6 }
 0xcdd   :  { %v3058_v46 = vmul.f32 0.5, %v3057_v56  ;;  %v2995_v31 = vpop.xlane.xlu1 %2994 }
 0xcde   :  { %v3005_v3 = vmul.f32 %v2995_v31, %v4734_v39  ;;  %v3107_v22 = vmul.f32 %v4980_v50, %v3098_v18 }
 0xcdf   :  { %v3059_v7 = vsub.f32 1.5, %v3058_v46 }
 0xce0   :  { %v3823_v20 = vpop.eup %3822  ;;  %v3013_v23 = vadd.f32 1e-12, %v3005_v3  ;;  %v5028_v51 = vadd.f32 %v4984_v32, %v3107_v22 }
 0xce1   :  { %v3060_v25 = vmul.f32 %v3821_v19, %v3059_v7  ;;  %v3066_v48 = vmul.f32 %v3823_v20, %v3012_v14  ;;  %vm3072_vm3 = vweird.f32 %v3823_v20 }
 0xce2   :  { %3824 = vrsqrt.f32 %v3013_v23  ;;  %v3133_v53 = vmul.f32 %v4988_v44, %v5028_v51  ;;  %3124 = vst.msk [vmem:[%s5132_s9 + $0x18] sm:$0xff] %vm53_vm0, %v5028_v51  ;;  %vm3073_vm5 = vmor %vm3071_vm4, %vm3072_vm3  ;;  %vm3081_vm7 = vweird.f32 %v3013_v23  ;;  %vm3201_vm3 = vcmask 1047559  }
 0xce3   :  { %v3064_v54 = vsel %vm3063_vm2, %v3821_v19, %v3060_v25  ;;  %v3067_v21 = vmul.f32 %v3823_v20, %v3066_v48  ;;  %vm3199_vm2 = vcmask 1046534  }
 0xce4   :  { %v3099_v9 = vmul.f32 %v3064_v54, %v4955_v4  ;;  %v3147_v5 = vsel %vm53_vm0, %v3133_v53, 0.0 }
 0xce5   :  { %v3068_v38 = vmul.f32 0.5, %v3067_v21  ;;  %3148 = vadd.xlane.f32.xlu2 %v3147_v5 }
 0xce6   :  { %v3108_v36 = vmul.f32 %v4980_v50, %v3099_v9 }
 0xce7   :  { %v3069_v11 = vsub.f32 1.5, %v3068_v38 }
 0xce8   :  { %v3825_v62 = vpop.eup %3824  ;;  %v5041_v58 = vadd.f32 %v4984_v32, %v3108_v36 }
 0xce9   :  { %v3070_v59 = vmul.f32 %v3823_v20, %v3069_v11  ;;  %v3076_v24 = vmul.f32 %v3825_v62, %v3013_v23  ;;  %vm3082_vm6 = vweird.f32 %v3825_v62 }
 0xcea   :  { %v3134_v61 = vmul.f32 %v4988_v44, %v5041_v58  ;;  %3125 = vst.msk [vmem:[%s5132_s9 + $0x20] sm:$0xff] %vm53_vm0, %v5041_v58  ;;  %vm3083_vm8 = vmor %vm3081_vm7, %vm3082_vm6 }
 0xceb   :  { %v3074_v4 = vsel %vm3073_vm5, %v3823_v20, %v3070_v59  ;;  %v3077_v45 = vmul.f32 %v3825_v62, %v3076_v24  ;;  %vm3400_vm5 = vcmask 253952  }
 0xcec   :  { %v3100_v60 = vmul.f32 %v3074_v4, %v4961_v42  ;;  %v3150_v13 = vsel %vm53_vm0, %v3134_v61, 0.0 }
 0xced   :  { %v3078_v52 = vmul.f32 0.5, %v3077_v45  ;;  %3151 = vadd.xlane.f32.xlu1 %v3150_v13 }
 0xcee   :  { %v3109_v27 = vmul.f32 %v4980_v50, %v3100_v60  ;;  %v3832_v60 = vld [vmem:[%s5124_s1] sm:$0xff]  ;;  %s3872_s1 = smov [#allocation2]  }
 0xcef   :  { %v3079_v63 = vsub.f32 1.5, %v3078_v52  ;;  %vm3170_vm4 = vcmp.gt.f32.partialorder %v3832_v60, 0.5  ;;  %s3415_s30 = sshll.u32 %s3872_s1, 4  ;;  %s3416_s30 = int_to_ptr.vmem [resolvable:$true] %s3415_s30 }
 0xcf0   :  { %v2998_v28 = vpop.xlane.xlu0 %2997  ;;  %v5054_v55 = vadd.f32 %v4984_v32, %v3109_v27 }
 0xcf1   :  { %v3080_v49 = vmul.f32 %v3825_v62, %v3079_v63  ;;  %v3006_v8 = vmul.f32 %v2998_v28, %v4734_v39 }
 0xcf2   :  { %3126 = vst.msk [vmem:[%s5132_s9 + $0x28] sm:$0xff] %vm53_vm0, %v5054_v55  ;;  %v3135_v42 = vmul.f32 %v4988_v44, %v5054_v55 }
 0xcf3   :  { %v3084_v35 = vsel %vm3083_vm8, %v3825_v62, %v3080_v49  ;;  %v3014_v12 = vadd.f32 1e-12, %v3006_v8 }
 0xcf4   :  { %v3101_v43 = vmul.f32 %v3084_v35, %v4967_v30  ;;  %v3153_v29 = vsel %vm53_vm0, %v3135_v42, 0.0 }
 0xcf5   :  { %3826 = vrsqrt.f32 %v3014_v12  ;;  %3154 = vadd.xlane.f32.xlu0 %v3153_v29  ;;  %vm3091_vm10 = vweird.f32 %v3014_v12 }
 0xcf6   :  { %v3110_v39 = vmul.f32 %v4980_v50, %v3101_v43 }
 0xcf8   :  { %v5068_v40 = vadd.f32 %v4984_v32, %v3110_v39 }
 0xcfa   :  { %v3136_v2 = vmul.f32 %v4988_v44, %v5068_v40  ;;  %3127 = vst.msk [vmem:[%s5132_s9 + $0x30] sm:$0xff] %vm53_vm0, %v5068_v40 }
 0xcfb   :  { %v3827_v17 = vpop.eup %3826 }
 0xcfc   :  { %v3086_v30 = vmul.f32 %v3827_v17, %v3014_v12  ;;  %v3156_v47 = vsel %vm53_vm0, %v3136_v2, 0.0  ;;  %vm3092_vm9 = vweird.f32 %v3827_v17 }
 0xcfd   :  { %3157 = vadd.xlane.f32.xlu2 %v3156_v47  ;;  %vm3093_vm11 = vmor %vm3091_vm10, %vm3092_vm9 }
 0xcfe   :  { %v3087_v57 = vmul.f32 %v3827_v17, %v3086_v30 }
 0xd00   :  { %v3088_v41 = vmul.f32 0.5, %v3087_v57  ;;  %v3140_v16 = vpop.xlane.xlu2 %3139 }
 0xd02   :  { %v3089_v10 = vsub.f32 1.5, %v3088_v41 }
 0xd04   :  { %v3090_v34 = vmul.f32 %v3827_v17, %v3089_v10 }
 0xd06   :  { %v3094_v37 = vsel %vm3093_vm11, %v3827_v17, %v3090_v34 }
 0xd07   :  { %v3102_v19 = vmul.f32 %v3094_v37, %v4974_v0 }
 0xd09   :  { %v3111_v14 = vmul.f32 %v4980_v50, %v3102_v19  ;;  %v3179_v50 = vlaneseq }
 0xd0b   :  { %v5081_v33 = vadd.f32 %v4984_v32, %v3111_v14  ;;  %v3180_v3 = vand.u32 127, %v3179_v50 }
 0xd0d   :  { %v3137_v15 = vmul.f32 %v4988_v44, %v5081_v33  ;;  %3128 = vst.msk [vmem:[%s5132_s9 + $0x38] sm:$0xff] %vm53_vm0, %v5081_v33  ;;  %v3162_v44 = vmul.f32 0.17677669, %v3140_v16 }
 0xd0f   :  { %v3159_v26 = vsel %vm53_vm0, %v3137_v15, 0.0  ;;  %v3181_v54 = vperm.slane %v3162_v44, %v3180_v3  ;;  %vm3191_vm0 = vcmask 1042434  }
 0xd10   :  { %3160 = vadd.xlane.f32.xlu1 %v3159_v26 }
 0xd46   :  { %v3143_v56 = vpop.xlane.xlu1 %3142 }
 0xd47   :  { %v3163_v18 = vmul.f32 0.17677669, %v3143_v56 }
 0xd49   :  { %v3182_v23 = vperm.slane %v3163_v18, %v3180_v3 }
 0xd4b   :  { %v3190_v5 = vsel %vm3189_vm12, %v3182_v23, %v3181_v54 }
 0xd4f   :  { %v3146_v0 = vpop.xlane.xlu0 %3145 }
 0xd50   :  { %v3164_v46 = vmul.f32 0.17677669, %v3146_v0 }
 0xd52   :  { %v3183_v48 = vperm.slane %v3164_v46, %v3180_v3 }
 0xd54   :  { %v3192_v36 = vsel %vm3191_vm0, %v3183_v48, %v3190_v5 }
 0xd58   :  { %v3149_v6 = vpop.xlane.xlu2 %3148 }
 0xd59   :  { %v3165_v22 = vmul.f32 0.17677669, %v3149_v6 }
 0xd5b   :  { %v3184_v21 = vperm.slane %v3165_v22, %v3180_v3 }
 0xd5d   :  { %v3194_v59 = vsel %vm3193_vm13, %v3184_v21, %v3192_v36 }
 0xd60   :  { %v3152_v32 = vpop.xlane.xlu1 %3151 }
 0xd61   :  { %v3166_v20 = vmul.f32 0.17677669, %v3152_v32 }
 0xd63   :  { %v3185_v9 = vperm.slane %v3166_v20, %v3180_v3 }
 0xd65   :  { %v3196_v61 = vsel %vm3195_vm14, %v3185_v9, %v3194_v59 }
 0xd68   :  { %v3155_v31 = vpop.xlane.xlu0 %3154 }
 0xd69   :  { %v3167_v25 = vmul.f32 0.17677669, %v3155_v31 }
 0xd6b   :  { %v3186_v38 = vperm.slane %v3167_v25, %v3180_v3 }
 0xd6d   :  { %v3198_v4 = vsel %vm3197_vm15, %v3186_v38, %v3196_v61 }
 0xd70   :  { %v3158_v7 = vpop.xlane.xlu2 %3157 }
 0xd71   :  { %v3168_v53 = vmul.f32 0.17677669, %v3158_v7 }
 0xd73   :  { %v3187_v11 = vperm.slane %v3168_v53, %v3180_v3 }
 0xd75   :  { %v3200_v13 = vsel %vm3199_vm2, %v3187_v11, %v3198_v4 }
 0xd83   :  { %v3161_v62 = vpop.xlane.xlu1 %3160 }
 0xd84   :  { %v3169_v24 = vmul.f32 0.17677669, %v3161_v62 }
 0xd86   :  { %v3188_v45 = vperm.slane %v3169_v24, %v3180_v3 }
 0xd88   :  { %v3202_v52 = vsel %vm3201_vm3, %v3188_v45, %v3200_v13 }
 0xd89   :  { %v3204_v27 = vsel %vm3170_vm4, %v3202_v52, -1e+09 }
 0xd8a   :  { %v3205_v63 = vsel %vm134_vm1, %v3204_v27, -inf }
 0xd8b   :  { %3206 = vmax.xlane.f32.xlu0 %v3205_v63 }
 0xdfe   :  { %v3207_v28 = vpop.xlane.xlu0 %3206 }
 0xdff   :  { %v3208_v49 = vsub.f32 %v3204_v27, %v3207_v28 }
 0xe01   :  { %v3209_v8 = vmul.f32 1.442695, %v3208_v49 }
 0xe03   :  { %3828 = vpow2.f32 %v3209_v8 }
 0xe09   :  { %v3829_v42 = vpop.eup %3828 }
 0xe0a   :  { %v3211_v35 = vsel %vm134_vm1, %v3829_v42, 0.0 }
 0xe0b   :  { %3212 = vadd.xlane.f32.xlu2 %v3211_v35 }
 0xe7e   :  { %v3213_v12 = vpop.xlane.xlu2 %3212 }
 0xe7f   :  { %3830 = vrcp.f32 %v3213_v12 }
 0xe85   :  { %v3831_v43 = vpop.eup %3830 }
 0xe86   :  { %v3215_v29 = vmul.f32 %v3831_v43, %v3829_v42 }
 0xe88   :  { %3560 = vmatmul.msk.f32.vlgmr.msrb.gmra.mxu0 %vm134_vm1, %v3215_v29  ;;  %v3217_v39 = vrot.slane %v3215_v29, 1  ;;  %v3218_v2 = vrot.slane %v3215_v29, 2  ;;  %v3219_v17 = vrot.slane %v3215_v29, 3  ;;  %v3220_v30 = vrot.slane %v3215_v29, 4 }
 0xe89   :  { %3285 = vmatpush.msrb.mxu0 %v5014_v1  ;;  %v3221_v1 = vrot.slane %v3215_v29, 5  ;;  %v3223_v47 = vrot.slane %v3215_v29, 7 }
 0xe90   :  { %3561 = vmatmul.msk.f32.vlgmr.msra.gmra.mxu0 %vm134_vm1, %v3217_v39 }
 0xe91   :  { %3307 = vmatpush.msra.mxu0 %v5028_v51  ;;  %v3222_v51 = vrot.slane %v3215_v29, 6 }
 0xe98   :  { %3562 = vmatmul.msk.f32.vlgmr.msrb.gmra.mxu0 %vm134_vm1, %v3218_v2 }
 0xe99   :  { %3329 = vmatpush.msrb.mxu0 %v5041_v58 }
 0xea0   :  { %3563 = vmatmul.msk.f32.vlgmr.msra.gmra.mxu0 %vm134_vm1, %v3219_v17 }
 0xea1   :  { %3351 = vmatpush.msra.mxu0 %v5054_v55 }
 0xea8   :  { %3564 = vmatmul.msk.f32.vlgmr.msrb.gmra.mxu0 %vm134_vm1, %v3220_v30 }
 0xea9   :  { %3373 = vmatpush.msrb.mxu0 %v5068_v40 }
 0xeb0   :  { %3565 = vmatmul.msk.f32.vlgmr.msra.gmra.mxu0 %vm134_vm1, %v3221_v1 }
 0xeb1   :  { %3395 = vmatpush.msra.mxu0 %v5081_v33 }
 0xeb8   :  { %3566 = vmatmul.msk.f32.vlgmr.msrb.gmra.mxu0 %vm134_vm1, %v3222_v51 }
 0xec0   :  { %3567 = vmatmul.msk.f32.vlgmr.msra.gmra.mxu0 %vm134_vm1, %v3223_v47 }
 0xf05   :  { %v3243_v58 = vpop.f32.mrf.mxu0 }
 0xf06   :  { %3401 = vst.msk [vmem:[#allocation2] sm:$0x1] %vm3400_vm5, %v3243_v58 }
 0xf0d   :  { %v3265_v55 = vpop.f32.mrf.mxu0 }
 0xf0e   :  { %3402 = vst.msk [vmem:[#allocation2 + $0x1] sm:$0x1] %vm3400_vm5, %v3265_v55 }
 0xf15   :  { %v3287_v57 = vpop.f32.mrf.mxu0 }
 0xf16   :  { %3403 = vst.msk [vmem:[#allocation2 + $0x2] sm:$0x1] %vm3400_vm5, %v3287_v57 }
 0xf1d   :  { %v3309_v40 = vpop.f32.mrf.mxu0 }
 0xf1e   :  { %3404 = vst.msk [vmem:[#allocation2 + $0x3] sm:$0x1] %vm3400_vm5, %v3309_v40 }
 0xf25   :  { %v3331_v41 = vpop.f32.mrf.mxu0 }
 0xf26   :  { %3405 = vst.msk [vmem:[#allocation2 + $0x4] sm:$0x1] %vm3400_vm5, %v3331_v41 }
 0xf2d   :  { %v3353_v10 = vpop.f32.mrf.mxu0 }
 0xf2e   :  { %3406 = vst.msk [vmem:[#allocation2 + $0x5] sm:$0x1] %vm3400_vm5, %v3353_v10 }
 0xf35   :  { %v3375_v34 = vpop.f32.mrf.mxu0 }
 0xf36   :  { %3407 = vst.msk [vmem:[#allocation2 + $0x6] sm:$0x1] %vm3400_vm5, %v3375_v34 }
 0xf3d   :  { %v3397_v37 = vpop.f32.mrf.mxu0 }
 0xf3e   :  { %3408 = vst.msk [vmem:[#allocation2 + $0x7] sm:$0x1] %vm3400_vm5, %v3397_v37 }
 0xf3f   :  { %3423 = dma.vmem_to_hbm [thread:$0]  %s3416_s30, 128, %s3418_s13, [#allocation3], %s3867_s26, %s3867_s26, %s3873_s14  }
 0xf40   :  { %3857 = dma.done.wait [#allocation3], 128  }
 0xf41   :  { %3858 = vsyncadd [#allocation3], 4294967168 }
 0xf42   :  { %3430 = vsyncpa [#allocation3], 1 }

</bundles_post_ra>
